<compile_context>
chip_gen: v7x
topology: tpu7x:2x2x1
jax: 0.10.0
libtpu: 0.0.40
codegen_flags: <defaults>
</compile_context>

<pallas_src>
import functools
import math

import jax
import jax.numpy as jnp
from jax.experimental import pallas as pl
from jax.experimental.pallas import tpu as pltpu

F32 = jnp.float32
BF16 = jnp.bfloat16
_MM_DTYPE = jnp.bfloat16            # MXU operand dtype (f32 accumulation everywhere)
_LN_EPS_BERT = 1e-12                # BERT encoder LayerNorm eps
_LN_EPS_DEC = 1e-5                  # nn.TransformerDecoder-style LayerNorm eps


# --------------------- generation-dependent configuration ---------------------

def _vmem_capacity_bytes():
    try:
        info = pltpu.get_tpu_info()
        cap = getattr(info, "vmem_capacity_bytes", None)
        if cap:
            return int(cap)
    except Exception:
        pass
    return 64 * 1024 * 1024          # conservative default (v7x per-core VMEM)


_VMEM_CAP = _vmem_capacity_bytes()
_LARGE_VMEM = _VMEM_CAP >= 96 * 1024 * 1024              # v5e / v6e (128 MiB VMEM)
_VMEM_LIMIT = min(_VMEM_CAP * 3 // 4, 100 * 1024 * 1024)  # ~48 MiB v7x, ~96 MiB v5e/v6e

_TM_LINEAR = 512 if _LARGE_VMEM else 256
_TN_LINEAR = 512 if _LARGE_VMEM else 256
_TK_LINEAR = 512
_TM_FUSED = 256                      # rows for fused (proj/FFN + LN) kernels
_TM_LN = 1024 if _LARGE_VMEM else 512
_TF_FFN = 2048 if _LARGE_VMEM else 1024   # d_ff chunk for the FFN inner axis
_TM_LMHEAD = 2048 if _LARGE_VMEM else 1024  # stream the vocab weight as few times as possible
_TQ_ATTN = 256                       # query-sequence tile for attention


def _mosaic(sem):
    return pltpu.CompilerParams(dimension_semantics=sem,
                                vmem_limit_bytes=_VMEM_LIMIT)


# ------------------------------ small helpers ------------------------------

def _pick_tile(dim, target, aligns):
    """Largest tile <= target that divides dim and is a multiple of one of `aligns`
    (tried in preference order), else the full dim (full-extent blocks are legal)."""
    if dim <= target:
        return dim
    for a in aligns:
        t = (target // a) * a
        while t >= a:
            if dim % t == 0:
                return t
            t -= a
    return dim


def _mm(a, b):
    # a: (M, K), b: (N, K) -> (M, N).  Contract K of both operands (no transpose);
    # bf16 MXU operands, f32 accumulation.
    return jax.lax.dot_general(
        a.astype(_MM_DTYPE), b.astype(_MM_DTYPE),
        (((1,), (1,)), ((), ())),
        preferred_element_type=jnp.float32)


def _ln(z, g, b, eps):
    mu = jnp.mean(z, axis=-1, keepdims=True)
    var = jnp.mean(jnp.square(z - mu), axis=-1, keepdims=True)
    return (z - mu) * jax.lax.rsqrt(var + eps) * g + b


# ----------------------------- Pallas kernels ------------------------------

def _linear_kernel(x_ref, w_ref, b_ref, o_ref, acc_ref):
    # grid = (M/tm, N/tn, K/tk); K innermost ("arbitrary"), f32 acc in VMEM.
    @pl.when(pl.program_id(2) == 0)
    def _():
        acc_ref[...] = jnp.zeros_like(acc_ref)

    acc_ref[...] += _mm(x_ref[...], w_ref[...])

    @pl.when(pl.program_id(2) == pl.num_programs(2) - 1)
    def _():
        o_ref[...] = (acc_ref[...] + b_ref[...].astype(F32)).astype(o_ref.dtype)


def linear(x2d, w, b, *, tm_target=None, out_dtype=BF16):
    # x2d: (M, K) bf16; w: (N, K) PyTorch-style bf16; b: (N,) f32.
    M, K = x2d.shape
    N = w.shape[0]
    tm = _pick_tile(M, tm_target or _TM_LINEAR, (128, 16))
    tn = _pick_tile(N, _TN_LINEAR, (256, 128))
    tk = _pick_tile(K, _TK_LINEAR, (256, 128))
    return pl.pallas_call(
        _linear_kernel,
        grid=(M // tm, N // tn, K // tk),
        in_specs=[pl.BlockSpec((tm, tk), lambda i, j, k: (i, k)),
                  pl.BlockSpec((tn, tk), lambda i, j, k: (j, k)),
                  pl.BlockSpec((1, tn), lambda i, j, k: (0, j))],
        out_specs=pl.BlockSpec((tm, tn), lambda i, j, k: (i, j)),
        out_shape=jax.ShapeDtypeStruct((M, N), out_dtype),
        scratch_shapes=[pltpu.VMEM((tm, tn), jnp.float32)],
        compiler_params=_mosaic(("parallel", "parallel", "arbitrary")),
    )(x2d, w, b.reshape(1, N))


def _qkv_proj_kernel(x_ref, wq_ref, bq_ref, wkv_ref, bkv_ref, q_ref, kv_ref):
    # One read of x produces both the q projection and the fused (k|v) projection,
    # so the attention kernel never needs JAX-side lane slices of a fused qkv tensor.
    x = x_ref[...]
    q_ref[...] = (_mm(x, wq_ref[...]) + bq_ref[...].astype(F32)).astype(q_ref.dtype)
    kv_ref[...] = (_mm(x, wkv_ref[...]) + bkv_ref[...].astype(F32)).astype(kv_ref.dtype)


def qkv_proj(x2d, wq, bq, wkv, bkv):
    M, K = x2d.shape
    D = wq.shape[0]
    tm = _pick_tile(M, _TM_FUSED, (128, 16))
    return pl.pallas_call(
        _qkv_proj_kernel,
        grid=(M // tm,),
        in_specs=[pl.BlockSpec((tm, K), lambda i: (i, 0)),
                  pl.BlockSpec((D, K), lambda i: (0, 0)),
                  pl.BlockSpec((1, D), lambda i: (0, 0)),
                  pl.BlockSpec((2 * D, K), lambda i: (0, 0)),
                  pl.BlockSpec((1, 2 * D), lambda i: (0, 0))],
        out_specs=[pl.BlockSpec((tm, D), lambda i: (i, 0)),
                   pl.BlockSpec((tm, 2 * D), lambda i: (i, 0))],
        out_shape=(jax.ShapeDtypeStruct((M, D), BF16),
                   jax.ShapeDtypeStruct((M, 2 * D), BF16)),
        compiler_params=_mosaic(("parallel",)),
    )(x2d, wq, bq.reshape(1, D), wkv, bkv.reshape(1, 2 * D))


def _ln_kernel(x_ref, g_ref, b_ref, o_ref, *, eps):
    x = x_ref[...].astype(F32)
    o_ref[...] = _ln(x, g_ref[...], b_ref[...], eps).astype(o_ref.dtype)


def layer_norm(x2d, gamma, beta, eps=_LN_EPS_BERT):
    M, D = x2d.shape
    tm = _pick_tile(M, _TM_LN, (128, 16))
    return pl.pallas_call(
        functools.partial(_ln_kernel, eps=eps),
        grid=(M // tm,),
        in_specs=[pl.BlockSpec((tm, D), lambda i: (i, 0)),
                  pl.BlockSpec((1, D), lambda i: (0, 0)),
                  pl.BlockSpec((1, D), lambda i: (0, 0))],
        out_specs=pl.BlockSpec((tm, D), lambda i: (i, 0)),
        out_shape=jax.ShapeDtypeStruct((M, D), BF16),
        compiler_params=_mosaic(("parallel",)),
    )(x2d, gamma.reshape(1, D), beta.reshape(1, D))


def _linear_add_ln_kernel(x_ref, w_ref, b_ref, r_ref, g_ref, be_ref, o_ref, *, eps):
    # y = x @ W^T + b ; out = LN(residual + y)
    y = _mm(x_ref[...], w_ref[...]) + b_ref[...].astype(F32)
    z = r_ref[...].astype(F32) + y
    o_ref[...] = _ln(z, g_ref[...], be_ref[...], eps).astype(o_ref.dtype)


def linear_add_ln(x2d, w, b, res2d, gamma, beta, eps):
    M, K = x2d.shape
    N = w.shape[0]
    tm = _pick_tile(M, _TM_FUSED, (128, 16))
    return pl.pallas_call(
        functools.partial(_linear_add_ln_kernel, eps=eps),
        grid=(M // tm,),
        in_specs=[pl.BlockSpec((tm, K), lambda i: (i, 0)),
                  pl.BlockSpec((N, K), lambda i: (0, 0)),
                  pl.BlockSpec((1, N), lambda i: (0, 0)),
                  pl.BlockSpec((tm, N), lambda i: (i, 0)),
                  pl.BlockSpec((1, N), lambda i: (0, 0)),
                  pl.BlockSpec((1, N), lambda i: (0, 0))],
        out_specs=pl.BlockSpec((tm, N), lambda i: (i, 0)),
        out_shape=jax.ShapeDtypeStruct((M, N), BF16),
        compiler_params=_mosaic(("parallel",)),
    )(x2d, w, b.reshape(1, N), res2d, gamma.reshape(1, N), beta.reshape(1, N))


def _ffn_add_ln_kernel(x_ref, w1_ref, b1_ref, w2_ref, b2_ref, g_ref, be_ref,
                       o_ref, acc_ref, *, activation, eps):
    # grid = (M/tm, d_ff/tf): d_ff chunked on the inner "arbitrary" axis so only one
    # (tf, D)/(D, tf) weight chunk and one (tm, tf) f32 hidden are live at a time
    # (v7x 64 MiB VMEM safe); residual + bias2 + LayerNorm fused at the last chunk.
    @pl.when(pl.program_id(1) == 0)
    def _():
        acc_ref[...] = jnp.zeros_like(acc_ref)

    x = x_ref[...]
    h = _mm(x, w1_ref[...]) + b1_ref[...].astype(F32)
    if activation == "gelu":
        h = jax.nn.gelu(h, approximate=True)
    else:  # relu
        h = jnp.maximum(h, 0.0)
    acc_ref[...] += _mm(h, w2_ref[...])

    @pl.when(pl.program_id(1) == pl.num_programs(1) - 1)
    def _():
        z = x.astype(F32) + acc_ref[...] + b2_ref[...].astype(F32)
        o_ref[...] = _ln(z, g_ref[...], be_ref[...], eps).astype(o_ref.dtype)


def ffn_add_ln(x2d, p, ln_p, activation, eps):
    M, D = x2d.shape
    d_ff = p["w1"].shape[0]
    tm = _pick_tile(M, _TM_FUSED, (128, 16))
    tf = _pick_tile(d_ff, _TF_FFN, (256, 128))
    return pl.pallas_call(
        functools.partial(_ffn_add_ln_kernel, activation=activation, eps=eps),
        grid=(M // tm, d_ff // tf),
        in_specs=[pl.BlockSpec((tm, D), lambda i, f: (i, 0)),
                  pl.BlockSpec((tf, D), lambda i, f: (f, 0)),
                  pl.BlockSpec((1, tf), lambda i, f: (0, f)),
                  pl.BlockSpec((D, tf), lambda i, f: (0, f)),
                  pl.BlockSpec((1, D), lambda i, f: (0, 0)),
                  pl.BlockSpec((1, D), lambda i, f: (0, 0)),
                  pl.BlockSpec((1, D), lambda i, f: (0, 0))],
        out_specs=pl.BlockSpec((tm, D), lambda i, f: (i, 0)),
        out_shape=jax.ShapeDtypeStruct((M, D), BF16),
        scratch_shapes=[pltpu.VMEM((tm, D), jnp.float32)],
        compiler_params=_mosaic(("parallel", "arbitrary")),
    )(x2d, p["w1"], p["b1"].reshape(1, d_ff), p["w2"], p["b2"].reshape(1, D),
      ln_p["g"].reshape(1, D), ln_p["b"].reshape(1, D))


def _attention_kernel(*refs, scale, num_head, mask_mode):
    # q block: (1, tq, H*Dh); kv block: (1, Sk, 2*H*Dh) — lane-dense, heads sliced
    # in-kernel, context written directly into the head's lane slice of o_ref.
    if mask_mode == "bias":
        q_ref, kv_ref, bias_ref, o_ref = refs
    else:
        q_ref, kv_ref, o_ref = refs
    Tq = q_ref.shape[1]
    Sk = kv_ref.shape[1]
    D = q_ref.shape[2]
    Dh = D // num_head

    q = q_ref[0]            # (Tq, D)   bf16
    kv = kv_ref[0]          # (Sk, 2D)  bf16

    if mask_mode == "causal":
        q_off = pl.program_id(1) * Tq
        row = q_off + jax.lax.broadcasted_iota(jnp.int32, (Tq, Sk), 0)
        col = jax.lax.broadcasted_iota(jnp.int32, (Tq, Sk), 1)
        extra_bias = jnp.where(col > row, -1e9, 0.0).astype(F32)
    elif mask_mode == "bias":
        extra_bias = bias_ref[0].astype(F32)     # (1, Sk), broadcast over rows
    else:
        extra_bias = None

    # TODO(synk): for long sequences tile Sk with an online-softmax (flash) accumulator;
    # for very large num_head switch to a fori_loop / (B*H, S, Dh) grid restructure.
    for h in range(num_head):
        qh = q[:, h * Dh:(h + 1) * Dh]
        kh = kv[:, h * Dh:(h + 1) * Dh]
        vh = kv[:, D + h * Dh:D + (h + 1) * Dh]
        s = jax.lax.dot_general(
            qh.astype(_MM_DTYPE), kh.astype(_MM_DTYPE),
            (((1,), (1,)), ((), ())),
            preferred_element_type=jnp.float32) * scale
        if extra_bias is not None:
            s = s + extra_bias
        s = s - jnp.max(s, axis=-1, keepdims=True)
        p = jnp.exp(s)
        p = p * pl.reciprocal(jnp.sum(p, axis=-1, keepdims=True), approx=True)
        ctx = jnp.dot(p.astype(_MM_DTYPE), vh.astype(_MM_DTYPE),
                      preferred_element_type=jnp.float32)
        # direct per-head store: no concatenate, bounded live ranges
        o_ref[0, :, h * Dh:(h + 1) * Dh] = ctx.astype(o_ref.dtype)


def attention(q, kv, *, num_head, mask_mode, bias=None):
    # q: (B, Sq, D); kv: (B, Sk, 2D) fused [k|v]; bias (optional): (B, 1, Sk) additive.
    B, Sq, D = q.shape
    Sk = kv.shape[1]
    scale = 1.0 / math.sqrt(D // num_head)
    tq = _pick_tile(Sq, _TQ_ATTN, (128, 16))

    in_specs = [pl.BlockSpec((1, tq, D), lambda b, s: (b, s, 0)),
                pl.BlockSpec((1, Sk, 2 * D), lambda b, s: (b, 0, 0))]
    args = [q, kv]
    if mask_mode == "bias":
        in_specs.append(pl.BlockSpec((1, 1, Sk), lambda b, s: (b, 0, 0)))
        args.append(bias)

    return pl.pallas_call(
        functools.partial(_attention_kernel, scale=scale, num_head=num_head,
                          mask_mode=mask_mode),
        grid=(B, Sq // tq),
        in_specs=in_specs,
        out_specs=pl.BlockSpec((1, tq, D), lambda b, s: (b, s, 0)),
        out_shape=jax.ShapeDtypeStruct((B, Sq, D), BF16),
        compiler_params=_mosaic(("parallel", "parallel")),
    )(*args)


# ------------------------- model glue (plain JAX) --------------------------

def self_attention_block(p, ln_p, x, num_head, mask_mode, eps):
    B, S, D = x.shape
    x2d = x.reshape(B * S, D)
    q, kv = qkv_proj(x2d, p["wq"]["w"], p["wq"]["b"], p["wkv"]["w"], p["wkv"]["b"])
    ctx = attention(q.reshape(B, S, D), kv.reshape(B, S, 2 * D),
                    num_head=num_head, mask_mode=mask_mode)
    out = linear_add_ln(ctx.reshape(B * S, D), p["wo"]["w"], p["wo"]["b"],
                        x2d, ln_p["g"], ln_p["b"], eps)
    return out.reshape(B, S, D)


def cross_attention_block(p, ln_p, x, memory, src_bias, num_head, eps):
    B, St, D = x.shape
    Ss = memory.shape[1]
    x2d = x.reshape(B * St, D)
    q = linear(x2d, p["wq"]["w"], p["wq"]["b"]).reshape(B, St, D)
    kv = linear(memory.reshape(B * Ss, D), p["wkv"]["w"], p["wkv"]["b"]).reshape(B, Ss, 2 * D)
    ctx = attention(q, kv, num_head=num_head, mask_mode="bias", bias=src_bias)
    out = linear_add_ln(ctx.reshape(B * St, D), p["wo"]["w"], p["wo"]["b"],
                        x2d, ln_p["g"], ln_p["b"], eps)
    return out.reshape(B, St, D)


def ffn_block(p, ln_p, x, activation, eps):
    B, S, D = x.shape
    return ffn_add_ln(x.reshape(B * S, D), p, ln_p, activation, eps).reshape(B, S, D)


def encoder_forward(p, input_ids, num_head):
    B, S = input_ids.shape
    emb = (p["word_emb"][input_ids].astype(F32)
           + p["pos_emb"][:S][None].astype(F32)
           + p["type_emb"][0][None, None].astype(F32)).astype(BF16)
    D = emb.shape[-1]
    x = layer_norm(emb.reshape(B * S, D), p["emb_ln"]["g"], p["emb_ln"]["b"],
                   eps=_LN_EPS_BERT).reshape(B, S, D)
    # BERT encoder is called without an attention_mask in Seq2Seq.forward -> no masking.
    for lyr in p["layers"]:
        x = self_attention_block(lyr["attn"], lyr["attn_ln"], x, num_head,
                                 mask_mode="none", eps=_LN_EPS_BERT)
        x = ffn_block(lyr["ffn"], lyr["ffn_ln"], x, "gelu", _LN_EPS_BERT)
    return x


def decoder_forward(p, tgt_ids, memory, src_bias, num_head):
    B, St = tgt_ids.shape
    D = memory.shape[-1]
    x = (p["word_emb"][tgt_ids].astype(F32) * math.sqrt(D)
         + p["pos_enc"][:St][None].astype(F32)).astype(BF16)
    for lyr in p["layers"]:
        x = self_attention_block(lyr["self_attn"], lyr["ln1"], x, num_head,
                                 mask_mode="causal", eps=_LN_EPS_DEC)
        x = cross_attention_block(lyr["cross_attn"], lyr["ln2"], x, memory,
                                  src_bias, num_head, _LN_EPS_DEC)
        x = ffn_block(lyr["ffn"], lyr["ln3"], x, "relu", _LN_EPS_DEC)
    return x


def seq2seq_forward(params, input_ids, attention_mask, tgt_ids, num_head):
    src_hidden = encoder_forward(params["encoder"], input_ids, num_head)
    B, St = tgt_ids.shape
    D = src_hidden.shape[-1]

    # src padding mask for cross-attention kept as (B, 1, Ss); the attention kernel
    # broadcasts it on the fly.  The causal mask is generated in-kernel via iota.
    src_bias = jnp.where(attention_mask[:, None, :] == 1, 0.0, -1e9).astype(F32)

    out = decoder_forward(params["decoder"], tgt_ids, src_hidden, src_bias, num_head)
    # lm_head: weight tied to the decoder word embedding (tgt_vocab, d_model), bf16
    # weight stream; large tm so the vocab-sized weight is re-read as few times as
    # possible; logits emitted in f32 (model output).
    logits = linear(out.reshape(B * St, D),
                    params["decoder"]["word_emb"],
                    params["lm_head_bias"],
                    tm_target=_TM_LMHEAD,
                    out_dtype=F32)
    return logits.reshape(B, St, -1)


# --------------------------- parameter creation ----------------------------

def init_linear_p(key, out_dim, in_dim):
    kw, kb = jax.random.split(key)
    return {"w": (jax.random.normal(kw, (out_dim, in_dim), F32) * 0.02).astype(BF16),
            "b": jax.random.normal(kb, (out_dim,), F32) * 0.02}


def init_ln(D):
    return {"g": jnp.ones((D,), F32), "b": jnp.zeros((D,), F32)}


def init_self_mha(key, D):
    ks = jax.random.split(key, 3)
    return {"wq": init_linear_p(ks[0], D, D),
            "wkv": init_linear_p(ks[1], 2 * D, D),   # fused K/V projection
            "wo": init_linear_p(ks[2], D, D)}


def init_cross_mha(key, D):
    ks = jax.random.split(key, 3)
    return {"wq": init_linear_p(ks[0], D, D),
            "wkv": init_linear_p(ks[1], 2 * D, D),   # fused K/V projection
            "wo": init_linear_p(ks[2], D, D)}


def init_ffn(key, D, d_ff):
    k1, k2 = jax.random.split(key)
    l1, l2 = init_linear_p(k1, d_ff, D), init_linear_p(k2, D, d_ff)
    return {"w1": l1["w"], "b1": l1["b"], "w2": l2["w"], "b2": l2["b"]}


def sinusoidal_pe(max_len, d_model):
    pos = jnp.arange(max_len, dtype=F32)[:, None]
    i = jnp.arange(0, d_model, 2, dtype=F32)
    div = jnp.exp(-jnp.log(10000.0) * i / d_model)
    pe = jnp.zeros((max_len, d_model), F32)
    pe = pe.at[:, 0::2].set(jnp.sin(pos * div))
    pe = pe.at[:, 1::2].set(jnp.cos(pos * div))
    return pe.astype(BF16)


def init_params(key, *, src_vocab, tgt_vocab, d_model, n_head, d_ff,
                n_enc_layer, n_dec_layer, max_pos):
    k_enc, k_dec, k_lm = jax.random.split(key, 3)

    ek = jax.random.split(k_enc, 3 + n_enc_layer)
    encoder = {
        "word_emb": (jax.random.normal(ek[0], (src_vocab, d_model), F32) * 0.02).astype(BF16),
        "pos_emb": (jax.random.normal(ek[1], (max_pos, d_model), F32) * 0.02).astype(BF16),
        "type_emb": (jax.random.normal(ek[2], (2, d_model), F32) * 0.02).astype(BF16),
        "emb_ln": init_ln(d_model),
        "layers": [],
    }
    for i in range(n_enc_layer):
        la, lf = jax.random.split(ek[3 + i])
        encoder["layers"].append({
            "attn": init_self_mha(la, d_model), "attn_ln": init_ln(d_model),
            "ffn": init_ffn(lf, d_model, d_ff), "ffn_ln": init_ln(d_model),
        })

    dk = jax.random.split(k_dec, 1 + n_dec_layer)
    decoder = {
        "word_emb": (jax.random.normal(dk[0], (tgt_vocab, d_model), F32) * 0.02).astype(BF16),
        "pos_enc": sinusoidal_pe(max_pos, d_model),
        "layers": [],
    }
    for i in range(n_dec_layer):
        ls, lc, lf = jax.random.split(dk[1 + i], 3)
        decoder["layers"].append({
            "self_attn": init_self_mha(ls, d_model), "ln1": init_ln(d_model),
            "cross_attn": init_cross_mha(lc, d_model), "ln2": init_ln(d_model),
            "ffn": init_ffn(lf, d_model, d_ff), "ln3": init_ln(d_model),
        })

    return {
        "encoder": encoder,
        "decoder": decoder,
        "lm_head_bias": jax.random.normal(k_lm, (tgt_vocab,), F32) * 0.02,
    }


# ---------------------------------- main -----------------------------------

if __name__ == "__main__":
    SRC_VOCAB, TGT_VOCAB = 50, 40
    D_MODEL, N_HEAD, D_FF = 32, 4, 64
    N_ENC_LAYER, N_DEC_LAYER = 2, 2
    MAX_POS = 32
    B, S_SRC, S_TGT = 2, 8, 8

    key = jax.random.PRNGKey(0)
    k_params, k_data = jax.random.split(key)
    params = init_params(k_params, src_vocab=SRC_VOCAB, tgt_vocab=TGT_VOCAB,
                         d_model=D_MODEL, n_head=N_HEAD, d_ff=D_FF,
                         n_enc_layer=N_ENC_LAYER, n_dec_layer=N_DEC_LAYER,
                         max_pos=MAX_POS)

    k1, k2 = jax.random.split(k_data)
    input_ids = jax.random.randint(k1, (B, S_SRC), 1, SRC_VOCAB, dtype=jnp.int32)
    attention_mask = jnp.ones((B, S_SRC), jnp.int32).at[1, -2:].set(0)
    tgt_ids = jax.random.randint(k2, (B, S_TGT), 1, TGT_VOCAB, dtype=jnp.int32)

    fwd = jax.jit(seq2seq_forward, static_argnames=("num_head",))
    logits = fwd(params, input_ids, attention_mask, tgt_ids, num_head=N_HEAD)
    logits = jax.block_until_ready(logits)
    assert logits.shape == (B, S_TGT, TGT_VOCAB)
    assert bool(jnp.isfinite(logits).all())
    print("KERNEL_OK")
</pallas_src>

<mosaic_0001>
module attributes {stable_mosaic.version = 11 : i64} {
  func.func @_ln_kernel(%arg0: i32, %arg1: memref<16x32xbf16, #tpu.memory_space<vmem>>, %arg2: memref<1x32xf32, #tpu.memory_space<vmem>>, %arg3: memref<1x32xf32, #tpu.memory_space<vmem>>, %arg4: memref<16x32xbf16, #tpu.memory_space<vmem>>) attributes {dimension_semantics = [#tpu.dimension_semantics<parallel>], iteration_bounds = array<i64: 1>, scalar_prefetch = 0 : i64, scratch_operands = 0 : i64, tpu.core_type = #tpu.core_type<tc>, window_params = [{transform_indices = @transform_0, window_bounds = array<i64: 16, 32>}, {pipeline_mode = #tpu.pipeline_mode<synchronous>, transform_indices = @transform_1, window_bounds = array<i64: 1, 32>}, {pipeline_mode = #tpu.pipeline_mode<synchronous>, transform_indices = @transform_2, window_bounds = array<i64: 1, 32>}, {transform_indices = @transform_3, window_bounds = array<i64: 16, 32>}]} {
    %c0 = arith.constant 0 : index
    %c0_0 = arith.constant 0 : index
    %0 = vector.load %arg1[%c0, %c0_0] : memref<16x32xbf16, #tpu.memory_space<vmem>>, vector<16x32xbf16>
    %1 = arith.extf %0 : vector<16x32xbf16> to vector<16x32xf32>
    %c0_1 = arith.constant 0 : index
    %c0_2 = arith.constant 0 : index
    %2 = vector.load %arg2[%c0_1, %c0_2] : memref<1x32xf32, #tpu.memory_space<vmem>>, vector<1x32xf32>
    %c0_3 = arith.constant 0 : index
    %c0_4 = arith.constant 0 : index
    %3 = vector.load %arg3[%c0_3, %c0_4] : memref<1x32xf32, #tpu.memory_space<vmem>>, vector<1x32xf32>
    %cst = arith.constant dense<0.000000e+00> : vector<16xf32>
    %4 = vector.multi_reduction <add>, %1, %cst [1] : vector<16x32xf32> to vector<16xf32>
    %5 = vector.shape_cast %4 : vector<16xf32> to vector<16x1xf32>
    %cst_5 = arith.constant 3.200000e+01 : f32
    %6 = vector.broadcast %cst_5 : f32 to vector<16x1xf32>
    %7 = arith.divf %5, %6 : vector<16x1xf32>
    %8 = vector.broadcast %7 : vector<16x1xf32> to vector<16x32xf32>
    %9 = arith.subf %1, %8 : vector<16x32xf32>
    %10 = arith.mulf %9, %9 : vector<16x32xf32>
    %cst_6 = arith.constant dense<0.000000e+00> : vector<16xf32>
    %11 = vector.multi_reduction <add>, %10, %cst_6 [1] : vector<16x32xf32> to vector<16xf32>
    %12 = vector.shape_cast %11 : vector<16xf32> to vector<16x1xf32>
    %cst_7 = arith.constant 3.200000e+01 : f32
    %13 = vector.broadcast %cst_7 : f32 to vector<16x1xf32>
    %14 = arith.divf %12, %13 : vector<16x1xf32>
    %15 = vector.broadcast %7 : vector<16x1xf32> to vector<16x32xf32>
    %16 = arith.subf %1, %15 : vector<16x32xf32>
    %cst_8 = arith.constant 9.99999996E-13 : f32
    %17 = vector.broadcast %cst_8 : f32 to vector<16x1xf32>
    %18 = arith.addf %14, %17 : vector<16x1xf32>
    %19 = math.rsqrt %18 : vector<16x1xf32>
    %20 = vector.broadcast %19 : vector<16x1xf32> to vector<16x32xf32>
    %21 = arith.mulf %16, %20 : vector<16x32xf32>
    %22 = vector.broadcast %2 : vector<1x32xf32> to vector<16x32xf32>
    %23 = arith.mulf %21, %22 : vector<16x32xf32>
    %24 = vector.broadcast %3 : vector<1x32xf32> to vector<16x32xf32>
    %25 = arith.addf %23, %24 : vector<16x32xf32>
    %26 = arith.truncf %25 : vector<16x32xf32> to vector<16x32xbf16>
    %c0_9 = arith.constant 0 : index
    %c0_10 = arith.constant 0 : index
    %27 = vector.load %arg4[%c0_9, %c0_10] : memref<16x32xbf16, #tpu.memory_space<vmem>>, vector<16x32xbf16>
    tpu.vector_store %arg4[%c0_9, %c0_10], %26 {strides = array<i32>} : memref<16x32xbf16, #tpu.memory_space<vmem>>, vector<16x32xbf16>,
    return
  }
  func.func @transform_0(%arg0: i32) -> (i32, i32) {
    %c0_i32 = arith.constant 0 : i32
    %c0_i32_0 = arith.constant 0 : i32
    return %arg0, %c0_i32 : i32, i32
  }
  func.func @transform_1(%arg0: i32) -> (i32, i32) {
    %c0_i32 = arith.constant 0 : i32
    %c0_i32_0 = arith.constant 0 : i32
    %c0_i32_1 = arith.constant 0 : i32
    return %c0_i32, %c0_i32_0 : i32, i32
  }
  func.func @transform_2(%arg0: i32) -> (i32, i32) {
    %c0_i32 = arith.constant 0 : i32
    %c0_i32_0 = arith.constant 0 : i32
    %c0_i32_1 = arith.constant 0 : i32
    return %c0_i32, %c0_i32_0 : i32, i32
  }
  func.func @transform_3(%arg0: i32) -> (i32, i32) {
    %c0_i32 = arith.constant 0 : i32
    %c0_i32_0 = arith.constant 0 : i32
    return %arg0, %c0_i32 : i32, i32
  }
}

module attributes {stable_mosaic.version = 11 : i64} {
  func.func @_qkv_proj_kernel(%arg0: i32, %arg1: memref<16x32xbf16, #tpu.memory_space<vmem>>, %arg2: memref<32x32xbf16, #tpu.memory_space<vmem>>, %arg3: memref<1x32xf32, #tpu.memory_space<vmem>>, %arg4: memref<64x32xbf16, #tpu.memory_space<vmem>>, %arg5: memref<1x64xf32, #tpu.memory_space<vmem>>, %arg6: memref<16x32xbf16, #tpu.memory_space<vmem>>, %arg7: memref<16x64xbf16, #tpu.memory_space<vmem>>) attributes {dimension_semantics = [#tpu.dimension_semantics<parallel>], iteration_bounds = array<i64: 1>, scalar_prefetch = 0 : i64, scratch_operands = 0 : i64, tpu.core_type = #tpu.core_type<tc>, window_params = [{transform_indices = @transform_0, window_bounds = array<i64: 16, 32>}, {pipeline_mode = #tpu.pipeline_mode<synchronous>, transform_indices = @transform_1, window_bounds = array<i64: 32, 32>}, {pipeline_mode = #tpu.pipeline_mode<synchronous>, transform_indices = @transform_2, window_bounds = array<i64: 1, 32>}, {pipeline_mode = #tpu.pipeline_mode<synchronous>, transform_indices = @transform_3, window_bounds = array<i64: 64, 32>}, {pipeline_mode = #tpu.pipeline_mode<synchronous>, transform_indices = @transform_4, window_bounds = array<i64: 1, 64>}, {transform_indices = @transform_5, window_bounds = array<i64: 16, 32>}, {transform_indices = @transform_6, window_bounds = array<i64: 16, 64>}]} {
    %c0 = arith.constant 0 : index
    %c0_0 = arith.constant 0 : index
    %0 = vector.load %arg1[%c0, %c0_0] : memref<16x32xbf16, #tpu.memory_space<vmem>>, vector<16x32xbf16>
    %c0_1 = arith.constant 0 : index
    %c0_2 = arith.constant 0 : index
    %1 = vector.load %arg2[%c0_1, %c0_2] : memref<32x32xbf16, #tpu.memory_space<vmem>>, vector<32x32xbf16>
    %cst = arith.constant dense<0.000000e+00> : vector<16x32xf32>
    %2 = tpu.matmul %0, %1, %cst {dimension_numbers = #tpu.dot_dimension_numbers<[1], [1], [0], [0], [0, 0, 1, 0], [], []>} : vector<16x32xbf16>, vector<32x32xbf16>, vector<16x32xf32> -> vector<16x32xf32>
    %c0_3 = arith.constant 0 : index
    %c0_4 = arith.constant 0 : index
    %3 = vector.load %arg3[%c0_3, %c0_4] : memref<1x32xf32, #tpu.memory_space<vmem>>, vector<1x32xf32>
    %4 = vector.broadcast %3 : vector<1x32xf32> to vector<16x32xf32>
    %5 = arith.addf %2, %4 : vector<16x32xf32>
    %6 = arith.truncf %5 : vector<16x32xf32> to vector<16x32xbf16>
    %c0_5 = arith.constant 0 : index
    %c0_6 = arith.constant 0 : index
    %7 = vector.load %arg6[%c0_5, %c0_6] : memref<16x32xbf16, #tpu.memory_space<vmem>>, vector<16x32xbf16>
    tpu.vector_store %arg6[%c0_5, %c0_6], %6 {strides = array<i32>} : memref<16x32xbf16, #tpu.memory_space<vmem>>, vector<16x32xbf16>,
    %c0_7 = arith.constant 0 : index
    %c0_8 = arith.constant 0 : index
    %8 = vector.load %arg4[%c0_7, %c0_8] : memref<64x32xbf16, #tpu.memory_space<vmem>>, vector<64x32xbf16>
    %cst_9 = arith.constant dense<0.000000e+00> : vector<16x64xf32>
    %9 = tpu.matmul %0, %8, %cst_9 {dimension_numbers = #tpu.dot_dimension_numbers<[1], [1], [0], [0], [0, 0, 1, 0], [], []>} : vector<16x32xbf16>, vector<64x32xbf16>, vector<16x64xf32> -> vector<16x64xf32>
    %c0_10 = arith.constant 0 : index
    %c0_11 = arith.constant 0 : index
    %10 = vector.load %arg5[%c0_10, %c0_11] : memref<1x64xf32, #tpu.memory_space<vmem>>, vector<1x64xf32>
    %11 = vector.broadcast %10 : vector<1x64xf32> to vector<16x64xf32>
    %12 = arith.addf %9, %11 : vector<16x64xf32>
    %13 = arith.truncf %12 : vector<16x64xf32> to vector<16x64xbf16>
    %c0_12 = arith.constant 0 : index
    %c0_13 = arith.constant 0 : index
    %14 = vector.load %arg7[%c0_12, %c0_13] : memref<16x64xbf16, #tpu.memory_space<vmem>>, vector<16x64xbf16>
    tpu.vector_store %arg7[%c0_12, %c0_13], %13 {strides = array<i32>} : memref<16x64xbf16, #tpu.memory_space<vmem>>, vector<16x64xbf16>,
    return
  }
  func.func @transform_0(%arg0: i32) -> (i32, i32) {
    %c0_i32 = arith.constant 0 : i32
    %c0_i32_0 = arith.constant 0 : i32
    return %arg0, %c0_i32 : i32, i32
  }
  func.func @transform_1(%arg0: i32) -> (i32, i32) {
    %c0_i32 = arith.constant 0 : i32
    %c0_i32_0 = arith.constant 0 : i32
    %c0_i32_1 = arith.constant 0 : i32
    return %c0_i32, %c0_i32_0 : i32, i32
  }
  func.func @transform_2(%arg0: i32) -> (i32, i32) {
    %c0_i32 = arith.constant 0 : i32
    %c0_i32_0 = arith.constant 0 : i32
    %c0_i32_1 = arith.constant 0 : i32
    return %c0_i32, %c0_i32_0 : i32, i32
  }
  func.func @transform_3(%arg0: i32) -> (i32, i32) {
    %c0_i32 = arith.constant 0 : i32
    %c0_i32_0 = arith.constant 0 : i32
    %c0_i32_1 = arith.constant 0 : i32
    return %c0_i32, %c0_i32_0 : i32, i32
  }
  func.func @transform_4(%arg0: i32) -> (i32, i32) {
    %c0_i32 = arith.constant 0 : i32
    %c0_i32_0 = arith.constant 0 : i32
    %c0_i32_1 = arith.constant 0 : i32
    return %c0_i32, %c0_i32_0 : i32, i32
  }
  func.func @transform_5(%arg0: i32) -> (i32, i32) {
    %c0_i32 = arith.constant 0 : i32
    %c0_i32_0 = arith.constant 0 : i32
    return %arg0, %c0_i32 : i32, i32
  }
  func.func @transform_6(%arg0: i32) -> (i32, i32) {
    %c0_i32 = arith.constant 0 : i32
    %c0_i32_0 = arith.constant 0 : i32
    return %arg0, %c0_i32 : i32, i32
  }
}

module attributes {stable_mosaic.version = 11 : i64} {
  func.func @_linear_add_ln_kernel(%arg0: i32, %arg1: memref<16x32xbf16, #tpu.memory_space<vmem>>, %arg2: memref<32x32xbf16, #tpu.memory_space<vmem>>, %arg3: memref<1x32xf32, #tpu.memory_space<vmem>>, %arg4: memref<16x32xbf16, #tpu.memory_space<vmem>>, %arg5: memref<1x32xf32, #tpu.memory_space<vmem>>, %arg6: memref<1x32xf32, #tpu.memory_space<vmem>>, %arg7: memref<16x32xbf16, #tpu.memory_space<vmem>>) attributes {dimension_semantics = [#tpu.dimension_semantics<parallel>], iteration_bounds = array<i64: 1>, scalar_prefetch = 0 : i64, scratch_operands = 0 : i64, tpu.core_type = #tpu.core_type<tc>, window_params = [{transform_indices = @transform_0, window_bounds = array<i64: 16, 32>}, {pipeline_mode = #tpu.pipeline_mode<synchronous>, transform_indices = @transform_1, window_bounds = array<i64: 32, 32>}, {pipeline_mode = #tpu.pipeline_mode<synchronous>, transform_indices = @transform_2, window_bounds = array<i64: 1, 32>}, {transform_indices = @transform_3, window_bounds = array<i64: 16, 32>}, {pipeline_mode = #tpu.pipeline_mode<synchronous>, transform_indices = @transform_4, window_bounds = array<i64: 1, 32>}, {pipeline_mode = #tpu.pipeline_mode<synchronous>, transform_indices = @transform_5, window_bounds = array<i64: 1, 32>}, {transform_indices = @transform_6, window_bounds = array<i64: 16, 32>}]} {
    %c0 = arith.constant 0 : index
    %c0_0 = arith.constant 0 : index
    %0 = vector.load %arg1[%c0, %c0_0] : memref<16x32xbf16, #tpu.memory_space<vmem>>, vector<16x32xbf16>
    %c0_1 = arith.constant 0 : index
    %c0_2 = arith.constant 0 : index
    %1 = vector.load %arg2[%c0_1, %c0_2] : memref<32x32xbf16, #tpu.memory_space<vmem>>, vector<32x32xbf16>
    %cst = arith.constant dense<0.000000e+00> : vector<16x32xf32>
    %2 = tpu.matmul %0, %1, %cst {dimension_numbers = #tpu.dot_dimension_numbers<[1], [1], [0], [0], [0, 0, 1, 0], [], []>} : vector<16x32xbf16>, vector<32x32xbf16>, vector<16x32xf32> -> vector<16x32xf32>
    %c0_3 = arith.constant 0 : index
    %c0_4 = arith.constant 0 : index
    %3 = vector.load %arg3[%c0_3, %c0_4] : memref<1x32xf32, #tpu.memory_space<vmem>>, vector<1x32xf32>
    %4 = vector.broadcast %3 : vector<1x32xf32> to vector<16x32xf32>
    %5 = arith.addf %2, %4 : vector<16x32xf32>
    %c0_5 = arith.constant 0 : index
    %c0_6 = arith.constant 0 : index
    %6 = vector.load %arg4[%c0_5, %c0_6] : memref<16x32xbf16, #tpu.memory_space<vmem>>, vector<16x32xbf16>
    %7 = arith.extf %6 : vector<16x32xbf16> to vector<16x32xf32>
    %8 = arith.addf %7, %5 : vector<16x32xf32>
    %c0_7 = arith.constant 0 : index
    %c0_8 = arith.constant 0 : index
    %9 = vector.load %arg5[%c0_7, %c0_8] : memref<1x32xf32, #tpu.memory_space<vmem>>, vector<1x32xf32>
    %c0_9 = arith.constant 0 : index
    %c0_10 = arith.constant 0 : index
    %10 = vector.load %arg6[%c0_9, %c0_10] : memref<1x32xf32, #tpu.memory_space<vmem>>, vector<1x32xf32>
    %cst_11 = arith.constant dense<0.000000e+00> : vector<16xf32>
    %11 = vector.multi_reduction <add>, %8, %cst_11 [1] : vector<16x32xf32> to vector<16xf32>
    %12 = vector.shape_cast %11 : vector<16xf32> to vector<16x1xf32>
    %cst_12 = arith.constant 3.200000e+01 : f32
    %13 = vector.broadcast %cst_12 : f32 to vector<16x1xf32>
    %14 = arith.divf %12, %13 : vector<16x1xf32>
    %15 = vector.broadcast %14 : vector<16x1xf32> to vector<16x32xf32>
    %16 = arith.subf %8, %15 : vector<16x32xf32>
    %17 = arith.mulf %16, %16 : vector<16x32xf32>
    %cst_13 = arith.constant dense<0.000000e+00> : vector<16xf32>
    %18 = vector.multi_reduction <add>, %17, %cst_13 [1] : vector<16x32xf32> to vector<16xf32>
    %19 = vector.shape_cast %18 : vector<16xf32> to vector<16x1xf32>
    %cst_14 = arith.constant 3.200000e+01 : f32
    %20 = vector.broadcast %cst_14 : f32 to vector<16x1xf32>
    %21 = arith.divf %19, %20 : vector<16x1xf32>
    %22 = vector.broadcast %14 : vector<16x1xf32> to vector<16x32xf32>
    %23 = arith.subf %8, %22 : vector<16x32xf32>
    %cst_15 = arith.constant 9.99999996E-13 : f32
    %24 = vector.broadcast %cst_15 : f32 to vector<16x1xf32>
    %25 = arith.addf %21, %24 : vector<16x1xf32>
    %26 = math.rsqrt %25 : vector<16x1xf32>
    %27 = vector.broadcast %26 : vector<16x1xf32> to vector<16x32xf32>
    %28 = arith.mulf %23, %27 : vector<16x32xf32>
    %29 = vector.broadcast %9 : vector<1x32xf32> to vector<16x32xf32>
    %30 = arith.mulf %28, %29 : vector<16x32xf32>
    %31 = vector.broadcast %10 : vector<1x32xf32> to vector<16x32xf32>
    %32 = arith.addf %30, %31 : vector<16x32xf32>
    %33 = arith.truncf %32 : vector<16x32xf32> to vector<16x32xbf16>
    %c0_16 = arith.constant 0 : index
    %c0_17 = arith.constant 0 : index
    %34 = vector.load %arg7[%c0_16, %c0_17] : memref<16x32xbf16, #tpu.memory_space<vmem>>, vector<16x32xbf16>
    tpu.vector_store %arg7[%c0_16, %c0_17], %33 {strides = array<i32>} : memref<16x32xbf16, #tpu.memory_space<vmem>>, vector<16x32xbf16>,
    return
  }
  func.func @transform_0(%arg0: i32) -> (i32, i32) {
    %c0_i32 = arith.constant 0 : i32
    %c0_i32_0 = arith.constant 0 : i32
    return %arg0, %c0_i32 : i32, i32
  }
  func.func @transform_1(%arg0: i32) -> (i32, i32) {
    %c0_i32 = arith.constant 0 : i32
    %c0_i32_0 = arith.constant 0 : i32
    %c0_i32_1 = arith.constant 0 : i32
    return %c0_i32, %c0_i32_0 : i32, i32
  }
  func.func @transform_2(%arg0: i32) -> (i32, i32) {
    %c0_i32 = arith.constant 0 : i32
    %c0_i32_0 = arith.constant 0 : i32
    %c0_i32_1 = arith.constant 0 : i32
    return %c0_i32, %c0_i32_0 : i32, i32
  }
  func.func @transform_3(%arg0: i32) -> (i32, i32) {
    %c0_i32 = arith.constant 0 : i32
    %c0_i32_0 = arith.constant 0 : i32
    return %arg0, %c0_i32 : i32, i32
  }
  func.func @transform_4(%arg0: i32) -> (i32, i32) {
    %c0_i32 = arith.constant 0 : i32
    %c0_i32_0 = arith.constant 0 : i32
    %c0_i32_1 = arith.constant 0 : i32
    return %c0_i32, %c0_i32_0 : i32, i32
  }
  func.func @transform_5(%arg0: i32) -> (i32, i32) {
    %c0_i32 = arith.constant 0 : i32
    %c0_i32_0 = arith.constant 0 : i32
    %c0_i32_1 = arith.constant 0 : i32
    return %c0_i32, %c0_i32_0 : i32, i32
  }
  func.func @transform_6(%arg0: i32) -> (i32, i32) {
    %c0_i32 = arith.constant 0 : i32
    %c0_i32_0 = arith.constant 0 : i32
    return %arg0, %c0_i32 : i32, i32
  }
}

module attributes {stable_mosaic.version = 11 : i64} {
  func.func @_attention_kernel(%arg0: i32, %arg1: i32, %arg2: memref<1x8x32xbf16, #tpu.memory_space<vmem>>, %arg3: memref<1x8x64xbf16, #tpu.memory_space<vmem>>, %arg4: memref<1x8x32xbf16, #tpu.memory_space<vmem>>) attributes {dimension_semantics = [#tpu.dimension_semantics<parallel>, #tpu.dimension_semantics<parallel>], iteration_bounds = array<i64: 2, 1>, scalar_prefetch = 0 : i64, scratch_operands = 0 : i64, tpu.core_type = #tpu.core_type<tc>, window_params = [{transform_indices = @transform_0, window_bounds = array<i64: 1, 8, 32>}, {transform_indices = @transform_1, window_bounds = array<i64: 1, 8, 64>}, {transform_indices = @transform_2, window_bounds = array<i64: 1, 8, 32>}]} {
    %c0 = arith.constant 0 : index
    %c0_0 = arith.constant 0 : index
    %c0_1 = arith.constant 0 : index
    %0 = vector.load %arg2[%c0, %c0_0, %c0_1] : memref<1x8x32xbf16, #tpu.memory_space<vmem>>, vector<1x8x32xbf16>
    %1 = vector.shape_cast %0 : vector<1x8x32xbf16> to vector<8x32xbf16>
    %c0_2 = arith.constant 0 : index
    %c0_3 = arith.constant 0 : index
    %c0_4 = arith.constant 0 : index
    %2 = vector.load %arg3[%c0_2, %c0_3, %c0_4] : memref<1x8x64xbf16, #tpu.memory_space<vmem>>, vector<1x8x64xbf16>
    %3 = vector.shape_cast %2 : vector<1x8x64xbf16> to vector<8x64xbf16>
    %4 = vector.extract_strided_slice %1 {offsets = [0, 0], sizes = [8, 8], strides = [1, 1]} : vector<8x32xbf16> to vector<8x8xbf16>
    %5 = vector.extract_strided_slice %3 {offsets = [0, 0], sizes = [8, 8], strides = [1, 1]} : vector<8x64xbf16> to vector<8x8xbf16>
    %6 = vector.extract_strided_slice %3 {offsets = [0, 32], sizes = [8, 8], strides = [1, 1]} : vector<8x64xbf16> to vector<8x8xbf16>
    %cst = arith.constant dense<0.000000e+00> : vector<8x8xf32>
    %7 = tpu.matmul %4, %5, %cst {dimension_numbers = #tpu.dot_dimension_numbers<[1], [1], [0], [0], [0, 0, 1, 0], [], []>} : vector<8x8xbf16>, vector<8x8xbf16>, vector<8x8xf32> -> vector<8x8xf32>
    %cst_5 = arith.constant 0.353553385 : f32
    %8 = vector.broadcast %cst_5 : f32 to vector<8x8xf32>
    %9 = arith.mulf %7, %8 : vector<8x8xf32>
    %cst_6 = arith.constant dense<0xFF800000> : vector<8xf32>
    %10 = vector.multi_reduction <maximumf>, %9, %cst_6 [1] : vector<8x8xf32> to vector<8xf32>
    %11 = vector.shape_cast %10 : vector<8xf32> to vector<8x1xf32>
    %12 = vector.broadcast %11 : vector<8x1xf32> to vector<8x8xf32>
    %13 = arith.subf %9, %12 : vector<8x8xf32>
    %14 = math.exp %13 : vector<8x8xf32>
    %cst_7 = arith.constant dense<0.000000e+00> : vector<8xf32>
    %15 = vector.multi_reduction <add>, %14, %cst_7 [1] : vector<8x8xf32> to vector<8xf32>
    %16 = vector.shape_cast %15 : vector<8xf32> to vector<8x1xf32>
    %17 = tpu.reciprocal %16 {approx = true} : vector<8x1xf32> -> vector<8x1xf32>
    %18 = vector.broadcast %17 : vector<8x1xf32> to vector<8x8xf32>
    %19 = arith.mulf %14, %18 : vector<8x8xf32>
    %20 = arith.truncf %19 : vector<8x8xf32> to vector<8x8xbf16>
    %cst_8 = arith.constant dense<0.000000e+00> : vector<8x8xf32>
    %21 = tpu.matmul %20, %6, %cst_8 {dimension_numbers = #tpu.dot_dimension_numbers<[1], [0], [0], [1], [0, 0, 1, 1], [], []>} : vector<8x8xbf16>, vector<8x8xbf16>, vector<8x8xf32> -> vector<8x8xf32>
    %22 = arith.truncf %21 : vector<8x8xf32> to vector<8x8xbf16>
    %c0_9 = arith.constant 0 : index
    %c0_10 = arith.constant 0 : index
    %c0_11 = arith.constant 0 : index
    %23 = vector.load %arg4[%c0_9, %c0_10, %c0_11] : memref<1x8x32xbf16, #tpu.memory_space<vmem>>, vector<1x8x8xbf16>
    %24 = vector.shape_cast %23 : vector<1x8x8xbf16> to vector<8x8xbf16>
    %25 = vector.shape_cast %22 : vector<8x8xbf16> to vector<1x8x8xbf16>
    tpu.vector_store %arg4[%c0_9, %c0_10, %c0_11], %25 {strides = array<i32>} : memref<1x8x32xbf16, #tpu.memory_space<vmem>>, vector<1x8x8xbf16>,
    %26 = vector.extract_strided_slice %1 {offsets = [0, 8], sizes = [8, 8], strides = [1, 1]} : vector<8x32xbf16> to vector<8x8xbf16>
    %27 = vector.extract_strided_slice %3 {offsets = [0, 8], sizes = [8, 8], strides = [1, 1]} : vector<8x64xbf16> to vector<8x8xbf16>
    %28 = vector.extract_strided_slice %3 {offsets = [0, 40], sizes = [8, 8], strides = [1, 1]} : vector<8x64xbf16> to vector<8x8xbf16>
    %cst_12 = arith.constant dense<0.000000e+00> : vector<8x8xf32>
    %29 = tpu.matmul %26, %27, %cst_12 {dimension_numbers = #tpu.dot_dimension_numbers<[1], [1], [0], [0], [0, 0, 1, 0], [], []>} : vector<8x8xbf16>, vector<8x8xbf16>, vector<8x8xf32> -> vector<8x8xf32>
    %cst_13 = arith.constant 0.353553385 : f32
    %30 = vector.broadcast %cst_13 : f32 to vector<8x8xf32>
    %31 = arith.mulf %29, %30 : vector<8x8xf32>
    %cst_14 = arith.constant dense<0xFF800000> : vector<8xf32>
    %32 = vector.multi_reduction <maximumf>, %31, %cst_14 [1] : vector<8x8xf32> to vector<8xf32>
    %33 = vector.shape_cast %32 : vector<8xf32> to vector<8x1xf32>
    %34 = vector.broadcast %33 : vector<8x1xf32> to vector<8x8xf32>
    %35 = arith.subf %31, %34 : vector<8x8xf32>
    %36 = math.exp %35 : vector<8x8xf32>
    %cst_15 = arith.constant dense<0.000000e+00> : vector<8xf32>
    %37 = vector.multi_reduction <add>, %36, %cst_15 [1] : vector<8x8xf32> to vector<8xf32>
    %38 = vector.shape_cast %37 : vector<8xf32> to vector<8x1xf32>
    %39 = tpu.reciprocal %38 {approx = true} : vector<8x1xf32> -> vector<8x1xf32>
    %40 = vector.broadcast %39 : vector<8x1xf32> to vector<8x8xf32>
    %41 = arith.mulf %36, %40 : vector<8x8xf32>
    %42 = arith.truncf %41 : vector<8x8xf32> to vector<8x8xbf16>
    %cst_16 = arith.constant dense<0.000000e+00> : vector<8x8xf32>
    %43 = tpu.matmul %42, %28, %cst_16 {dimension_numbers = #tpu.dot_dimension_numbers<[1], [0], [0], [1], [0, 0, 1, 1], [], []>} : vector<8x8xbf16>, vector<8x8xbf16>, vector<8x8xf32> -> vector<8x8xf32>
    %44 = arith.truncf %43 : vector<8x8xf32> to vector<8x8xbf16>
    %c0_17 = arith.constant 0 : index
    %c0_18 = arith.constant 0 : index
    %c8 = arith.constant 8 : index
    %45 = vector.load %arg4[%c0_17, %c0_18, %c8] : memref<1x8x32xbf16, #tpu.memory_space<vmem>>, vector<1x8x8xbf16>
    %46 = vector.shape_cast %45 : vector<1x8x8xbf16> to vector<8x8xbf16>
    %47 = vector.shape_cast %44 : vector<8x8xbf16> to vector<1x8x8xbf16>
    tpu.vector_store %arg4[%c0_17, %c0_18, %c8], %47 {strides = array<i32>} : memref<1x8x32xbf16, #tpu.memory_space<vmem>>, vector<1x8x8xbf16>,
    %48 = vector.extract_strided_slice %1 {offsets = [0, 16], sizes = [8, 8], strides = [1, 1]} : vector<8x32xbf16> to vector<8x8xbf16>
    %49 = vector.extract_strided_slice %3 {offsets = [0, 16], sizes = [8, 8], strides = [1, 1]} : vector<8x64xbf16> to vector<8x8xbf16>
    %50 = vector.extract_strided_slice %3 {offsets = [0, 48], sizes = [8, 8], strides = [1, 1]} : vector<8x64xbf16> to vector<8x8xbf16>
    %cst_19 = arith.constant dense<0.000000e+00> : vector<8x8xf32>
    %51 = tpu.matmul %48, %49, %cst_19 {dimension_numbers = #tpu.dot_dimension_numbers<[1], [1], [0], [0], [0, 0, 1, 0], [], []>} : vector<8x8xbf16>, vector<8x8xbf16>, vector<8x8xf32> -> vector<8x8xf32>
    %cst_20 = arith.constant 0.353553385 : f32
    %52 = vector.broadcast %cst_20 : f32 to vector<8x8xf32>
    %53 = arith.mulf %51, %52 : vector<8x8xf32>
    %cst_21 = arith.constant dense<0xFF800000> : vector<8xf32>
    %54 = vector.multi_reduction <maximumf>, %53, %cst_21 [1] : vector<8x8xf32> to vector<8xf32>
    %55 = vector.shape_cast %54 : vector<8xf32> to vector<8x1xf32>
    %56 = vector.broadcast %55 : vector<8x1xf32> to vector<8x8xf32>
    %57 = arith.subf %53, %56 : vector<8x8xf32>
    %58 = math.exp %57 : vector<8x8xf32>
    %cst_22 = arith.constant dense<0.000000e+00> : vector<8xf32>
    %59 = vector.multi_reduction <add>, %58, %cst_22 [1] : vector<8x8xf32> to vector<8xf32>
    %60 = vector.shape_cast %59 : vector<8xf32> to vector<8x1xf32>
    %61 = tpu.reciprocal %60 {approx = true} : vector<8x1xf32> -> vector<8x1xf32>
    %62 = vector.broadcast %61 : vector<8x1xf32> to vector<8x8xf32>
    %63 = arith.mulf %58, %62 : vector<8x8xf32>
    %64 = arith.truncf %63 : vector<8x8xf32> to vector<8x8xbf16>
    %cst_23 = arith.constant dense<0.000000e+00> : vector<8x8xf32>
    %65 = tpu.matmul %64, %50, %cst_23 {dimension_numbers = #tpu.dot_dimension_numbers<[1], [0], [0], [1], [0, 0, 1, 1], [], []>} : vector<8x8xbf16>, vector<8x8xbf16>, vector<8x8xf32> -> vector<8x8xf32>
    %66 = arith.truncf %65 : vector<8x8xf32> to vector<8x8xbf16>
    %c0_24 = arith.constant 0 : index
    %c0_25 = arith.constant 0 : index
    %c16 = arith.constant 16 : index
    %67 = vector.load %arg4[%c0_24, %c0_25, %c16] : memref<1x8x32xbf16, #tpu.memory_space<vmem>>, vector<1x8x8xbf16>
    %68 = vector.shape_cast %67 : vector<1x8x8xbf16> to vector<8x8xbf16>
    %69 = vector.shape_cast %66 : vector<8x8xbf16> to vector<1x8x8xbf16>
    tpu.vector_store %arg4[%c0_24, %c0_25, %c16], %69 {strides = array<i32>} : memref<1x8x32xbf16, #tpu.memory_space<vmem>>, vector<1x8x8xbf16>,
    %70 = vector.extract_strided_slice %1 {offsets = [0, 24], sizes = [8, 8], strides = [1, 1]} : vector<8x32xbf16> to vector<8x8xbf16>
    %71 = vector.extract_strided_slice %3 {offsets = [0, 24], sizes = [8, 8], strides = [1, 1]} : vector<8x64xbf16> to vector<8x8xbf16>
    %72 = vector.extract_strided_slice %3 {offsets = [0, 56], sizes = [8, 8], strides = [1, 1]} : vector<8x64xbf16> to vector<8x8xbf16>
    %cst_26 = arith.constant dense<0.000000e+00> : vector<8x8xf32>
    %73 = tpu.matmul %70, %71, %cst_26 {dimension_numbers = #tpu.dot_dimension_numbers<[1], [1], [0], [0], [0, 0, 1, 0], [], []>} : vector<8x8xbf16>, vector<8x8xbf16>, vector<8x8xf32> -> vector<8x8xf32>
    %cst_27 = arith.constant 0.353553385 : f32
    %74 = vector.broadcast %cst_27 : f32 to vector<8x8xf32>
    %75 = arith.mulf %73, %74 : vector<8x8xf32>
    %cst_28 = arith.constant dense<0xFF800000> : vector<8xf32>
    %76 = vector.multi_reduction <maximumf>, %75, %cst_28 [1] : vector<8x8xf32> to vector<8xf32>
    %77 = vector.shape_cast %76 : vector<8xf32> to vector<8x1xf32>
    %78 = vector.broadcast %77 : vector<8x1xf32> to vector<8x8xf32>
    %79 = arith.subf %75, %78 : vector<8x8xf32>
    %80 = math.exp %79 : vector<8x8xf32>
    %cst_29 = arith.constant dense<0.000000e+00> : vector<8xf32>
    %81 = vector.multi_reduction <add>, %80, %cst_29 [1] : vector<8x8xf32> to vector<8xf32>
    %82 = vector.shape_cast %81 : vector<8xf32> to vector<8x1xf32>
    %83 = tpu.reciprocal %82 {approx = true} : vector<8x1xf32> -> vector<8x1xf32>
    %84 = vector.broadcast %83 : vector<8x1xf32> to vector<8x8xf32>
    %85 = arith.mulf %80, %84 : vector<8x8xf32>
    %86 = arith.truncf %85 : vector<8x8xf32> to vector<8x8xbf16>
    %cst_30 = arith.constant dense<0.000000e+00> : vector<8x8xf32>
    %87 = tpu.matmul %86, %72, %cst_30 {dimension_numbers = #tpu.dot_dimension_numbers<[1], [0], [0], [1], [0, 0, 1, 1], [], []>} : vector<8x8xbf16>, vector<8x8xbf16>, vector<8x8xf32> -> vector<8x8xf32>
    %88 = arith.truncf %87 : vector<8x8xf32> to vector<8x8xbf16>
    %c0_31 = arith.constant 0 : index
    %c0_32 = arith.constant 0 : index
    %c24 = arith.constant 24 : index
    %89 = vector.load %arg4[%c0_31, %c0_32, %c24] : memref<1x8x32xbf16, #tpu.memory_space<vmem>>, vector<1x8x8xbf16>
    %90 = vector.shape_cast %89 : vector<1x8x8xbf16> to vector<8x8xbf16>
    %91 = vector.shape_cast %88 : vector<8x8xbf16> to vector<1x8x8xbf16>
    tpu.vector_store %arg4[%c0_31, %c0_32, %c24], %91 {strides = array<i32>} : memref<1x8x32xbf16, #tpu.memory_space<vmem>>, vector<1x8x8xbf16>,
    return
  }
  func.func @transform_0(%arg0: i32, %arg1: i32) -> (i32, i32, i32) {
    %c0_i32 = arith.constant 0 : i32
    %c0_i32_0 = arith.constant 0 : i32
    return %arg0, %arg1, %c0_i32 : i32, i32, i32
  }
  func.func @transform_1(%arg0: i32, %arg1: i32) -> (i32, i32, i32) {
    %c0_i32 = arith.constant 0 : i32
    %c0_i32_0 = arith.constant 0 : i32
    %c0_i32_1 = arith.constant 0 : i32
    return %arg0, %c0_i32, %c0_i32_0 : i32, i32, i32
  }
  func.func @transform_2(%arg0: i32, %arg1: i32) -> (i32, i32, i32) {
    %c0_i32 = arith.constant 0 : i32
    %c0_i32_0 = arith.constant 0 : i32
    return %arg0, %arg1, %c0_i32 : i32, i32, i32
  }
}

module attributes {stable_mosaic.version = 11 : i64} {
  func.func @_linear_kernel(%arg0: i32, %arg1: i32, %arg2: i32, %arg3: memref<16x32xbf16, #tpu.memory_space<vmem>>, %arg4: memref<64x32xbf16, #tpu.memory_space<vmem>>, %arg5: memref<1x64xf32, #tpu.memory_space<vmem>>, %arg6: memref<16x64xbf16, #tpu.memory_space<vmem>>, %arg7: memref<16x64xf32, #tpu.memory_space<vmem>>) attributes {dimension_semantics = [#tpu.dimension_semantics<parallel>, #tpu.dimension_semantics<parallel>, #tpu.dimension_semantics<arbitrary>], iteration_bounds = array<i64: 1, 1, 1>, scalar_prefetch = 0 : i64, scratch_operands = 1 : i64, tpu.core_type = #tpu.core_type<tc>, window_params = [{transform_indices = @transform_0, window_bounds = array<i64: 16, 32>}, {transform_indices = @transform_1, window_bounds = array<i64: 64, 32>}, {transform_indices = @transform_2, window_bounds = array<i64: 1, 64>}, {transform_indices = @transform_3, window_bounds = array<i64: 16, 64>}]} {
    %c0_i32 = arith.constant 0 : i32
    %0 = arith.cmpi eq, %arg2, %c0_i32 : i32
    %1 = arith.extui %0 : i1 to i32
    %c0_i32_0 = arith.constant 0 : i32
    %2 = arith.cmpi ne, %1, %c0_i32_0 : i32
    scf.if %2 {
      %cst_10 = arith.constant 0.000000e+00 : f32
      %12 = vector.broadcast %cst_10 : f32 to vector<16x64xf32>
      %c0_11 = arith.constant 0 : index
      %c0_12 = arith.constant 0 : index
      %13 = vector.load %arg7[%c0_11, %c0_12] : memref<16x64xf32, #tpu.memory_space<vmem>>, vector<16x64xf32>
      tpu.vector_store %arg7[%c0_11, %c0_12], %12 {strides = array<i32>} : memref<16x64xf32, #tpu.memory_space<vmem>>, vector<16x64xf32>,
    } else {
    }
    %c0 = arith.constant 0 : index
    %c0_1 = arith.constant 0 : index
    %3 = vector.load %arg7[%c0, %c0_1] : memref<16x64xf32, #tpu.memory_space<vmem>>, vector<16x64xf32>
    %c0_2 = arith.constant 0 : index
    %c0_3 = arith.constant 0 : index
    %4 = vector.load %arg3[%c0_2, %c0_3] : memref<16x32xbf16, #tpu.memory_space<vmem>>, vector<16x32xbf16>
    %c0_4 = arith.constant 0 : index
    %c0_5 = arith.constant 0 : index
    %5 = vector.load %arg4[%c0_4, %c0_5] : memref<64x32xbf16, #tpu.memory_space<vmem>>, vector<64x32xbf16>
    %cst = arith.constant dense<0.000000e+00> : vector<16x64xf32>
    %6 = tpu.matmul %4, %5, %cst {dimension_numbers = #tpu.dot_dimension_numbers<[1], [1], [0], [0], [0, 0, 1, 0], [], []>} : vector<16x32xbf16>, vector<64x32xbf16>, vector<16x64xf32> -> vector<16x64xf32>
    %7 = arith.addf %3, %6 : vector<16x64xf32>
    %c0_6 = arith.constant 0 : index
    %c0_7 = arith.constant 0 : index
    %8 = vector.load %arg7[%c0_6, %c0_7] : memref<16x64xf32, #tpu.memory_space<vmem>>, vector<16x64xf32>
    tpu.vector_store %arg7[%c0_6, %c0_7], %7 {strides = array<i32>} : memref<16x64xf32, #tpu.memory_space<vmem>>, vector<16x64xf32>,
    %c0_i32_8 = arith.constant 0 : i32
    %9 = arith.cmpi eq, %arg2, %c0_i32_8 : i32
    %10 = arith.extui %9 : i1 to i32
    %c0_i32_9 = arith.constant 0 : i32
    %11 = arith.cmpi ne, %10, %c0_i32_9 : i32
    scf.if %11 {
      %c0_10 = arith.constant 0 : index
      %c0_11 = arith.constant 0 : index
      %12 = vector.load %arg7[%c0_10, %c0_11] : memref<16x64xf32, #tpu.memory_space<vmem>>, vector<16x64xf32>
      %c0_12 = arith.constant 0 : index
      %c0_13 = arith.constant 0 : index
      %13 = vector.load %arg5[%c0_12, %c0_13] : memref<1x64xf32, #tpu.memory_space<vmem>>, vector<1x64xf32>
      %14 = vector.broadcast %13 : vector<1x64xf32> to vector<16x64xf32>
      %15 = arith.addf %12, %14 : vector<16x64xf32>
      %16 = arith.truncf %15 : vector<16x64xf32> to vector<16x64xbf16>
      %c0_14 = arith.constant 0 : index
      %c0_15 = arith.constant 0 : index
      %17 = vector.load %arg6[%c0_14, %c0_15] : memref<16x64xbf16, #tpu.memory_space<vmem>>, vector<16x64xbf16>
      tpu.vector_store %arg6[%c0_14, %c0_15], %16 {strides = array<i32>} : memref<16x64xbf16, #tpu.memory_space<vmem>>, vector<16x64xbf16>,
    } else {
    }
    return
  }
  func.func @transform_0(%arg0: i32, %arg1: i32, %arg2: i32) -> (i32, i32) {
    %c0_i32 = arith.constant 0 : i32
    return %arg0, %arg2 : i32, i32
  }
  func.func @transform_1(%arg0: i32, %arg1: i32, %arg2: i32) -> (i32, i32) {
    %c0_i32 = arith.constant 0 : i32
    return %arg1, %arg2 : i32, i32
  }
  func.func @transform_2(%arg0: i32, %arg1: i32, %arg2: i32) -> (i32, i32) {
    %c0_i32 = arith.constant 0 : i32
    %c0_i32_0 = arith.constant 0 : i32
    return %c0_i32, %arg1 : i32, i32
  }
  func.func @transform_3(%arg0: i32, %arg1: i32, %arg2: i32) -> (i32, i32) {
    %c0_i32 = arith.constant 0 : i32
    return %arg0, %arg1 : i32, i32
  }
}

module attributes {stable_mosaic.version = 11 : i64} {
  func.func @_ffn_add_ln_kernel(%arg0: i32, %arg1: i32, %arg2: memref<16x32xbf16, #tpu.memory_space<vmem>>, %arg3: memref<64x32xbf16, #tpu.memory_space<vmem>>, %arg4: memref<1x64xf32, #tpu.memory_space<vmem>>, %arg5: memref<32x64xbf16, #tpu.memory_space<vmem>>, %arg6: memref<1x32xf32, #tpu.memory_space<vmem>>, %arg7: memref<1x32xf32, #tpu.memory_space<vmem>>, %arg8: memref<1x32xf32, #tpu.memory_space<vmem>>, %arg9: memref<16x32xbf16, #tpu.memory_space<vmem>>, %arg10: memref<16x32xf32, #tpu.memory_space<vmem>>) attributes {dimension_semantics = [#tpu.dimension_semantics<parallel>, #tpu.dimension_semantics<arbitrary>], iteration_bounds = array<i64: 1, 1>, scalar_prefetch = 0 : i64, scratch_operands = 1 : i64, tpu.core_type = #tpu.core_type<tc>, window_params = [{transform_indices = @transform_0, window_bounds = array<i64: 16, 32>}, {transform_indices = @transform_1, window_bounds = array<i64: 64, 32>}, {transform_indices = @transform_2, window_bounds = array<i64: 1, 64>}, {transform_indices = @transform_3, window_bounds = array<i64: 32, 64>}, {pipeline_mode = #tpu.pipeline_mode<synchronous>, transform_indices = @transform_4, window_bounds = array<i64: 1, 32>}, {pipeline_mode = #tpu.pipeline_mode<synchronous>, transform_indices = @transform_5, window_bounds = array<i64: 1, 32>}, {pipeline_mode = #tpu.pipeline_mode<synchronous>, transform_indices = @transform_6, window_bounds = array<i64: 1, 32>}, {transform_indices = @transform_7, window_bounds = array<i64: 16, 32>}]} {
    %c0_i32 = arith.constant 0 : i32
    %0 = arith.cmpi eq, %arg1, %c0_i32 : i32
    %1 = arith.extui %0 : i1 to i32
    %c0_i32_0 = arith.constant 0 : i32
    %2 = arith.cmpi ne, %1, %c0_i32_0 : i32
    scf.if %2 {
      %cst_19 = arith.constant 0.000000e+00 : f32
      %31 = vector.broadcast %cst_19 : f32 to vector<16x32xf32>
      %c0_20 = arith.constant 0 : index
      %c0_21 = arith.constant 0 : index
      %32 = vector.load %arg10[%c0_20, %c0_21] : memref<16x32xf32, #tpu.memory_space<vmem>>, vector<16x32xf32>
      tpu.vector_store %arg10[%c0_20, %c0_21], %31 {strides = array<i32>} : memref<16x32xf32, #tpu.memory_space<vmem>>, vector<16x32xf32>,
    } else {
    }
    %c0 = arith.constant 0 : index
    %c0_1 = arith.constant 0 : index
    %3 = vector.load %arg2[%c0, %c0_1] : memref<16x32xbf16, #tpu.memory_space<vmem>>, vector<16x32xbf16>
    %c0_2 = arith.constant 0 : index
    %c0_3 = arith.constant 0 : index
    %4 = vector.load %arg3[%c0_2, %c0_3] : memref<64x32xbf16, #tpu.memory_space<vmem>>, vector<64x32xbf16>
    %cst = arith.constant dense<0.000000e+00> : vector<16x64xf32>
    %5 = tpu.matmul %3, %4, %cst {dimension_numbers = #tpu.dot_dimension_numbers<[1], [1], [0], [0], [0, 0, 1, 0], [], []>} : vector<16x32xbf16>, vector<64x32xbf16>, vector<16x64xf32> -> vector<16x64xf32>
    %c0_4 = arith.constant 0 : index
    %c0_5 = arith.constant 0 : index
    %6 = vector.load %arg4[%c0_4, %c0_5] : memref<1x64xf32, #tpu.memory_space<vmem>>, vector<1x64xf32>
    %7 = vector.broadcast %6 : vector<1x64xf32> to vector<16x64xf32>
    %8 = arith.addf %5, %7 : vector<16x64xf32>
    %9 = arith.mulf %8, %8 : vector<16x64xf32>
    %10 = arith.mulf %8, %9 : vector<16x64xf32>
    %cst_6 = arith.constant 4.471500e-02 : f32
    %11 = vector.broadcast %cst_6 : f32 to vector<16x64xf32>
    %12 = arith.mulf %11, %10 : vector<16x64xf32>
    %13 = arith.addf %8, %12 : vector<16x64xf32>
    %cst_7 = arith.constant 0.797884583 : f32
    %14 = vector.broadcast %cst_7 : f32 to vector<16x64xf32>
    %15 = arith.mulf %14, %13 : vector<16x64xf32>
    %16 = math.tanh %15 : vector<16x64xf32>
    %cst_8 = arith.constant 1.000000e+00 : f32
    %17 = vector.broadcast %cst_8 : f32 to vector<16x64xf32>
    %18 = arith.addf %17, %16 : vector<16x64xf32>
    %cst_9 = arith.constant 5.000000e-01 : f32
    %19 = vector.broadcast %cst_9 : f32 to vector<16x64xf32>
    %20 = arith.mulf %19, %18 : vector<16x64xf32>
    %21 = arith.mulf %8, %20 : vector<16x64xf32>
    %c0_10 = arith.constant 0 : index
    %c0_11 = arith.constant 0 : index
    %22 = vector.load %arg10[%c0_10, %c0_11] : memref<16x32xf32, #tpu.memory_space<vmem>>, vector<16x32xf32>
    %c0_12 = arith.constant 0 : index
    %c0_13 = arith.constant 0 : index
    %23 = vector.load %arg5[%c0_12, %c0_13] : memref<32x64xbf16, #tpu.memory_space<vmem>>, vector<32x64xbf16>
    %24 = arith.truncf %21 : vector<16x64xf32> to vector<16x64xbf16>
    %cst_14 = arith.constant dense<0.000000e+00> : vector<16x32xf32>
    %25 = tpu.matmul %24, %23, %cst_14 {dimension_numbers = #tpu.dot_dimension_numbers<[1], [1], [0], [0], [0, 0, 1, 0], [], []>} : vector<16x64xbf16>, vector<32x64xbf16>, vector<16x32xf32> -> vector<16x32xf32>
    %26 = arith.addf %22, %25 : vector<16x32xf32>
    %c0_15 = arith.constant 0 : index
    %c0_16 = arith.constant 0 : index
    %27 = vector.load %arg10[%c0_15, %c0_16] : memref<16x32xf32, #tpu.memory_space<vmem>>, vector<16x32xf32>
    tpu.vector_store %arg10[%c0_15, %c0_16], %26 {strides = array<i32>} : memref<16x32xf32, #tpu.memory_space<vmem>>, vector<16x32xf32>,
    %c0_i32_17 = arith.constant 0 : i32
    %28 = arith.cmpi eq, %arg1, %c0_i32_17 : i32
    %29 = arith.extui %28 : i1 to i32
    %c0_i32_18 = arith.constant 0 : i32
    %30 = arith.cmpi ne, %29, %c0_i32_18 : i32
    scf.if %30 {
      %31 = arith.extf %3 : vector<16x32xbf16> to vector<16x32xf32>
      %c0_19 = arith.constant 0 : index
      %c0_20 = arith.constant 0 : index
      %32 = vector.load %arg10[%c0_19, %c0_20] : memref<16x32xf32, #tpu.memory_space<vmem>>, vector<16x32xf32>
      %33 = arith.addf %31, %32 : vector<16x32xf32>
      %c0_21 = arith.constant 0 : index
      %c0_22 = arith.constant 0 : index
      %34 = vector.load %arg6[%c0_21, %c0_22] : memref<1x32xf32, #tpu.memory_space<vmem>>, vector<1x32xf32>
      %35 = vector.broadcast %34 : vector<1x32xf32> to vector<16x32xf32>
      %36 = arith.addf %33, %35 : vector<16x32xf32>
      %c0_23 = arith.constant 0 : index
      %c0_24 = arith.constant 0 : index
      %37 = vector.load %arg7[%c0_23, %c0_24] : memref<1x32xf32, #tpu.memory_space<vmem>>, vector<1x32xf32>
      %c0_25 = arith.constant 0 : index
      %c0_26 = arith.constant 0 : index
      %38 = vector.load %arg8[%c0_25, %c0_26] : memref<1x32xf32, #tpu.memory_space<vmem>>, vector<1x32xf32>
      %cst_27 = arith.constant dense<0.000000e+00> : vector<16xf32>
      %39 = vector.multi_reduction <add>, %36, %cst_27 [1] : vector<16x32xf32> to vector<16xf32>
      %40 = vector.shape_cast %39 : vector<16xf32> to vector<16x1xf32>
      %cst_28 = arith.constant 3.200000e+01 : f32
      %41 = vector.broadcast %cst_28 : f32 to vector<16x1xf32>
      %42 = arith.divf %40, %41 : vector<16x1xf32>
      %43 = vector.broadcast %42 : vector<16x1xf32> to vector<16x32xf32>
      %44 = arith.subf %36, %43 : vector<16x32xf32>
      %45 = arith.mulf %44, %44 : vector<16x32xf32>
      %cst_29 = arith.constant dense<0.000000e+00> : vector<16xf32>
      %46 = vector.multi_reduction <add>, %45, %cst_29 [1] : vector<16x32xf32> to vector<16xf32>
      %47 = vector.shape_cast %46 : vector<16xf32> to vector<16x1xf32>
      %cst_30 = arith.constant 3.200000e+01 : f32
      %48 = vector.broadcast %cst_30 : f32 to vector<16x1xf32>
      %49 = arith.divf %47, %48 : vector<16x1xf32>
      %50 = vector.broadcast %42 : vector<16x1xf32> to vector<16x32xf32>
      %51 = arith.subf %36, %50 : vector<16x32xf32>
      %cst_31 = arith.constant 9.99999996E-13 : f32
      %52 = vector.broadcast %cst_31 : f32 to vector<16x1xf32>
      %53 = arith.addf %49, %52 : vector<16x1xf32>
      %54 = math.rsqrt %53 : vector<16x1xf32>
      %55 = vector.broadcast %54 : vector<16x1xf32> to vector<16x32xf32>
      %56 = arith.mulf %51, %55 : vector<16x32xf32>
      %57 = vector.broadcast %37 : vector<1x32xf32> to vector<16x32xf32>
      %58 = arith.mulf %56, %57 : vector<16x32xf32>
      %59 = vector.broadcast %38 : vector<1x32xf32> to vector<16x32xf32>
      %60 = arith.addf %58, %59 : vector<16x32xf32>
      %61 = arith.truncf %60 : vector<16x32xf32> to vector<16x32xbf16>
      %c0_32 = arith.constant 0 : index
      %c0_33 = arith.constant 0 : index
      %62 = vector.load %arg9[%c0_32, %c0_33] : memref<16x32xbf16, #tpu.memory_space<vmem>>, vector<16x32xbf16>
      tpu.vector_store %arg9[%c0_32, %c0_33], %61 {strides = array<i32>} : memref<16x32xbf16, #tpu.memory_space<vmem>>, vector<16x32xbf16>,
    } else {
    }
    return
  }
  func.func @transform_0(%arg0: i32, %arg1: i32) -> (i32, i32) {
    %c0_i32 = arith.constant 0 : i32
    %c0_i32_0 = arith.constant 0 : i32
    return %arg0, %c0_i32 : i32, i32
  }
  func.func @transform_1(%arg0: i32, %arg1: i32) -> (i32, i32) {
    %c0_i32 = arith.constant 0 : i32
    %c0_i32_0 = arith.constant 0 : i32
    return %arg1, %c0_i32 : i32, i32
  }
  func.func @transform_2(%arg0: i32, %arg1: i32) -> (i32, i32) {
    %c0_i32 = arith.constant 0 : i32
    %c0_i32_0 = arith.constant 0 : i32
    return %c0_i32, %arg1 : i32, i32
  }
  func.func @transform_3(%arg0: i32, %arg1: i32) -> (i32, i32) {
    %c0_i32 = arith.constant 0 : i32
    %c0_i32_0 = arith.constant 0 : i32
    return %c0_i32, %arg1 : i32, i32
  }
  func.func @transform_4(%arg0: i32, %arg1: i32) -> (i32, i32) {
    %c0_i32 = arith.constant 0 : i32
    %c0_i32_0 = arith.constant 0 : i32
    %c0_i32_1 = arith.constant 0 : i32
    return %c0_i32, %c0_i32_0 : i32, i32
  }
  func.func @transform_5(%arg0: i32, %arg1: i32) -> (i32, i32) {
    %c0_i32 = arith.constant 0 : i32
    %c0_i32_0 = arith.constant 0 : i32
    %c0_i32_1 = arith.constant 0 : i32
    return %c0_i32, %c0_i32_0 : i32, i32
  }
  func.func @transform_6(%arg0: i32, %arg1: i32) -> (i32, i32) {
    %c0_i32 = arith.constant 0 : i32
    %c0_i32_0 = arith.constant 0 : i32
    %c0_i32_1 = arith.constant 0 : i32
    return %c0_i32, %c0_i32_0 : i32, i32
  }
  func.func @transform_7(%arg0: i32, %arg1: i32) -> (i32, i32) {
    %c0_i32 = arith.constant 0 : i32
    %c0_i32_0 = arith.constant 0 : i32
    return %arg0, %c0_i32 : i32, i32
  }
}

module attributes {stable_mosaic.version = 11 : i64} {
  func.func @_attention_kernel(%arg0: i32, %arg1: i32, %arg2: memref<1x8x32xbf16, #tpu.memory_space<vmem>>, %arg3: memref<1x8x64xbf16, #tpu.memory_space<vmem>>, %arg4: memref<1x8x32xbf16, #tpu.memory_space<vmem>>) attributes {dimension_semantics = [#tpu.dimension_semantics<parallel>, #tpu.dimension_semantics<parallel>], iteration_bounds = array<i64: 2, 1>, scalar_prefetch = 0 : i64, scratch_operands = 0 : i64, tpu.core_type = #tpu.core_type<tc>, window_params = [{transform_indices = @transform_0, window_bounds = array<i64: 1, 8, 32>}, {transform_indices = @transform_1, window_bounds = array<i64: 1, 8, 64>}, {transform_indices = @transform_2, window_bounds = array<i64: 1, 8, 32>}]} {
    %c0 = arith.constant 0 : index
    %c0_0 = arith.constant 0 : index
    %c0_1 = arith.constant 0 : index
    %0 = vector.load %arg2[%c0, %c0_0, %c0_1] : memref<1x8x32xbf16, #tpu.memory_space<vmem>>, vector<1x8x32xbf16>
    %1 = vector.shape_cast %0 : vector<1x8x32xbf16> to vector<8x32xbf16>
    %c0_2 = arith.constant 0 : index
    %c0_3 = arith.constant 0 : index
    %c0_4 = arith.constant 0 : index
    %2 = vector.load %arg3[%c0_2, %c0_3, %c0_4] : memref<1x8x64xbf16, #tpu.memory_space<vmem>>, vector<1x8x64xbf16>
    %3 = vector.shape_cast %2 : vector<1x8x64xbf16> to vector<8x64xbf16>
    %c8_i32 = arith.constant 8 : i32
    %4 = arith.muli %arg1, %c8_i32 : i32
    %5 = tpu.iota {dimensions = array<i32: 0>} : vector<8x8xi32>
    %6 = vector.broadcast %4 : i32 to vector<8x8xi32>
    %7 = arith.addi %6, %5 : vector<8x8xi32>
    %8 = tpu.iota {dimensions = array<i32: 1>} : vector<8x8xi32>
    %9 = arith.cmpi sgt, %8, %7 : vector<8x8xi32>
    %cst = arith.constant -1.000000e+09 : f32
    %cst_5 = arith.constant 0.000000e+00 : f32
    %10 = vector.broadcast %cst : f32 to vector<8x8xf32>
    %11 = vector.broadcast %cst_5 : f32 to vector<8x8xf32>
    %12 = arith.select %9, %10, %11 : vector<8x8xi1>, vector<8x8xf32>
    %13 = vector.extract_strided_slice %1 {offsets = [0, 0], sizes = [8, 8], strides = [1, 1]} : vector<8x32xbf16> to vector<8x8xbf16>
    %14 = vector.extract_strided_slice %3 {offsets = [0, 0], sizes = [8, 8], strides = [1, 1]} : vector<8x64xbf16> to vector<8x8xbf16>
    %15 = vector.extract_strided_slice %3 {offsets = [0, 32], sizes = [8, 8], strides = [1, 1]} : vector<8x64xbf16> to vector<8x8xbf16>
    %cst_6 = arith.constant dense<0.000000e+00> : vector<8x8xf32>
    %16 = tpu.matmul %13, %14, %cst_6 {dimension_numbers = #tpu.dot_dimension_numbers<[1], [1], [0], [0], [0, 0, 1, 0], [], []>} : vector<8x8xbf16>, vector<8x8xbf16>, vector<8x8xf32> -> vector<8x8xf32>
    %cst_7 = arith.constant 0.353553385 : f32
    %17 = vector.broadcast %cst_7 : f32 to vector<8x8xf32>
    %18 = arith.mulf %16, %17 : vector<8x8xf32>
    %19 = arith.addf %18, %12 : vector<8x8xf32>
    %cst_8 = arith.constant dense<0xFF800000> : vector<8xf32>
    %20 = vector.multi_reduction <maximumf>, %19, %cst_8 [1] : vector<8x8xf32> to vector<8xf32>
    %21 = vector.shape_cast %20 : vector<8xf32> to vector<8x1xf32>
    %22 = vector.broadcast %21 : vector<8x1xf32> to vector<8x8xf32>
    %23 = arith.subf %19, %22 : vector<8x8xf32>
    %24 = math.exp %23 : vector<8x8xf32>
    %cst_9 = arith.constant dense<0.000000e+00> : vector<8xf32>
    %25 = vector.multi_reduction <add>, %24, %cst_9 [1] : vector<8x8xf32> to vector<8xf32>
    %26 = vector.shape_cast %25 : vector<8xf32> to vector<8x1xf32>
    %27 = tpu.reciprocal %26 {approx = true} : vector<8x1xf32> -> vector<8x1xf32>
    %28 = vector.broadcast %27 : vector<8x1xf32> to vector<8x8xf32>
    %29 = arith.mulf %24, %28 : vector<8x8xf32>
    %30 = arith.truncf %29 : vector<8x8xf32> to vector<8x8xbf16>
    %cst_10 = arith.constant dense<0.000000e+00> : vector<8x8xf32>
    %31 = tpu.matmul %30, %15, %cst_10 {dimension_numbers = #tpu.dot_dimension_numbers<[1], [0], [0], [1], [0, 0, 1, 1], [], []>} : vector<8x8xbf16>, vector<8x8xbf16>, vector<8x8xf32> -> vector<8x8xf32>
    %32 = arith.truncf %31 : vector<8x8xf32> to vector<8x8xbf16>
    %c0_11 = arith.constant 0 : index
    %c0_12 = arith.constant 0 : index
    %c0_13 = arith.constant 0 : index
    %33 = vector.load %arg4[%c0_11, %c0_12, %c0_13] : memref<1x8x32xbf16, #tpu.memory_space<vmem>>, vector<1x8x8xbf16>
    %34 = vector.shape_cast %33 : vector<1x8x8xbf16> to vector<8x8xbf16>
    %35 = vector.shape_cast %32 : vector<8x8xbf16> to vector<1x8x8xbf16>
    tpu.vector_store %arg4[%c0_11, %c0_12, %c0_13], %35 {strides = array<i32>} : memref<1x8x32xbf16, #tpu.memory_space<vmem>>, vector<1x8x8xbf16>,
    %36 = vector.extract_strided_slice %1 {offsets = [0, 8], sizes = [8, 8], strides = [1, 1]} : vector<8x32xbf16> to vector<8x8xbf16>
    %37 = vector.extract_strided_slice %3 {offsets = [0, 8], sizes = [8, 8], strides = [1, 1]} : vector<8x64xbf16> to vector<8x8xbf16>
    %38 = vector.extract_strided_slice %3 {offsets = [0, 40], sizes = [8, 8], strides = [1, 1]} : vector<8x64xbf16> to vector<8x8xbf16>
    %cst_14 = arith.constant dense<0.000000e+00> : vector<8x8xf32>
    %39 = tpu.matmul %36, %37, %cst_14 {dimension_numbers = #tpu.dot_dimension_numbers<[1], [1], [0], [0], [0, 0, 1, 0], [], []>} : vector<8x8xbf16>, vector<8x8xbf16>, vector<8x8xf32> -> vector<8x8xf32>
    %cst_15 = arith.constant 0.353553385 : f32
    %40 = vector.broadcast %cst_15 : f32 to vector<8x8xf32>
    %41 = arith.mulf %39, %40 : vector<8x8xf32>
    %42 = arith.addf %41, %12 : vector<8x8xf32>
    %cst_16 = arith.constant dense<0xFF800000> : vector<8xf32>
    %43 = vector.multi_reduction <maximumf>, %42, %cst_16 [1] : vector<8x8xf32> to vector<8xf32>
    %44 = vector.shape_cast %43 : vector<8xf32> to vector<8x1xf32>
    %45 = vector.broadcast %44 : vector<8x1xf32> to vector<8x8xf32>
    %46 = arith.subf %42, %45 : vector<8x8xf32>
    %47 = math.exp %46 : vector<8x8xf32>
    %cst_17 = arith.constant dense<0.000000e+00> : vector<8xf32>
    %48 = vector.multi_reduction <add>, %47, %cst_17 [1] : vector<8x8xf32> to vector<8xf32>
    %49 = vector.shape_cast %48 : vector<8xf32> to vector<8x1xf32>
    %50 = tpu.reciprocal %49 {approx = true} : vector<8x1xf32> -> vector<8x1xf32>
    %51 = vector.broadcast %50 : vector<8x1xf32> to vector<8x8xf32>
    %52 = arith.mulf %47, %51 : vector<8x8xf32>
    %53 = arith.truncf %52 : vector<8x8xf32> to vector<8x8xbf16>
    %cst_18 = arith.constant dense<0.000000e+00> : vector<8x8xf32>
    %54 = tpu.matmul %53, %38, %cst_18 {dimension_numbers = #tpu.dot_dimension_numbers<[1], [0], [0], [1], [0, 0, 1, 1], [], []>} : vector<8x8xbf16>, vector<8x8xbf16>, vector<8x8xf32> -> vector<8x8xf32>
    %55 = arith.truncf %54 : vector<8x8xf32> to vector<8x8xbf16>
    %c0_19 = arith.constant 0 : index
    %c0_20 = arith.constant 0 : index
    %c8 = arith.constant 8 : index
    %56 = vector.load %arg4[%c0_19, %c0_20, %c8] : memref<1x8x32xbf16, #tpu.memory_space<vmem>>, vector<1x8x8xbf16>
    %57 = vector.shape_cast %56 : vector<1x8x8xbf16> to vector<8x8xbf16>
    %58 = vector.shape_cast %55 : vector<8x8xbf16> to vector<1x8x8xbf16>
    tpu.vector_store %arg4[%c0_19, %c0_20, %c8], %58 {strides = array<i32>} : memref<1x8x32xbf16, #tpu.memory_space<vmem>>, vector<1x8x8xbf16>,
    %59 = vector.extract_strided_slice %1 {offsets = [0, 16], sizes = [8, 8], strides = [1, 1]} : vector<8x32xbf16> to vector<8x8xbf16>
    %60 = vector.extract_strided_slice %3 {offsets = [0, 16], sizes = [8, 8], strides = [1, 1]} : vector<8x64xbf16> to vector<8x8xbf16>
    %61 = vector.extract_strided_slice %3 {offsets = [0, 48], sizes = [8, 8], strides = [1, 1]} : vector<8x64xbf16> to vector<8x8xbf16>
    %cst_21 = arith.constant dense<0.000000e+00> : vector<8x8xf32>
    %62 = tpu.matmul %59, %60, %cst_21 {dimension_numbers = #tpu.dot_dimension_numbers<[1], [1], [0], [0], [0, 0, 1, 0], [], []>} : vector<8x8xbf16>, vector<8x8xbf16>, vector<8x8xf32> -> vector<8x8xf32>
    %cst_22 = arith.constant 0.353553385 : f32
    %63 = vector.broadcast %cst_22 : f32 to vector<8x8xf32>
    %64 = arith.mulf %62, %63 : vector<8x8xf32>
    %65 = arith.addf %64, %12 : vector<8x8xf32>
    %cst_23 = arith.constant dense<0xFF800000> : vector<8xf32>
    %66 = vector.multi_reduction <maximumf>, %65, %cst_23 [1] : vector<8x8xf32> to vector<8xf32>
    %67 = vector.shape_cast %66 : vector<8xf32> to vector<8x1xf32>
    %68 = vector.broadcast %67 : vector<8x1xf32> to vector<8x8xf32>
    %69 = arith.subf %65, %68 : vector<8x8xf32>
    %70 = math.exp %69 : vector<8x8xf32>
    %cst_24 = arith.constant dense<0.000000e+00> : vector<8xf32>
    %71 = vector.multi_reduction <add>, %70, %cst_24 [1] : vector<8x8xf32> to vector<8xf32>
    %72 = vector.shape_cast %71 : vector<8xf32> to vector<8x1xf32>
    %73 = tpu.reciprocal %72 {approx = true} : vector<8x1xf32> -> vector<8x1xf32>
    %74 = vector.broadcast %73 : vector<8x1xf32> to vector<8x8xf32>
    %75 = arith.mulf %70, %74 : vector<8x8xf32>
    %76 = arith.truncf %75 : vector<8x8xf32> to vector<8x8xbf16>
    %cst_25 = arith.constant dense<0.000000e+00> : vector<8x8xf32>
    %77 = tpu.matmul %76, %61, %cst_25 {dimension_numbers = #tpu.dot_dimension_numbers<[1], [0], [0], [1], [0, 0, 1, 1], [], []>} : vector<8x8xbf16>, vector<8x8xbf16>, vector<8x8xf32> -> vector<8x8xf32>
    %78 = arith.truncf %77 : vector<8x8xf32> to vector<8x8xbf16>
    %c0_26 = arith.constant 0 : index
    %c0_27 = arith.constant 0 : index
    %c16 = arith.constant 16 : index
    %79 = vector.load %arg4[%c0_26, %c0_27, %c16] : memref<1x8x32xbf16, #tpu.memory_space<vmem>>, vector<1x8x8xbf16>
    %80 = vector.shape_cast %79 : vector<1x8x8xbf16> to vector<8x8xbf16>
    %81 = vector.shape_cast %78 : vector<8x8xbf16> to vector<1x8x8xbf16>
    tpu.vector_store %arg4[%c0_26, %c0_27, %c16], %81 {strides = array<i32>} : memref<1x8x32xbf16, #tpu.memory_space<vmem>>, vector<1x8x8xbf16>,
    %82 = vector.extract_strided_slice %1 {offsets = [0, 24], sizes = [8, 8], strides = [1, 1]} : vector<8x32xbf16> to vector<8x8xbf16>
    %83 = vector.extract_strided_slice %3 {offsets = [0, 24], sizes = [8, 8], strides = [1, 1]} : vector<8x64xbf16> to vector<8x8xbf16>
    %84 = vector.extract_strided_slice %3 {offsets = [0, 56], sizes = [8, 8], strides = [1, 1]} : vector<8x64xbf16> to vector<8x8xbf16>
    %cst_28 = arith.constant dense<0.000000e+00> : vector<8x8xf32>
    %85 = tpu.matmul %82, %83, %cst_28 {dimension_numbers = #tpu.dot_dimension_numbers<[1], [1], [0], [0], [0, 0, 1, 0], [], []>} : vector<8x8xbf16>, vector<8x8xbf16>, vector<8x8xf32> -> vector<8x8xf32>
    %cst_29 = arith.constant 0.353553385 : f32
    %86 = vector.broadcast %cst_29 : f32 to vector<8x8xf32>
    %87 = arith.mulf %85, %86 : vector<8x8xf32>
    %88 = arith.addf %87, %12 : vector<8x8xf32>
    %cst_30 = arith.constant dense<0xFF800000> : vector<8xf32>
    %89 = vector.multi_reduction <maximumf>, %88, %cst_30 [1] : vector<8x8xf32> to vector<8xf32>
    %90 = vector.shape_cast %89 : vector<8xf32> to vector<8x1xf32>
    %91 = vector.broadcast %90 : vector<8x1xf32> to vector<8x8xf32>
    %92 = arith.subf %88, %91 : vector<8x8xf32>
    %93 = math.exp %92 : vector<8x8xf32>
    %cst_31 = arith.constant dense<0.000000e+00> : vector<8xf32>
    %94 = vector.multi_reduction <add>, %93, %cst_31 [1] : vector<8x8xf32> to vector<8xf32>
    %95 = vector.shape_cast %94 : vector<8xf32> to vector<8x1xf32>
    %96 = tpu.reciprocal %95 {approx = true} : vector<8x1xf32> -> vector<8x1xf32>
    %97 = vector.broadcast %96 : vector<8x1xf32> to vector<8x8xf32>
    %98 = arith.mulf %93, %97 : vector<8x8xf32>
    %99 = arith.truncf %98 : vector<8x8xf32> to vector<8x8xbf16>
    %cst_32 = arith.constant dense<0.000000e+00> : vector<8x8xf32>
    %100 = tpu.matmul %99, %84, %cst_32 {dimension_numbers = #tpu.dot_dimension_numbers<[1], [0], [0], [1], [0, 0, 1, 1], [], []>} : vector<8x8xbf16>, vector<8x8xbf16>, vector<8x8xf32> -> vector<8x8xf32>
    %101 = arith.truncf %100 : vector<8x8xf32> to vector<8x8xbf16>
    %c0_33 = arith.constant 0 : index
    %c0_34 = arith.constant 0 : index
    %c24 = arith.constant 24 : index
    %102 = vector.load %arg4[%c0_33, %c0_34, %c24] : memref<1x8x32xbf16, #tpu.memory_space<vmem>>, vector<1x8x8xbf16>
    %103 = vector.shape_cast %102 : vector<1x8x8xbf16> to vector<8x8xbf16>
    %104 = vector.shape_cast %101 : vector<8x8xbf16> to vector<1x8x8xbf16>
    tpu.vector_store %arg4[%c0_33, %c0_34, %c24], %104 {strides = array<i32>} : memref<1x8x32xbf16, #tpu.memory_space<vmem>>, vector<1x8x8xbf16>,
    return
  }
  func.func @transform_0(%arg0: i32, %arg1: i32) -> (i32, i32, i32) {
    %c0_i32 = arith.constant 0 : i32
    %c0_i32_0 = arith.constant 0 : i32
    return %arg0, %arg1, %c0_i32 : i32, i32, i32
  }
  func.func @transform_1(%arg0: i32, %arg1: i32) -> (i32, i32, i32) {
    %c0_i32 = arith.constant 0 : i32
    %c0_i32_0 = arith.constant 0 : i32
    %c0_i32_1 = arith.constant 0 : i32
    return %arg0, %c0_i32, %c0_i32_0 : i32, i32, i32
  }
  func.func @transform_2(%arg0: i32, %arg1: i32) -> (i32, i32, i32) {
    %c0_i32 = arith.constant 0 : i32
    %c0_i32_0 = arith.constant 0 : i32
    return %arg0, %arg1, %c0_i32 : i32, i32, i32
  }
}

module attributes {stable_mosaic.version = 11 : i64} {
  func.func @_linear_add_ln_kernel(%arg0: i32, %arg1: memref<16x32xbf16, #tpu.memory_space<vmem>>, %arg2: memref<32x32xbf16, #tpu.memory_space<vmem>>, %arg3: memref<1x32xf32, #tpu.memory_space<vmem>>, %arg4: memref<16x32xbf16, #tpu.memory_space<vmem>>, %arg5: memref<1x32xf32, #tpu.memory_space<vmem>>, %arg6: memref<1x32xf32, #tpu.memory_space<vmem>>, %arg7: memref<16x32xbf16, #tpu.memory_space<vmem>>) attributes {dimension_semantics = [#tpu.dimension_semantics<parallel>], iteration_bounds = array<i64: 1>, scalar_prefetch = 0 : i64, scratch_operands = 0 : i64, tpu.core_type = #tpu.core_type<tc>, window_params = [{transform_indices = @transform_0, window_bounds = array<i64: 16, 32>}, {pipeline_mode = #tpu.pipeline_mode<synchronous>, transform_indices = @transform_1, window_bounds = array<i64: 32, 32>}, {pipeline_mode = #tpu.pipeline_mode<synchronous>, transform_indices = @transform_2, window_bounds = array<i64: 1, 32>}, {transform_indices = @transform_3, window_bounds = array<i64: 16, 32>}, {pipeline_mode = #tpu.pipeline_mode<synchronous>, transform_indices = @transform_4, window_bounds = array<i64: 1, 32>}, {pipeline_mode = #tpu.pipeline_mode<synchronous>, transform_indices = @transform_5, window_bounds = array<i64: 1, 32>}, {transform_indices = @transform_6, window_bounds = array<i64: 16, 32>}]} {
    %c0 = arith.constant 0 : index
    %c0_0 = arith.constant 0 : index
    %0 = vector.load %arg1[%c0, %c0_0] : memref<16x32xbf16, #tpu.memory_space<vmem>>, vector<16x32xbf16>
    %c0_1 = arith.constant 0 : index
    %c0_2 = arith.constant 0 : index
    %1 = vector.load %arg2[%c0_1, %c0_2] : memref<32x32xbf16, #tpu.memory_space<vmem>>, vector<32x32xbf16>
    %cst = arith.constant dense<0.000000e+00> : vector<16x32xf32>
    %2 = tpu.matmul %0, %1, %cst {dimension_numbers = #tpu.dot_dimension_numbers<[1], [1], [0], [0], [0, 0, 1, 0], [], []>} : vector<16x32xbf16>, vector<32x32xbf16>, vector<16x32xf32> -> vector<16x32xf32>
    %c0_3 = arith.constant 0 : index
    %c0_4 = arith.constant 0 : index
    %3 = vector.load %arg3[%c0_3, %c0_4] : memref<1x32xf32, #tpu.memory_space<vmem>>, vector<1x32xf32>
    %4 = vector.broadcast %3 : vector<1x32xf32> to vector<16x32xf32>
    %5 = arith.addf %2, %4 : vector<16x32xf32>
    %c0_5 = arith.constant 0 : index
    %c0_6 = arith.constant 0 : index
    %6 = vector.load %arg4[%c0_5, %c0_6] : memref<16x32xbf16, #tpu.memory_space<vmem>>, vector<16x32xbf16>
    %7 = arith.extf %6 : vector<16x32xbf16> to vector<16x32xf32>
    %8 = arith.addf %7, %5 : vector<16x32xf32>
    %c0_7 = arith.constant 0 : index
    %c0_8 = arith.constant 0 : index
    %9 = vector.load %arg5[%c0_7, %c0_8] : memref<1x32xf32, #tpu.memory_space<vmem>>, vector<1x32xf32>
    %c0_9 = arith.constant 0 : index
    %c0_10 = arith.constant 0 : index
    %10 = vector.load %arg6[%c0_9, %c0_10] : memref<1x32xf32, #tpu.memory_space<vmem>>, vector<1x32xf32>
    %cst_11 = arith.constant dense<0.000000e+00> : vector<16xf32>
    %11 = vector.multi_reduction <add>, %8, %cst_11 [1] : vector<16x32xf32> to vector<16xf32>
    %12 = vector.shape_cast %11 : vector<16xf32> to vector<16x1xf32>
    %cst_12 = arith.constant 3.200000e+01 : f32
    %13 = vector.broadcast %cst_12 : f32 to vector<16x1xf32>
    %14 = arith.divf %12, %13 : vector<16x1xf32>
    %15 = vector.broadcast %14 : vector<16x1xf32> to vector<16x32xf32>
    %16 = arith.subf %8, %15 : vector<16x32xf32>
    %17 = arith.mulf %16, %16 : vector<16x32xf32>
    %cst_13 = arith.constant dense<0.000000e+00> : vector<16xf32>
    %18 = vector.multi_reduction <add>, %17, %cst_13 [1] : vector<16x32xf32> to vector<16xf32>
    %19 = vector.shape_cast %18 : vector<16xf32> to vector<16x1xf32>
    %cst_14 = arith.constant 3.200000e+01 : f32
    %20 = vector.broadcast %cst_14 : f32 to vector<16x1xf32>
    %21 = arith.divf %19, %20 : vector<16x1xf32>
    %22 = vector.broadcast %14 : vector<16x1xf32> to vector<16x32xf32>
    %23 = arith.subf %8, %22 : vector<16x32xf32>
    %cst_15 = arith.constant 9.99999974E-6 : f32
    %24 = vector.broadcast %cst_15 : f32 to vector<16x1xf32>
    %25 = arith.addf %21, %24 : vector<16x1xf32>
    %26 = math.rsqrt %25 : vector<16x1xf32>
    %27 = vector.broadcast %26 : vector<16x1xf32> to vector<16x32xf32>
    %28 = arith.mulf %23, %27 : vector<16x32xf32>
    %29 = vector.broadcast %9 : vector<1x32xf32> to vector<16x32xf32>
    %30 = arith.mulf %28, %29 : vector<16x32xf32>
    %31 = vector.broadcast %10 : vector<1x32xf32> to vector<16x32xf32>
    %32 = arith.addf %30, %31 : vector<16x32xf32>
    %33 = arith.truncf %32 : vector<16x32xf32> to vector<16x32xbf16>
    %c0_16 = arith.constant 0 : index
    %c0_17 = arith.constant 0 : index
    %34 = vector.load %arg7[%c0_16, %c0_17] : memref<16x32xbf16, #tpu.memory_space<vmem>>, vector<16x32xbf16>
    tpu.vector_store %arg7[%c0_16, %c0_17], %33 {strides = array<i32>} : memref<16x32xbf16, #tpu.memory_space<vmem>>, vector<16x32xbf16>,
    return
  }
  func.func @transform_0(%arg0: i32) -> (i32, i32) {
    %c0_i32 = arith.constant 0 : i32
    %c0_i32_0 = arith.constant 0 : i32
    return %arg0, %c0_i32 : i32, i32
  }
  func.func @transform_1(%arg0: i32) -> (i32, i32) {
    %c0_i32 = arith.constant 0 : i32
    %c0_i32_0 = arith.constant 0 : i32
    %c0_i32_1 = arith.constant 0 : i32
    return %c0_i32, %c0_i32_0 : i32, i32
  }
  func.func @transform_2(%arg0: i32) -> (i32, i32) {
    %c0_i32 = arith.constant 0 : i32
    %c0_i32_0 = arith.constant 0 : i32
    %c0_i32_1 = arith.constant 0 : i32
    return %c0_i32, %c0_i32_0 : i32, i32
  }
  func.func @transform_3(%arg0: i32) -> (i32, i32) {
    %c0_i32 = arith.constant 0 : i32
    %c0_i32_0 = arith.constant 0 : i32
    return %arg0, %c0_i32 : i32, i32
  }
  func.func @transform_4(%arg0: i32) -> (i32, i32) {
    %c0_i32 = arith.constant 0 : i32
    %c0_i32_0 = arith.constant 0 : i32
    %c0_i32_1 = arith.constant 0 : i32
    return %c0_i32, %c0_i32_0 : i32, i32
  }
  func.func @transform_5(%arg0: i32) -> (i32, i32) {
    %c0_i32 = arith.constant 0 : i32
    %c0_i32_0 = arith.constant 0 : i32
    %c0_i32_1 = arith.constant 0 : i32
    return %c0_i32, %c0_i32_0 : i32, i32
  }
  func.func @transform_6(%arg0: i32) -> (i32, i32) {
    %c0_i32 = arith.constant 0 : i32
    %c0_i32_0 = arith.constant 0 : i32
    return %arg0, %c0_i32 : i32, i32
  }
}

module attributes {stable_mosaic.version = 11 : i64} {
  func.func @_linear_kernel(%arg0: i32, %arg1: i32, %arg2: i32, %arg3: memref<16x32xbf16, #tpu.memory_space<vmem>>, %arg4: memref<32x32xbf16, #tpu.memory_space<vmem>>, %arg5: memref<1x32xf32, #tpu.memory_space<vmem>>, %arg6: memref<16x32xbf16, #tpu.memory_space<vmem>>, %arg7: memref<16x32xf32, #tpu.memory_space<vmem>>) attributes {dimension_semantics = [#tpu.dimension_semantics<parallel>, #tpu.dimension_semantics<parallel>, #tpu.dimension_semantics<arbitrary>], iteration_bounds = array<i64: 1, 1, 1>, scalar_prefetch = 0 : i64, scratch_operands = 1 : i64, tpu.core_type = #tpu.core_type<tc>, window_params = [{transform_indices = @transform_0, window_bounds = array<i64: 16, 32>}, {transform_indices = @transform_1, window_bounds = array<i64: 32, 32>}, {transform_indices = @transform_2, window_bounds = array<i64: 1, 32>}, {transform_indices = @transform_3, window_bounds = array<i64: 16, 32>}]} {
    %c0_i32 = arith.constant 0 : i32
    %0 = arith.cmpi eq, %arg2, %c0_i32 : i32
    %1 = arith.extui %0 : i1 to i32
    %c0_i32_0 = arith.constant 0 : i32
    %2 = arith.cmpi ne, %1, %c0_i32_0 : i32
    scf.if %2 {
      %cst_10 = arith.constant 0.000000e+00 : f32
      %12 = vector.broadcast %cst_10 : f32 to vector<16x32xf32>
      %c0_11 = arith.constant 0 : index
      %c0_12 = arith.constant 0 : index
      %13 = vector.load %arg7[%c0_11, %c0_12] : memref<16x32xf32, #tpu.memory_space<vmem>>, vector<16x32xf32>
      tpu.vector_store %arg7[%c0_11, %c0_12], %12 {strides = array<i32>} : memref<16x32xf32, #tpu.memory_space<vmem>>, vector<16x32xf32>,
    } else {
    }
    %c0 = arith.constant 0 : index
    %c0_1 = arith.constant 0 : index
    %3 = vector.load %arg7[%c0, %c0_1] : memref<16x32xf32, #tpu.memory_space<vmem>>, vector<16x32xf32>
    %c0_2 = arith.constant 0 : index
    %c0_3 = arith.constant 0 : index
    %4 = vector.load %arg3[%c0_2, %c0_3] : memref<16x32xbf16, #tpu.memory_space<vmem>>, vector<16x32xbf16>
    %c0_4 = arith.constant 0 : index
    %c0_5 = arith.constant 0 : index
    %5 = vector.load %arg4[%c0_4, %c0_5] : memref<32x32xbf16, #tpu.memory_space<vmem>>, vector<32x32xbf16>
    %cst = arith.constant dense<0.000000e+00> : vector<16x32xf32>
    %6 = tpu.matmul %4, %5, %cst {dimension_numbers = #tpu.dot_dimension_numbers<[1], [1], [0], [0], [0, 0, 1, 0], [], []>} : vector<16x32xbf16>, vector<32x32xbf16>, vector<16x32xf32> -> vector<16x32xf32>
    %7 = arith.addf %3, %6 : vector<16x32xf32>
    %c0_6 = arith.constant 0 : index
    %c0_7 = arith.constant 0 : index
    %8 = vector.load %arg7[%c0_6, %c0_7] : memref<16x32xf32, #tpu.memory_space<vmem>>, vector<16x32xf32>
    tpu.vector_store %arg7[%c0_6, %c0_7], %7 {strides = array<i32>} : memref<16x32xf32, #tpu.memory_space<vmem>>, vector<16x32xf32>,
    %c0_i32_8 = arith.constant 0 : i32
    %9 = arith.cmpi eq, %arg2, %c0_i32_8 : i32
    %10 = arith.extui %9 : i1 to i32
    %c0_i32_9 = arith.constant 0 : i32
    %11 = arith.cmpi ne, %10, %c0_i32_9 : i32
    scf.if %11 {
      %c0_10 = arith.constant 0 : index
      %c0_11 = arith.constant 0 : index
      %12 = vector.load %arg7[%c0_10, %c0_11] : memref<16x32xf32, #tpu.memory_space<vmem>>, vector<16x32xf32>
      %c0_12 = arith.constant 0 : index
      %c0_13 = arith.constant 0 : index
      %13 = vector.load %arg5[%c0_12, %c0_13] : memref<1x32xf32, #tpu.memory_space<vmem>>, vector<1x32xf32>
      %14 = vector.broadcast %13 : vector<1x32xf32> to vector<16x32xf32>
      %15 = arith.addf %12, %14 : vector<16x32xf32>
      %16 = arith.truncf %15 : vector<16x32xf32> to vector<16x32xbf16>
      %c0_14 = arith.constant 0 : index
      %c0_15 = arith.constant 0 : index
      %17 = vector.load %arg6[%c0_14, %c0_15] : memref<16x32xbf16, #tpu.memory_space<vmem>>, vector<16x32xbf16>
      tpu.vector_store %arg6[%c0_14, %c0_15], %16 {strides = array<i32>} : memref<16x32xbf16, #tpu.memory_space<vmem>>, vector<16x32xbf16>,
    } else {
    }
    return
  }
  func.func @transform_0(%arg0: i32, %arg1: i32, %arg2: i32) -> (i32, i32) {
    %c0_i32 = arith.constant 0 : i32
    return %arg0, %arg2 : i32, i32
  }
  func.func @transform_1(%arg0: i32, %arg1: i32, %arg2: i32) -> (i32, i32) {
    %c0_i32 = arith.constant 0 : i32
    return %arg1, %arg2 : i32, i32
  }
  func.func @transform_2(%arg0: i32, %arg1: i32, %arg2: i32) -> (i32, i32) {
    %c0_i32 = arith.constant 0 : i32
    %c0_i32_0 = arith.constant 0 : i32
    return %c0_i32, %arg1 : i32, i32
  }
  func.func @transform_3(%arg0: i32, %arg1: i32, %arg2: i32) -> (i32, i32) {
    %c0_i32 = arith.constant 0 : i32
    return %arg0, %arg1 : i32, i32
  }
}

module attributes {stable_mosaic.version = 11 : i64} {
  func.func @_attention_kernel(%arg0: i32, %arg1: i32, %arg2: memref<1x8x32xbf16, #tpu.memory_space<vmem>>, %arg3: memref<1x8x64xbf16, #tpu.memory_space<vmem>>, %arg4: memref<1x1x8xf32, #tpu.memory_space<vmem>>, %arg5: memref<1x8x32xbf16, #tpu.memory_space<vmem>>) attributes {dimension_semantics = [#tpu.dimension_semantics<parallel>, #tpu.dimension_semantics<parallel>], iteration_bounds = array<i64: 2, 1>, scalar_prefetch = 0 : i64, scratch_operands = 0 : i64, tpu.core_type = #tpu.core_type<tc>, window_params = [{transform_indices = @transform_0, window_bounds = array<i64: 1, 8, 32>}, {transform_indices = @transform_1, window_bounds = array<i64: 1, 8, 64>}, {transform_indices = @transform_2, window_bounds = array<i64: 1, 1, 8>}, {transform_indices = @transform_3, window_bounds = array<i64: 1, 8, 32>}]} {
    %c0 = arith.constant 0 : index
    %c0_0 = arith.constant 0 : index
    %c0_1 = arith.constant 0 : index
    %0 = vector.load %arg2[%c0, %c0_0, %c0_1] : memref<1x8x32xbf16, #tpu.memory_space<vmem>>, vector<1x8x32xbf16>
    %1 = vector.shape_cast %0 : vector<1x8x32xbf16> to vector<8x32xbf16>
    %c0_2 = arith.constant 0 : index
    %c0_3 = arith.constant 0 : index
    %c0_4 = arith.constant 0 : index
    %2 = vector.load %arg3[%c0_2, %c0_3, %c0_4] : memref<1x8x64xbf16, #tpu.memory_space<vmem>>, vector<1x8x64xbf16>
    %3 = vector.shape_cast %2 : vector<1x8x64xbf16> to vector<8x64xbf16>
    %c0_5 = arith.constant 0 : index
    %c0_6 = arith.constant 0 : index
    %c0_7 = arith.constant 0 : index
    %4 = vector.load %arg4[%c0_5, %c0_6, %c0_7] : memref<1x1x8xf32, #tpu.memory_space<vmem>>, vector<1x1x8xf32>
    %5 = vector.shape_cast %4 : vector<1x1x8xf32> to vector<1x8xf32>
    %6 = vector.extract_strided_slice %1 {offsets = [0, 0], sizes = [8, 8], strides = [1, 1]} : vector<8x32xbf16> to vector<8x8xbf16>
    %7 = vector.extract_strided_slice %3 {offsets = [0, 0], sizes = [8, 8], strides = [1, 1]} : vector<8x64xbf16> to vector<8x8xbf16>
    %8 = vector.extract_strided_slice %3 {offsets = [0, 32], sizes = [8, 8], strides = [1, 1]} : vector<8x64xbf16> to vector<8x8xbf16>
    %cst = arith.constant dense<0.000000e+00> : vector<8x8xf32>
    %9 = tpu.matmul %6, %7, %cst {dimension_numbers = #tpu.dot_dimension_numbers<[1], [1], [0], [0], [0, 0, 1, 0], [], []>} : vector<8x8xbf16>, vector<8x8xbf16>, vector<8x8xf32> -> vector<8x8xf32>
    %cst_8 = arith.constant 0.353553385 : f32
    %10 = vector.broadcast %cst_8 : f32 to vector<8x8xf32>
    %11 = arith.mulf %9, %10 : vector<8x8xf32>
    %12 = vector.broadcast %5 : vector<1x8xf32> to vector<8x8xf32>
    %13 = arith.addf %11, %12 : vector<8x8xf32>
    %cst_9 = arith.constant dense<0xFF800000> : vector<8xf32>
    %14 = vector.multi_reduction <maximumf>, %13, %cst_9 [1] : vector<8x8xf32> to vector<8xf32>
    %15 = vector.shape_cast %14 : vector<8xf32> to vector<8x1xf32>
    %16 = vector.broadcast %15 : vector<8x1xf32> to vector<8x8xf32>
    %17 = arith.subf %13, %16 : vector<8x8xf32>
    %18 = math.exp %17 : vector<8x8xf32>
    %cst_10 = arith.constant dense<0.000000e+00> : vector<8xf32>
    %19 = vector.multi_reduction <add>, %18, %cst_10 [1] : vector<8x8xf32> to vector<8xf32>
    %20 = vector.shape_cast %19 : vector<8xf32> to vector<8x1xf32>
    %21 = tpu.reciprocal %20 {approx = true} : vector<8x1xf32> -> vector<8x1xf32>
    %22 = vector.broadcast %21 : vector<8x1xf32> to vector<8x8xf32>
    %23 = arith.mulf %18, %22 : vector<8x8xf32>
    %24 = arith.truncf %23 : vector<8x8xf32> to vector<8x8xbf16>
    %cst_11 = arith.constant dense<0.000000e+00> : vector<8x8xf32>
    %25 = tpu.matmul %24, %8, %cst_11 {dimension_numbers = #tpu.dot_dimension_numbers<[1], [0], [0], [1], [0, 0, 1, 1], [], []>} : vector<8x8xbf16>, vector<8x8xbf16>, vector<8x8xf32> -> vector<8x8xf32>
    %26 = arith.truncf %25 : vector<8x8xf32> to vector<8x8xbf16>
    %c0_12 = arith.constant 0 : index
    %c0_13 = arith.constant 0 : index
    %c0_14 = arith.constant 0 : index
    %27 = vector.load %arg5[%c0_12, %c0_13, %c0_14] : memref<1x8x32xbf16, #tpu.memory_space<vmem>>, vector<1x8x8xbf16>
    %28 = vector.shape_cast %27 : vector<1x8x8xbf16> to vector<8x8xbf16>
    %29 = vector.shape_cast %26 : vector<8x8xbf16> to vector<1x8x8xbf16>
    tpu.vector_store %arg5[%c0_12, %c0_13, %c0_14], %29 {strides = array<i32>} : memref<1x8x32xbf16, #tpu.memory_space<vmem>>, vector<1x8x8xbf16>,
    %30 = vector.extract_strided_slice %1 {offsets = [0, 8], sizes = [8, 8], strides = [1, 1]} : vector<8x32xbf16> to vector<8x8xbf16>
    %31 = vector.extract_strided_slice %3 {offsets = [0, 8], sizes = [8, 8], strides = [1, 1]} : vector<8x64xbf16> to vector<8x8xbf16>
    %32 = vector.extract_strided_slice %3 {offsets = [0, 40], sizes = [8, 8], strides = [1, 1]} : vector<8x64xbf16> to vector<8x8xbf16>
    %cst_15 = arith.constant dense<0.000000e+00> : vector<8x8xf32>
    %33 = tpu.matmul %30, %31, %cst_15 {dimension_numbers = #tpu.dot_dimension_numbers<[1], [1], [0], [0], [0, 0, 1, 0], [], []>} : vector<8x8xbf16>, vector<8x8xbf16>, vector<8x8xf32> -> vector<8x8xf32>
    %cst_16 = arith.constant 0.353553385 : f32
    %34 = vector.broadcast %cst_16 : f32 to vector<8x8xf32>
    %35 = arith.mulf %33, %34 : vector<8x8xf32>
    %36 = vector.broadcast %5 : vector<1x8xf32> to vector<8x8xf32>
    %37 = arith.addf %35, %36 : vector<8x8xf32>
    %cst_17 = arith.constant dense<0xFF800000> : vector<8xf32>
    %38 = vector.multi_reduction <maximumf>, %37, %cst_17 [1] : vector<8x8xf32> to vector<8xf32>
    %39 = vector.shape_cast %38 : vector<8xf32> to vector<8x1xf32>
    %40 = vector.broadcast %39 : vector<8x1xf32> to vector<8x8xf32>
    %41 = arith.subf %37, %40 : vector<8x8xf32>
    %42 = math.exp %41 : vector<8x8xf32>
    %cst_18 = arith.constant dense<0.000000e+00> : vector<8xf32>
    %43 = vector.multi_reduction <add>, %42, %cst_18 [1] : vector<8x8xf32> to vector<8xf32>
    %44 = vector.shape_cast %43 : vector<8xf32> to vector<8x1xf32>
    %45 = tpu.reciprocal %44 {approx = true} : vector<8x1xf32> -> vector<8x1xf32>
    %46 = vector.broadcast %45 : vector<8x1xf32> to vector<8x8xf32>
    %47 = arith.mulf %42, %46 : vector<8x8xf32>
    %48 = arith.truncf %47 : vector<8x8xf32> to vector<8x8xbf16>
    %cst_19 = arith.constant dense<0.000000e+00> : vector<8x8xf32>
    %49 = tpu.matmul %48, %32, %cst_19 {dimension_numbers = #tpu.dot_dimension_numbers<[1], [0], [0], [1], [0, 0, 1, 1], [], []>} : vector<8x8xbf16>, vector<8x8xbf16>, vector<8x8xf32> -> vector<8x8xf32>
    %50 = arith.truncf %49 : vector<8x8xf32> to vector<8x8xbf16>
    %c0_20 = arith.constant 0 : index
    %c0_21 = arith.constant 0 : index
    %c8 = arith.constant 8 : index
    %51 = vector.load %arg5[%c0_20, %c0_21, %c8] : memref<1x8x32xbf16, #tpu.memory_space<vmem>>, vector<1x8x8xbf16>
    %52 = vector.shape_cast %51 : vector<1x8x8xbf16> to vector<8x8xbf16>
    %53 = vector.shape_cast %50 : vector<8x8xbf16> to vector<1x8x8xbf16>
    tpu.vector_store %arg5[%c0_20, %c0_21, %c8], %53 {strides = array<i32>} : memref<1x8x32xbf16, #tpu.memory_space<vmem>>, vector<1x8x8xbf16>,
    %54 = vector.extract_strided_slice %1 {offsets = [0, 16], sizes = [8, 8], strides = [1, 1]} : vector<8x32xbf16> to vector<8x8xbf16>
    %55 = vector.extract_strided_slice %3 {offsets = [0, 16], sizes = [8, 8], strides = [1, 1]} : vector<8x64xbf16> to vector<8x8xbf16>
    %56 = vector.extract_strided_slice %3 {offsets = [0, 48], sizes = [8, 8], strides = [1, 1]} : vector<8x64xbf16> to vector<8x8xbf16>
    %cst_22 = arith.constant dense<0.000000e+00> : vector<8x8xf32>
    %57 = tpu.matmul %54, %55, %cst_22 {dimension_numbers = #tpu.dot_dimension_numbers<[1], [1], [0], [0], [0, 0, 1, 0], [], []>} : vector<8x8xbf16>, vector<8x8xbf16>, vector<8x8xf32> -> vector<8x8xf32>
    %cst_23 = arith.constant 0.353553385 : f32
    %58 = vector.broadcast %cst_23 : f32 to vector<8x8xf32>
    %59 = arith.mulf %57, %58 : vector<8x8xf32>
    %60 = vector.broadcast %5 : vector<1x8xf32> to vector<8x8xf32>
    %61 = arith.addf %59, %60 : vector<8x8xf32>
    %cst_24 = arith.constant dense<0xFF800000> : vector<8xf32>
    %62 = vector.multi_reduction <maximumf>, %61, %cst_24 [1] : vector<8x8xf32> to vector<8xf32>
    %63 = vector.shape_cast %62 : vector<8xf32> to vector<8x1xf32>
    %64 = vector.broadcast %63 : vector<8x1xf32> to vector<8x8xf32>
    %65 = arith.subf %61, %64 : vector<8x8xf32>
    %66 = math.exp %65 : vector<8x8xf32>
    %cst_25 = arith.constant dense<0.000000e+00> : vector<8xf32>
    %67 = vector.multi_reduction <add>, %66, %cst_25 [1] : vector<8x8xf32> to vector<8xf32>
    %68 = vector.shape_cast %67 : vector<8xf32> to vector<8x1xf32>
    %69 = tpu.reciprocal %68 {approx = true} : vector<8x1xf32> -> vector<8x1xf32>
    %70 = vector.broadcast %69 : vector<8x1xf32> to vector<8x8xf32>
    %71 = arith.mulf %66, %70 : vector<8x8xf32>
    %72 = arith.truncf %71 : vector<8x8xf32> to vector<8x8xbf16>
    %cst_26 = arith.constant dense<0.000000e+00> : vector<8x8xf32>
    %73 = tpu.matmul %72, %56, %cst_26 {dimension_numbers = #tpu.dot_dimension_numbers<[1], [0], [0], [1], [0, 0, 1, 1], [], []>} : vector<8x8xbf16>, vector<8x8xbf16>, vector<8x8xf32> -> vector<8x8xf32>
    %74 = arith.truncf %73 : vector<8x8xf32> to vector<8x8xbf16>
    %c0_27 = arith.constant 0 : index
    %c0_28 = arith.constant 0 : index
    %c16 = arith.constant 16 : index
    %75 = vector.load %arg5[%c0_27, %c0_28, %c16] : memref<1x8x32xbf16, #tpu.memory_space<vmem>>, vector<1x8x8xbf16>
    %76 = vector.shape_cast %75 : vector<1x8x8xbf16> to vector<8x8xbf16>
    %77 = vector.shape_cast %74 : vector<8x8xbf16> to vector<1x8x8xbf16>
    tpu.vector_store %arg5[%c0_27, %c0_28, %c16], %77 {strides = array<i32>} : memref<1x8x32xbf16, #tpu.memory_space<vmem>>, vector<1x8x8xbf16>,
    %78 = vector.extract_strided_slice %1 {offsets = [0, 24], sizes = [8, 8], strides = [1, 1]} : vector<8x32xbf16> to vector<8x8xbf16>
    %79 = vector.extract_strided_slice %3 {offsets = [0, 24], sizes = [8, 8], strides = [1, 1]} : vector<8x64xbf16> to vector<8x8xbf16>
    %80 = vector.extract_strided_slice %3 {offsets = [0, 56], sizes = [8, 8], strides = [1, 1]} : vector<8x64xbf16> to vector<8x8xbf16>
    %cst_29 = arith.constant dense<0.000000e+00> : vector<8x8xf32>
    %81 = tpu.matmul %78, %79, %cst_29 {dimension_numbers = #tpu.dot_dimension_numbers<[1], [1], [0], [0], [0, 0, 1, 0], [], []>} : vector<8x8xbf16>, vector<8x8xbf16>, vector<8x8xf32> -> vector<8x8xf32>
    %cst_30 = arith.constant 0.353553385 : f32
    %82 = vector.broadcast %cst_30 : f32 to vector<8x8xf32>
    %83 = arith.mulf %81, %82 : vector<8x8xf32>
    %84 = vector.broadcast %5 : vector<1x8xf32> to vector<8x8xf32>
    %85 = arith.addf %83, %84 : vector<8x8xf32>
    %cst_31 = arith.constant dense<0xFF800000> : vector<8xf32>
    %86 = vector.multi_reduction <maximumf>, %85, %cst_31 [1] : vector<8x8xf32> to vector<8xf32>
    %87 = vector.shape_cast %86 : vector<8xf32> to vector<8x1xf32>
    %88 = vector.broadcast %87 : vector<8x1xf32> to vector<8x8xf32>
    %89 = arith.subf %85, %88 : vector<8x8xf32>
    %90 = math.exp %89 : vector<8x8xf32>
    %cst_32 = arith.constant dense<0.000000e+00> : vector<8xf32>
    %91 = vector.multi_reduction <add>, %90, %cst_32 [1] : vector<8x8xf32> to vector<8xf32>
    %92 = vector.shape_cast %91 : vector<8xf32> to vector<8x1xf32>
    %93 = tpu.reciprocal %92 {approx = true} : vector<8x1xf32> -> vector<8x1xf32>
    %94 = vector.broadcast %93 : vector<8x1xf32> to vector<8x8xf32>
    %95 = arith.mulf %90, %94 : vector<8x8xf32>
    %96 = arith.truncf %95 : vector<8x8xf32> to vector<8x8xbf16>
    %cst_33 = arith.constant dense<0.000000e+00> : vector<8x8xf32>
    %97 = tpu.matmul %96, %80, %cst_33 {dimension_numbers = #tpu.dot_dimension_numbers<[1], [0], [0], [1], [0, 0, 1, 1], [], []>} : vector<8x8xbf16>, vector<8x8xbf16>, vector<8x8xf32> -> vector<8x8xf32>
    %98 = arith.truncf %97 : vector<8x8xf32> to vector<8x8xbf16>
    %c0_34 = arith.constant 0 : index
    %c0_35 = arith.constant 0 : index
    %c24 = arith.constant 24 : index
    %99 = vector.load %arg5[%c0_34, %c0_35, %c24] : memref<1x8x32xbf16, #tpu.memory_space<vmem>>, vector<1x8x8xbf16>
    %100 = vector.shape_cast %99 : vector<1x8x8xbf16> to vector<8x8xbf16>
    %101 = vector.shape_cast %98 : vector<8x8xbf16> to vector<1x8x8xbf16>
    tpu.vector_store %arg5[%c0_34, %c0_35, %c24], %101 {strides = array<i32>} : memref<1x8x32xbf16, #tpu.memory_space<vmem>>, vector<1x8x8xbf16>,
    return
  }
  func.func @transform_0(%arg0: i32, %arg1: i32) -> (i32, i32, i32) {
    %c0_i32 = arith.constant 0 : i32
    %c0_i32_0 = arith.constant 0 : i32
    return %arg0, %arg1, %c0_i32 : i32, i32, i32
  }
  func.func @transform_1(%arg0: i32, %arg1: i32) -> (i32, i32, i32) {
    %c0_i32 = arith.constant 0 : i32
    %c0_i32_0 = arith.constant 0 : i32
    %c0_i32_1 = arith.constant 0 : i32
    return %arg0, %c0_i32, %c0_i32_0 : i32, i32, i32
  }
  func.func @transform_2(%arg0: i32, %arg1: i32) -> (i32, i32, i32) {
    %c0_i32 = arith.constant 0 : i32
    %c0_i32_0 = arith.constant 0 : i32
    %c0_i32_1 = arith.constant 0 : i32
    return %arg0, %c0_i32, %c0_i32_0 : i32, i32, i32
  }
  func.func @transform_3(%arg0: i32, %arg1: i32) -> (i32, i32, i32) {
    %c0_i32 = arith.constant 0 : i32
    %c0_i32_0 = arith.constant 0 : i32
    return %arg0, %arg1, %c0_i32 : i32, i32, i32
  }
}

module attributes {stable_mosaic.version = 11 : i64} {
  func.func @_ffn_add_ln_kernel(%arg0: i32, %arg1: i32, %arg2: memref<16x32xbf16, #tpu.memory_space<vmem>>, %arg3: memref<64x32xbf16, #tpu.memory_space<vmem>>, %arg4: memref<1x64xf32, #tpu.memory_space<vmem>>, %arg5: memref<32x64xbf16, #tpu.memory_space<vmem>>, %arg6: memref<1x32xf32, #tpu.memory_space<vmem>>, %arg7: memref<1x32xf32, #tpu.memory_space<vmem>>, %arg8: memref<1x32xf32, #tpu.memory_space<vmem>>, %arg9: memref<16x32xbf16, #tpu.memory_space<vmem>>, %arg10: memref<16x32xf32, #tpu.memory_space<vmem>>) attributes {dimension_semantics = [#tpu.dimension_semantics<parallel>, #tpu.dimension_semantics<arbitrary>], iteration_bounds = array<i64: 1, 1>, scalar_prefetch = 0 : i64, scratch_operands = 1 : i64, tpu.core_type = #tpu.core_type<tc>, window_params = [{transform_indices = @transform_0, window_bounds = array<i64: 16, 32>}, {transform_indices = @transform_1, window_bounds = array<i64: 64, 32>}, {transform_indices = @transform_2, window_bounds = array<i64: 1, 64>}, {transform_indices = @transform_3, window_bounds = array<i64: 32, 64>}, {pipeline_mode = #tpu.pipeline_mode<synchronous>, transform_indices = @transform_4, window_bounds = array<i64: 1, 32>}, {pipeline_mode = #tpu.pipeline_mode<synchronous>, transform_indices = @transform_5, window_bounds = array<i64: 1, 32>}, {pipeline_mode = #tpu.pipeline_mode<synchronous>, transform_indices = @transform_6, window_bounds = array<i64: 1, 32>}, {transform_indices = @transform_7, window_bounds = array<i64: 16, 32>}]} {
    %c0_i32 = arith.constant 0 : i32
    %0 = arith.cmpi eq, %arg1, %c0_i32 : i32
    %1 = arith.extui %0 : i1 to i32
    %c0_i32_0 = arith.constant 0 : i32
    %2 = arith.cmpi ne, %1, %c0_i32_0 : i32
    scf.if %2 {
      %cst_16 = arith.constant 0.000000e+00 : f32
      %20 = vector.broadcast %cst_16 : f32 to vector<16x32xf32>
      %c0_17 = arith.constant 0 : index
      %c0_18 = arith.constant 0 : index
      %21 = vector.load %arg10[%c0_17, %c0_18] : memref<16x32xf32, #tpu.memory_space<vmem>>, vector<16x32xf32>
      tpu.vector_store %arg10[%c0_17, %c0_18], %20 {strides = array<i32>} : memref<16x32xf32, #tpu.memory_space<vmem>>, vector<16x32xf32>,
    } else {
    }
    %c0 = arith.constant 0 : index
    %c0_1 = arith.constant 0 : index
    %3 = vector.load %arg2[%c0, %c0_1] : memref<16x32xbf16, #tpu.memory_space<vmem>>, vector<16x32xbf16>
    %c0_2 = arith.constant 0 : index
    %c0_3 = arith.constant 0 : index
    %4 = vector.load %arg3[%c0_2, %c0_3] : memref<64x32xbf16, #tpu.memory_space<vmem>>, vector<64x32xbf16>
    %cst = arith.constant dense<0.000000e+00> : vector<16x64xf32>
    %5 = tpu.matmul %3, %4, %cst {dimension_numbers = #tpu.dot_dimension_numbers<[1], [1], [0], [0], [0, 0, 1, 0], [], []>} : vector<16x32xbf16>, vector<64x32xbf16>, vector<16x64xf32> -> vector<16x64xf32>
    %c0_4 = arith.constant 0 : index
    %c0_5 = arith.constant 0 : index
    %6 = vector.load %arg4[%c0_4, %c0_5] : memref<1x64xf32, #tpu.memory_space<vmem>>, vector<1x64xf32>
    %7 = vector.broadcast %6 : vector<1x64xf32> to vector<16x64xf32>
    %8 = arith.addf %5, %7 : vector<16x64xf32>
    %cst_6 = arith.constant 0.000000e+00 : f32
    %9 = vector.broadcast %cst_6 : f32 to vector<16x64xf32>
    %10 = arith.maximumf %8, %9 : vector<16x64xf32>
    %c0_7 = arith.constant 0 : index
    %c0_8 = arith.constant 0 : index
    %11 = vector.load %arg10[%c0_7, %c0_8] : memref<16x32xf32, #tpu.memory_space<vmem>>, vector<16x32xf32>
    %c0_9 = arith.constant 0 : index
    %c0_10 = arith.constant 0 : index
    %12 = vector.load %arg5[%c0_9, %c0_10] : memref<32x64xbf16, #tpu.memory_space<vmem>>, vector<32x64xbf16>
    %13 = arith.truncf %10 : vector<16x64xf32> to vector<16x64xbf16>
    %cst_11 = arith.constant dense<0.000000e+00> : vector<16x32xf32>
    %14 = tpu.matmul %13, %12, %cst_11 {dimension_numbers = #tpu.dot_dimension_numbers<[1], [1], [0], [0], [0, 0, 1, 0], [], []>} : vector<16x64xbf16>, vector<32x64xbf16>, vector<16x32xf32> -> vector<16x32xf32>
    %15 = arith.addf %11, %14 : vector<16x32xf32>
    %c0_12 = arith.constant 0 : index
    %c0_13 = arith.constant 0 : index
    %16 = vector.load %arg10[%c0_12, %c0_13] : memref<16x32xf32, #tpu.memory_space<vmem>>, vector<16x32xf32>
    tpu.vector_store %arg10[%c0_12, %c0_13], %15 {strides = array<i32>} : memref<16x32xf32, #tpu.memory_space<vmem>>, vector<16x32xf32>,
    %c0_i32_14 = arith.constant 0 : i32
    %17 = arith.cmpi eq, %arg1, %c0_i32_14 : i32
    %18 = arith.extui %17 : i1 to i32
    %c0_i32_15 = arith.constant 0 : i32
    %19 = arith.cmpi ne, %18, %c0_i32_15 : i32
    scf.if %19 {
      %20 = arith.extf %3 : vector<16x32xbf16> to vector<16x32xf32>
      %c0_16 = arith.constant 0 : index
      %c0_17 = arith.constant 0 : index
      %21 = vector.load %arg10[%c0_16, %c0_17] : memref<16x32xf32, #tpu.memory_space<vmem>>, vector<16x32xf32>
      %22 = arith.addf %20, %21 : vector<16x32xf32>
      %c0_18 = arith.constant 0 : index
      %c0_19 = arith.constant 0 : index
      %23 = vector.load %arg6[%c0_18, %c0_19] : memref<1x32xf32, #tpu.memory_space<vmem>>, vector<1x32xf32>
      %24 = vector.broadcast %23 : vector<1x32xf32> to vector<16x32xf32>
      %25 = arith.addf %22, %24 : vector<16x32xf32>
      %c0_20 = arith.constant 0 : index
      %c0_21 = arith.constant 0 : index
      %26 = vector.load %arg7[%c0_20, %c0_21] : memref<1x32xf32, #tpu.memory_space<vmem>>, vector<1x32xf32>
      %c0_22 = arith.constant 0 : index
      %c0_23 = arith.constant 0 : index
      %27 = vector.load %arg8[%c0_22, %c0_23] : memref<1x32xf32, #tpu.memory_space<vmem>>, vector<1x32xf32>
      %cst_24 = arith.constant dense<0.000000e+00> : vector<16xf32>
      %28 = vector.multi_reduction <add>, %25, %cst_24 [1] : vector<16x32xf32> to vector<16xf32>
      %29 = vector.shape_cast %28 : vector<16xf32> to vector<16x1xf32>
      %cst_25 = arith.constant 3.200000e+01 : f32
      %30 = vector.broadcast %cst_25 : f32 to vector<16x1xf32>
      %31 = arith.divf %29, %30 : vector<16x1xf32>
      %32 = vector.broadcast %31 : vector<16x1xf32> to vector<16x32xf32>
      %33 = arith.subf %25, %32 : vector<16x32xf32>
      %34 = arith.mulf %33, %33 : vector<16x32xf32>
      %cst_26 = arith.constant dense<0.000000e+00> : vector<16xf32>
      %35 = vector.multi_reduction <add>, %34, %cst_26 [1] : vector<16x32xf32> to vector<16xf32>
      %36 = vector.shape_cast %35 : vector<16xf32> to vector<16x1xf32>
      %cst_27 = arith.constant 3.200000e+01 : f32
      %37 = vector.broadcast %cst_27 : f32 to vector<16x1xf32>
      %38 = arith.divf %36, %37 : vector<16x1xf32>
      %39 = vector.broadcast %31 : vector<16x1xf32> to vector<16x32xf32>
      %40 = arith.subf %25, %39 : vector<16x32xf32>
      %cst_28 = arith.constant 9.99999974E-6 : f32
      %41 = vector.broadcast %cst_28 : f32 to vector<16x1xf32>
      %42 = arith.addf %38, %41 : vector<16x1xf32>
      %43 = math.rsqrt %42 : vector<16x1xf32>
      %44 = vector.broadcast %43 : vector<16x1xf32> to vector<16x32xf32>
      %45 = arith.mulf %40, %44 : vector<16x32xf32>
      %46 = vector.broadcast %26 : vector<1x32xf32> to vector<16x32xf32>
      %47 = arith.mulf %45, %46 : vector<16x32xf32>
      %48 = vector.broadcast %27 : vector<1x32xf32> to vector<16x32xf32>
      %49 = arith.addf %47, %48 : vector<16x32xf32>
      %50 = arith.truncf %49 : vector<16x32xf32> to vector<16x32xbf16>
      %c0_29 = arith.constant 0 : index
      %c0_30 = arith.constant 0 : index
      %51 = vector.load %arg9[%c0_29, %c0_30] : memref<16x32xbf16, #tpu.memory_space<vmem>>, vector<16x32xbf16>
      tpu.vector_store %arg9[%c0_29, %c0_30], %50 {strides = array<i32>} : memref<16x32xbf16, #tpu.memory_space<vmem>>, vector<16x32xbf16>,
    } else {
    }
    return
  }
  func.func @transform_0(%arg0: i32, %arg1: i32) -> (i32, i32) {
    %c0_i32 = arith.constant 0 : i32
    %c0_i32_0 = arith.constant 0 : i32
    return %arg0, %c0_i32 : i32, i32
  }
  func.func @transform_1(%arg0: i32, %arg1: i32) -> (i32, i32) {
    %c0_i32 = arith.constant 0 : i32
    %c0_i32_0 = arith.constant 0 : i32
    return %arg1, %c0_i32 : i32, i32
  }
  func.func @transform_2(%arg0: i32, %arg1: i32) -> (i32, i32) {
    %c0_i32 = arith.constant 0 : i32
    %c0_i32_0 = arith.constant 0 : i32
    return %c0_i32, %arg1 : i32, i32
  }
  func.func @transform_3(%arg0: i32, %arg1: i32) -> (i32, i32) {
    %c0_i32 = arith.constant 0 : i32
    %c0_i32_0 = arith.constant 0 : i32
    return %c0_i32, %arg1 : i32, i32
  }
  func.func @transform_4(%arg0: i32, %arg1: i32) -> (i32, i32) {
    %c0_i32 = arith.constant 0 : i32
    %c0_i32_0 = arith.constant 0 : i32
    %c0_i32_1 = arith.constant 0 : i32
    return %c0_i32, %c0_i32_0 : i32, i32
  }
  func.func @transform_5(%arg0: i32, %arg1: i32) -> (i32, i32) {
    %c0_i32 = arith.constant 0 : i32
    %c0_i32_0 = arith.constant 0 : i32
    %c0_i32_1 = arith.constant 0 : i32
    return %c0_i32, %c0_i32_0 : i32, i32
  }
  func.func @transform_6(%arg0: i32, %arg1: i32) -> (i32, i32) {
    %c0_i32 = arith.constant 0 : i32
    %c0_i32_0 = arith.constant 0 : i32
    %c0_i32_1 = arith.constant 0 : i32
    return %c0_i32, %c0_i32_0 : i32, i32
  }
  func.func @transform_7(%arg0: i32, %arg1: i32) -> (i32, i32) {
    %c0_i32 = arith.constant 0 : i32
    %c0_i32_0 = arith.constant 0 : i32
    return %arg0, %c0_i32 : i32, i32
  }
}

module attributes {stable_mosaic.version = 11 : i64} {
  func.func @_linear_kernel(%arg0: i32, %arg1: i32, %arg2: i32, %arg3: memref<16x32xbf16, #tpu.memory_space<vmem>>, %arg4: memref<40x32xbf16, #tpu.memory_space<vmem>>, %arg5: memref<1x40xf32, #tpu.memory_space<vmem>>, %arg6: memref<16x40xf32, #tpu.memory_space<vmem>>, %arg7: memref<16x40xf32, #tpu.memory_space<vmem>>) attributes {dimension_semantics = [#tpu.dimension_semantics<parallel>, #tpu.dimension_semantics<parallel>, #tpu.dimension_semantics<arbitrary>], iteration_bounds = array<i64: 1, 1, 1>, scalar_prefetch = 0 : i64, scratch_operands = 1 : i64, tpu.core_type = #tpu.core_type<tc>, window_params = [{transform_indices = @transform_0, window_bounds = array<i64: 16, 32>}, {transform_indices = @transform_1, window_bounds = array<i64: 40, 32>}, {transform_indices = @transform_2, window_bounds = array<i64: 1, 40>}, {transform_indices = @transform_3, window_bounds = array<i64: 16, 40>}]} {
    %c0_i32 = arith.constant 0 : i32
    %0 = arith.cmpi eq, %arg2, %c0_i32 : i32
    %1 = arith.extui %0 : i1 to i32
    %c0_i32_0 = arith.constant 0 : i32
    %2 = arith.cmpi ne, %1, %c0_i32_0 : i32
    scf.if %2 {
      %cst_10 = arith.constant 0.000000e+00 : f32
      %12 = vector.broadcast %cst_10 : f32 to vector<16x40xf32>
      %c0_11 = arith.constant 0 : index
      %c0_12 = arith.constant 0 : index
      %13 = vector.load %arg7[%c0_11, %c0_12] : memref<16x40xf32, #tpu.memory_space<vmem>>, vector<16x40xf32>
      tpu.vector_store %arg7[%c0_11, %c0_12], %12 {strides = array<i32>} : memref<16x40xf32, #tpu.memory_space<vmem>>, vector<16x40xf32>,
    } else {
    }
    %c0 = arith.constant 0 : index
    %c0_1 = arith.constant 0 : index
    %3 = vector.load %arg7[%c0, %c0_1] : memref<16x40xf32, #tpu.memory_space<vmem>>, vector<16x40xf32>
    %c0_2 = arith.constant 0 : index
    %c0_3 = arith.constant 0 : index
    %4 = vector.load %arg3[%c0_2, %c0_3] : memref<16x32xbf16, #tpu.memory_space<vmem>>, vector<16x32xbf16>
    %c0_4 = arith.constant 0 : index
    %c0_5 = arith.constant 0 : index
    %5 = vector.load %arg4[%c0_4, %c0_5] : memref<40x32xbf16, #tpu.memory_space<vmem>>, vector<40x32xbf16>
    %cst = arith.constant dense<0.000000e+00> : vector<16x40xf32>
    %6 = tpu.matmul %4, %5, %cst {dimension_numbers = #tpu.dot_dimension_numbers<[1], [1], [0], [0], [0, 0, 1, 0], [], []>} : vector<16x32xbf16>, vector<40x32xbf16>, vector<16x40xf32> -> vector<16x40xf32>
    %7 = arith.addf %3, %6 : vector<16x40xf32>
    %c0_6 = arith.constant 0 : index
    %c0_7 = arith.constant 0 : index
    %8 = vector.load %arg7[%c0_6, %c0_7] : memref<16x40xf32, #tpu.memory_space<vmem>>, vector<16x40xf32>
    tpu.vector_store %arg7[%c0_6, %c0_7], %7 {strides = array<i32>} : memref<16x40xf32, #tpu.memory_space<vmem>>, vector<16x40xf32>,
    %c0_i32_8 = arith.constant 0 : i32
    %9 = arith.cmpi eq, %arg2, %c0_i32_8 : i32
    %10 = arith.extui %9 : i1 to i32
    %c0_i32_9 = arith.constant 0 : i32
    %11 = arith.cmpi ne, %10, %c0_i32_9 : i32
    scf.if %11 {
      %c0_10 = arith.constant 0 : index
      %c0_11 = arith.constant 0 : index
      %12 = vector.load %arg7[%c0_10, %c0_11] : memref<16x40xf32, #tpu.memory_space<vmem>>, vector<16x40xf32>
      %c0_12 = arith.constant 0 : index
      %c0_13 = arith.constant 0 : index
      %13 = vector.load %arg5[%c0_12, %c0_13] : memref<1x40xf32, #tpu.memory_space<vmem>>, vector<1x40xf32>
      %14 = vector.broadcast %13 : vector<1x40xf32> to vector<16x40xf32>
      %15 = arith.addf %12, %14 : vector<16x40xf32>
      %c0_14 = arith.constant 0 : index
      %c0_15 = arith.constant 0 : index
      %16 = vector.load %arg6[%c0_14, %c0_15] : memref<16x40xf32, #tpu.memory_space<vmem>>, vector<16x40xf32>
      tpu.vector_store %arg6[%c0_14, %c0_15], %15 {strides = array<i32>} : memref<16x40xf32, #tpu.memory_space<vmem>>, vector<16x40xf32>,
    } else {
    }
    return
  }
  func.func @transform_0(%arg0: i32, %arg1: i32, %arg2: i32) -> (i32, i32) {
    %c0_i32 = arith.constant 0 : i32
    return %arg0, %arg2 : i32, i32
  }
  func.func @transform_1(%arg0: i32, %arg1: i32, %arg2: i32) -> (i32, i32) {
    %c0_i32 = arith.constant 0 : i32
    return %arg1, %arg2 : i32, i32
  }
  func.func @transform_2(%arg0: i32, %arg1: i32, %arg2: i32) -> (i32, i32) {
    %c0_i32 = arith.constant 0 : i32
    %c0_i32_0 = arith.constant 0 : i32
    return %c0_i32, %arg1 : i32, i32
  }
  func.func @transform_3(%arg0: i32, %arg1: i32, %arg2: i32) -> (i32, i32) {
    %c0_i32 = arith.constant 0 : i32
    return %arg0, %arg1 : i32, i32
  }
}

</mosaic_0001>

<bundles_post_ra>
// kernel: seq2seq_forward.29
= control target key start
LH: loop header
LB: loop body
LE: loop exit
PB: predicated region body
PF: predicated region fallthrough
CT: control target
= control target key end

     0   :  { %vm52_vm0 = vcmask 261120   ;;  %v204_v0 = vmov 0.0   ;;  %vm205_vm1 = vmmov 0   ;;  %vm162_vm2 = vcmask 257024   ;;  %s275_s1 = inlined_call_operand.vmem [shape: bf16[32,32], index: 1, kind: input, shape index: {}]   ;;  %s276_s0 = inlined_call_operand.vmem [shape: bf16[16,32], index: 0, kind: input, shape index: {}]   ;;  %s277_s3 = inlined_call_operand.vmem [shape: bf16[16,32], index: 3, kind: input, shape index: {}]   ;;  %s278_s2 = inlined_call_operand.vmem [shape: f32[1,32], index: 2, kind: input, shape index: {}]   ;;  %s279_s4 = inlined_call_operand.vmem [shape: f32[1,32], index: 4, kind: input, shape index: {}]   ;;  %s280_s5 = inlined_call_operand.vmem [shape: f32[1,32], index: 5, kind: input, shape index: {}]   ;;  %s281_s6 = inlined_call_operand.vmem [shape: bf16[16,32], index: 6, kind: output, shape index: {}]  }
   0x1   :  { %187 = vmatprep.subr.bf16.mxu0 %v204_v0  ;;  %v197_v1 = vld [vmem:[%s275_s1] sm:$0xff]   ;;  %191 = vmatprep.mubr.msk.bf16.mxu0 %vm205_vm1, %v204_v0  ;;  %v198_v3 = vld [vmem:[%s275_s1 + $0x8] sm:$0xff]  }
   0x2   :  { %v57_v2 = vsel %vm52_vm0, %v197_v1, 0  ;;  %v60_v4 = vsel %vm52_vm0, %v198_v3, 0  ;;  %v199_v5 = vld [vmem:[%s276_s0] sm:$0xff]  }
   0x3   :  { %188 = vmatpush3.bf16.xpose.msra.mxu0 %v57_v2  ;;  %v181_v6 = vld [vmem:[%s277_s3] sm:$0xff]  }
   0x4   :  { %189 = vmatprep.subr.bf16.mxu0 %v204_v0  ;;  %v169_v7 = vld [vmem:[%s278_s2] ss:$0 sm:$0xff]  ;;  %v182_v8 = vunpack.c.l.bf16 %v181_v6  ;;  %v183_v12 = vunpack.c.h.bf16 %v181_v6 }
   0x5   :  { %v174_v37 = vld [vmem:[%s279_s4] ss:$0 sm:$0xff] }
   0x6   :  { %v175_v39 = vld [vmem:[%s280_s5] ss:$0 sm:$0xff] }
   0xb   :  { %190 = vmatpush3.bf16.xpose.msra.mxu0 %v60_v4 }
  0x12   :  { %192 = vmatmul.mubr.msk.bf16.vlgmr.msra.gmra.mrb[0].mxu0 %vm52_vm0, %v199_v5 }
  0xe5   :  { %v96_v9 = vpop.f32.mrb[0].mxu0 }
  0xe6   :  { %v97_v10 = vadd.f32 %v169_v7, %v96_v9  ;;  %v193_v11 = vpop.f32.mrb[1].mxu0 }
  0xe7   :  { %v99_v13 = vpop.f32.mrb[2].mxu0 }
  0xe8   :  { %v100_v14 = vadd.f32 %v169_v7, %v99_v13  ;;  %v194_v15 = vpop.f32.mrb[3].mxu0  ;;  %v107_v16 = vadd.f32 %v182_v8, %v97_v10 }
  0xea   :  { %v111_v17 = vsel %vm52_vm0, %v107_v16, 0.0  ;;  %v108_v18 = vadd.f32 %v183_v12, %v100_v14 }
  0xeb   :  { %112 = vadd.xlane.f32.xlu0 %v111_v17 }
  0xec   :  { %v114_v19 = vsel %vm52_vm0, %v108_v18, 0.0 }
  0xef   :  { %115 = vadd.xlane.f32.xlu0 %v114_v19 }
 0x178   :  { %v113_v20 = vpop.xlane.xlu0 %112 }
 0x179   :  { %v118_v21 = vmul.f32 0.03125, %v113_v20 }
 0x17b   :  { %v120_v22 = vsub.f32 %v107_v16, %v118_v21 }
 0x17c   :  { %v116_v23 = vpop.xlane.xlu0 %115 }
 0x17d   :  { %v119_v24 = vmul.f32 0.03125, %v116_v23  ;;  %v122_v25 = vmul.f32 %v120_v22, %v120_v22 }
 0x17f   :  { %v121_v26 = vsub.f32 %v108_v18, %v119_v24  ;;  %v124_v27 = vsel %vm52_vm0, %v122_v25, 0.0 }
 0x180   :  { %125 = vadd.xlane.f32.xlu1 %v124_v27 }
 0x181   :  { %v123_v28 = vmul.f32 %v121_v26, %v121_v26 }
 0x183   :  { %v127_v29 = vsel %vm52_vm0, %v123_v28, 0.0 }
 0x184   :  { %128 = vadd.xlane.f32.xlu1 %v127_v29 }
 0x20d   :  { %v126_v30 = vpop.xlane.xlu1 %125 }
 0x20e   :  { %v130_v31 = vmul.f32 0.03125, %v126_v30 }
 0x210   :  { %v132_v32 = vadd.f32 1e-12, %v130_v31 }
 0x211   :  { %v129_v33 = vpop.xlane.xlu1 %128 }
 0x212   :  { %200 = vrsqrt.f32 %v132_v32  ;;  %v131_v34 = vmul.f32 0.03125, %v129_v33 }
 0x214   :  { %v133_v35 = vadd.f32 1e-12, %v131_v34 }
 0x216   :  { %202 = vrsqrt.f32 %v133_v35 }
 0x21c   :  { %v201_v36 = vpop.eup %200 }
 0x21d   :  { %v136_v38 = vmul.f32 %v201_v36, %v120_v22 }
 0x21f   :  { %v144_v40 = vmul.f32 %v174_v37, %v136_v38 }
 0x220   :  { %v203_v41 = vpop.eup %202 }
 0x221   :  { %v152_v42 = vadd.f32 %v175_v39, %v144_v40  ;;  %v137_v43 = vmul.f32 %v203_v41, %v121_v26 }
 0x223   :  { %v178_v44 = vpack.c.bf16 %v152_v42, %v152_v42  ;;  %v145_v45 = vmul.f32 %v174_v37, %v137_v43 }
 0x225   :  { %163 = vst.msk [vmem:[%s281_s6] sm:$0xf] %vm162_vm2, %v178_v44  ;;  %v153_v46 = vadd.f32 %v175_v39, %v145_v45 }
 0x227   :  { %v179_v47 = vpack.c.bf16 %v153_v46, %v153_v46 }
 0x229   :  { %164 = vst.msk [vmem:[%s281_s6 + $0x4] sm:$0xf] %vm162_vm2, %v179_v47 }

// kernel: seq2seq_forward.26
= control target key start
LH: loop header
LB: loop body
LE: loop exit
PB: predicated region body
PF: predicated region fallthrough
CT: control target
= control target key end

     0   :  { %vm20_vm0 = vcmask 261120   ;;  %vm72_vm1 = vcmask 257024   ;;  %s132_s0 = inlined_call_operand.vmem [shape: bf16[16,32], index: 0, kind: input, shape index: {}]   ;;  %s133_s1 = inlined_call_operand.vmem [shape: f32[1,32], index: 1, kind: input, shape index: {}]   ;;  %s134_s2 = inlined_call_operand.vmem [shape: f32[1,32], index: 2, kind: input, shape index: {}]   ;;  %s135_s3 = inlined_call_operand.vmem [shape: bf16[16,32], index: 3, kind: output, shape index: {}]  }
   0x1   :  { %v86_v0 = vld [vmem:[%s132_s0] sm:$0xff]  }
   0x2   :  { %v87_v1 = vunpack.c.l.bf16 %v86_v0  ;;  %v88_v2 = vunpack.c.h.bf16 %v86_v0  ;;  %v79_v22 = vld [vmem:[%s133_s1] ss:$0 sm:$0xff] }
   0x3   :  { %v80_v24 = vld [vmem:[%s134_s2] ss:$0 sm:$0xff] }
   0x4   :  { %v21_v3 = vsel %vm20_vm0, %v87_v1, 0.0  ;;  %v24_v4 = vsel %vm20_vm0, %v88_v2, 0.0 }
   0x5   :  { %22 = vadd.xlane.f32.xlu0 %v21_v3 }
   0x9   :  { %25 = vadd.xlane.f32.xlu0 %v24_v4 }
  0x92   :  { %v23_v5 = vpop.xlane.xlu0 %22 }
  0x93   :  { %v28_v6 = vmul.f32 0.03125, %v23_v5 }
  0x95   :  { %v30_v7 = vsub.f32 %v87_v1, %v28_v6 }
  0x96   :  { %v26_v8 = vpop.xlane.xlu0 %25 }
  0x97   :  { %v29_v9 = vmul.f32 0.03125, %v26_v8  ;;  %v32_v10 = vmul.f32 %v30_v7, %v30_v7 }
  0x99   :  { %v31_v11 = vsub.f32 %v88_v2, %v29_v9  ;;  %v34_v12 = vsel %vm20_vm0, %v32_v10, 0.0 }
  0x9a   :  { %35 = vadd.xlane.f32.xlu1 %v34_v12 }
  0x9b   :  { %v33_v13 = vmul.f32 %v31_v11, %v31_v11 }
  0x9d   :  { %v37_v14 = vsel %vm20_vm0, %v33_v13, 0.0 }
  0x9e   :  { %38 = vadd.xlane.f32.xlu1 %v37_v14 }
 0x127   :  { %v36_v15 = vpop.xlane.xlu1 %35 }
 0x128   :  { %v40_v16 = vmul.f32 0.03125, %v36_v15 }
 0x12a   :  { %v42_v17 = vadd.f32 1e-12, %v40_v16 }
 0x12b   :  { %v39_v18 = vpop.xlane.xlu1 %38 }
 0x12c   :  { %89 = vrsqrt.f32 %v42_v17  ;;  %v41_v19 = vmul.f32 0.03125, %v39_v18 }
 0x12e   :  { %v43_v20 = vadd.f32 1e-12, %v41_v19 }
 0x130   :  { %91 = vrsqrt.f32 %v43_v20 }
 0x136   :  { %v90_v21 = vpop.eup %89 }
 0x137   :  { %v46_v23 = vmul.f32 %v90_v21, %v30_v7 }
 0x139   :  { %v54_v25 = vmul.f32 %v79_v22, %v46_v23 }
 0x13a   :  { %v92_v26 = vpop.eup %91 }
 0x13b   :  { %v62_v27 = vadd.f32 %v80_v24, %v54_v25  ;;  %v47_v28 = vmul.f32 %v92_v26, %v31_v11 }
 0x13d   :  { %v83_v29 = vpack.c.bf16 %v62_v27, %v62_v27  ;;  %v55_v30 = vmul.f32 %v79_v22, %v47_v28 }
 0x13f   :  { %73 = vst.msk [vmem:[%s135_s3] sm:$0xf] %vm72_vm1, %v83_v29  ;;  %v63_v31 = vadd.f32 %v80_v24, %v55_v30 }
 0x141   :  { %v84_v32 = vpack.c.bf16 %v63_v31, %v63_v31 }
 0x143   :  { %74 = vst.msk [vmem:[%s135_s3 + $0x4] sm:$0xf] %vm72_vm1, %v84_v32 }

// kernel: seq2seq_forward.27
= control target key start
LH: loop header
LB: loop body
LE: loop exit
PB: predicated region body
PF: predicated region fallthrough
CT: control target
= control target key end

     0   :  { %vm51_vm0 = vcmask 261120   ;;  %v276_v0 = vmov 0.0   ;;  %vm277_vm1 = vmmov 0   ;;  %vm110_vm2 = vcmask 257024   ;;  %s360_s3 = inlined_call_operand.vmem [shape: bf16[64,32], index: 3, kind: input, shape index: {}]   ;;  %s361_s1 = inlined_call_operand.vmem [shape: bf16[32,32], index: 1, kind: input, shape index: {}]   ;;  %s362_s0 = inlined_call_operand.vmem [shape: bf16[16,32], index: 0, kind: input, shape index: {}]   ;;  %s363_s2 = inlined_call_operand.vmem [shape: f32[1,32], index: 2, kind: input, shape index: {}]   ;;  %s364_s5 = inlined_call_operand.vmem [shape: bf16[16,32], index: 5, kind: output, shape index: {0}]   ;;  %s365_s4 = inlined_call_operand.vmem [shape: f32[1,64], index: 4, kind: input, shape index: {}]   ;;  %s366_s6 = inlined_call_operand.vmem [shape: bf16[16,64], index: 6, kind: output, shape index: {1}]  }
   0x1   :  { %255 = vmatprep.subr.bf16.mxu1 %v276_v0  ;;  %v269_v1 = vld [vmem:[%s360_s3] sm:$0xff]   ;;  %247 = vmatprep.subr.bf16.mxu0 %v276_v0  ;;  %v270_v4 = vld [vmem:[%s360_s3 + $0x8] sm:$0xff]   ;;  %v272_v9 = vld [vmem:[%s360_s3 + $0x10] sm:$0xff]   ;;  %vm209_vm3 = vcmask 519168  }
   0x2   :  { %251 = vmatprep.mubr.msk.bf16.mxu0 %vm277_vm1, %v276_v0  ;;  %263 = vmatprep.mubr.msk.bf16.mxu1 %vm277_vm1, %v276_v0  ;;  %v149_v2 = vsel %vm51_vm0, %v269_v1, 0  ;;  %v271_v3 = vld [vmem:[%s361_s1] sm:$0xff]   ;;  %v273_v6 = vld [vmem:[%s361_s1 + $0x8] sm:$0xff]   ;;  %v152_v7 = vsel %vm51_vm0, %v270_v4, 0  ;;  %v155_v10 = vsel %vm51_vm0, %v272_v9, 0  ;;  %v274_v12 = vld [vmem:[%s360_s3 + $0x18] sm:$0xff]  }
   0x3   :  { %256 = vmatpush3.bf16.xpose.msra.mxu1 %v149_v2  ;;  %v56_v5 = vsel %vm51_vm0, %v271_v3, 0  ;;  %v59_v8 = vsel %vm51_vm0, %v273_v6, 0  ;;  %v275_v11 = vld [vmem:[%s362_s0] sm:$0xff]   ;;  %v158_v13 = vsel %vm51_vm0, %v274_v12, 0 }
   0x4   :  { %257 = vmatprep.subr.bf16.mxu1 %v276_v0  ;;  %248 = vmatpush3.bf16.xpose.msra.mxu0 %v56_v5  ;;  %v220_v14 = vld [vmem:[%s363_s2] ss:$0 sm:$0xff] }
   0x5   :  { %249 = vmatprep.subr.bf16.mxu0 %v276_v0  ;;  %v227_v23 = vld [vmem:[%s365_s4] ss:$0 sm:$0xff] }
   0xb   :  { %258 = vmatpush3.bf16.xpose.msra.mxu1 %v152_v7 }
   0xc   :  { %259 = vmatprep.subr.bf16.mxu1 %v276_v0  ;;  %250 = vmatpush3.bf16.xpose.msra.mxu0 %v59_v8 }
  0x13   :  { %260 = vmatpush3.bf16.xpose.msra.mxu1 %v155_v10  ;;  %252 = vmatmul.mubr.msk.bf16.vlgmr.msra.gmra.mrb[0].mxu0 %vm51_vm0, %v275_v11 }
  0x14   :  { %261 = vmatprep.subr.bf16.mxu1 %v276_v0 }
  0x1b   :  { %262 = vmatpush3.bf16.xpose.msra.mxu1 %v158_v13 }
  0x22   :  { %264 = vmatmul.mubr.msk.bf16.vlgmr.msra.gmra.mrb[0].mxu1 %vm51_vm0, %v275_v11 }
  0xe6   :  { %v95_v15 = vpop.f32.mrb[0].mxu0 }
  0xe7   :  { %v96_v16 = vadd.f32 %v220_v14, %v95_v15  ;;  %v253_v17 = vpop.f32.mrb[1].mxu0 }
  0xe8   :  { %v98_v18 = vpop.f32.mrb[2].mxu0 }
  0xe9   :  { %v235_v19 = vpack.c.bf16 %v96_v16, %v96_v16  ;;  %v99_v20 = vadd.f32 %v220_v14, %v98_v18  ;;  %v254_v21 = vpop.f32.mrb[3].mxu0 }
  0xeb   :  { %111 = vst.msk [vmem:[%s364_s5] sm:$0xf] %vm110_vm2, %v235_v19  ;;  %v236_v22 = vpack.c.bf16 %v99_v20, %v99_v20 }
  0xed   :  { %112 = vst.msk [vmem:[%s364_s5 + $0x4] sm:$0xf] %vm110_vm2, %v236_v22 }
  0xf5   :  { %v194_v24 = vpop.f32.mrb[0].mxu1 }
  0xf6   :  { %v195_v25 = vadd.f32 %v227_v23, %v194_v24  ;;  %v265_v26 = vpop.f32.mrb[1].mxu1 }
  0xf7   :  { %v197_v27 = vpop.f32.mrb[2].mxu1 }
  0xf8   :  { %v237_v28 = vpack.c.bf16 %v195_v25, %v195_v25  ;;  %v198_v29 = vadd.f32 %v227_v23, %v197_v27  ;;  %v266_v30 = vpop.f32.mrb[3].mxu1 }
  0xfa   :  { %210 = vst.msk [vmem:[%s366_s6] sm:$0xf] %vm209_vm3, %v237_v28  ;;  %v238_v31 = vpack.c.bf16 %v198_v29, %v198_v29 }
  0xfc   :  { %211 = vst.msk [vmem:[%s366_s6 + $0x4] sm:$0xf] %vm209_vm3, %v238_v31 }

// kernel: seq2seq_forward.28
= control target key start
LH: loop header
LB: loop body
LE: loop exit
PB: predicated region body
PF: predicated region fallthrough
CT: control target
= control target key end

     0   :  { %s949_s9 = smov 0   ;;  %s951_s10 = smov 0   ;;  %s1053_s0 = inlined_call_operand.vmem [shape: bf16[2,8,32], index: 0, kind: input, shape index: {}]   ;;  %s1054_s1 = inlined_call_operand.vmem [shape: bf16[2,8,64], index: 1, kind: input, shape index: {}]   ;;  %s1055_s2 = inlined_call_operand.vmem [shape: bf16[2,8,32], index: 2, kind: output, shape index: {}]  }
   0x1   :  { %s953_s11 = smov 0  }
   0x2 LB: > { %s24_s12 = sadd.s32 1, %s916_s10  ;;  %p758_p0 = scmp.ge.s32.totalorder %s920_s11, 1  ;;  %s920_s11 = sphi %s953_s11, %s12_s11   ;;  %s916_s10 = sphi %s951_s10, %s1057_s10   ;;  %s912_s9 = sphi %s949_s9, %s1056_s9  }
   0x3   : > { %p26_p1 = scmp.ge.s32.totalorder %s24_s12, 2  ;;  %p139_p2 = scmp.lt.s32.totalorder %s920_s11, 3 }
   0x5   : > { %s1059_s12 = smov (%p26_p1, %s24_s12), 0  ;;  %p140_p3 = pnand %p758_p0, %p139_p2 }
   0x6   : > { %p169_p4 = scmp.lt.s32.totalorder (!%p140_p3), %s912_s9, 1  ;;  %v922_v0 = vmov (!%p140_p3), 0.0   ;;  %vm923_vm0 = vmmov (!%p140_p3), 0   ;;  %vm190_vm1 = vcmask (!%p140_p3), 64512   ;;  %s924_s20 = smov (!%p140_p3), 96   ;;  %vm258_vm2 = vcmask (!%p140_p3), 1043456  }
   0x7   : > { %143 = sbr.rel (%p140_p3) target bundleno = 1441 (0x5a1), region = 28  ;;  %796 = vmatprep.subr.bf16.mxu0 (!%p140_p3), %v922_v0  ;;  %798 = vmatprep.mubr.msk.bf16.mxu0 (!%p140_p3), %vm923_vm0, %v922_v0  ;;  %s925_s21 = smov (!%p140_p3), 120   ;;  %vm303_vm3 = vcmask (!%p140_p3), 60416   ;;  %vm426_vm4 = vcmask (!%p140_p3), 126016   ;;  %vm546_vm5 = vcmask (!%p140_p3), 191616   ;;  %vm666_vm6 = vcmask (!%p140_p3), 257216  }
   0x8   : > { %802 = vmatprep.subr.bf16.mxu1 (!%p140_p3), %v922_v0  ;;  %804 = vmatprep.mubr.msk.bf16.mxu1 (!%p140_p3), %vm923_vm0, %v922_v0  ;;  %s926_s22 = smov (!%p140_p3), 112   ;;  %s927_s23 = smov (!%p140_p3), 104  }
   0x9   : > { %s928_s27 = smov (!%p140_p3), 88   ;;  %s929_s28 = smov (!%p140_p3), 72  }
   0xa   : > { %s930_s29 = smov (!%p140_p3), 80   ;;  %s931_s30 = smov (!%p140_p3), 8  }
   0xb   : > { %s932_s3 = smov (!%p140_p3), 16   ;;  %s933_s4 = smov (!%p140_p3), 24  }
   0xe   : > { %s1061_s9 = smov (!%p169_p4, %s912_s9), 1 }
   0xf   : > { %s973_s13 = sshll.u32 %s1061_s9, 2 }
  0x10   : > { %s179_s16 = scalar_lea.vmem %s1054_s1, %s973_s13  ;;  %s175_s19 = scalar_lea.vmem %s1053_s0, %s973_s13 }
  0x11   : > { %v189_v1 = vld [vmem:[%s179_s16] sm:$0xf]  ;;  %s1017_s26 = scalar_lea.vmem %s1055_s2, %s973_s13 }
  0x12   : > { %v195_v2 = vsel %vm190_vm1, %v189_v1, 0  ;;  %v188_v3 = vld [vmem:[%s175_s19] sm:$0xf]  ;;  %v989_v10 = vcombine.low %v189_v1, %v189_v1 }
  0x13   : > { %797 = vmatpush3.bf16.xpose.msra.mxu0 %v195_v2  ;;  %v765_v11 = vcombine.low %v188_v3, %v188_v3 }
  0x14   : > { %814 = vmatprep.subr.bf16.mxu0 %v922_v0  ;;  %253 = vrot.lane.b32.xlu1 %v989_v10, %s924_s20 }
  0x18   : > { %310 = vrot.lane.b32.xlu1 %v989_v10, %s925_s21 }
  0x1a   : > { %799 = vmatmul.mubr.msk.bf16.vlgmr.msra.gmra.mrb[0].mxu0 %vm190_vm1, %v188_v3 }
  0x1b   : > { %816 = vmatprep.mubr.msk.bf16.mxu0 %vm923_vm0, %v922_v0 }
  0x1c   : > { %430 = vrot.lane.b32.xlu1 %v989_v10, %s926_s22 }
  0x20   : > { %428 = vrot.lane.b32.xlu1 %v765_v11, %s926_s22 }
  0x24   : > { %550 = vrot.lane.b32.xlu1 %v989_v10, %s927_s23 }
  0x28   : > { %548 = vrot.lane.b32.xlu1 %v765_v11, %s927_s23 }
  0x86   : > { %v254_v17 = vpop.permute.xlu1 %253 }
  0x87   : > { %v260_v18 = vsel %vm258_vm2, %v254_v17, 0 }
  0x88   : > { %803 = vmatpush3.bf16.msra.mxu1 %v260_v18 }
  0x89   : > { %808 = vmatprep.subr.bf16.mxu1 %v922_v0 }
  0x8a   : > { %v311_v21 = vpop.permute.xlu1 %310 }
  0x8b   : > { %v316_v23 = vsel %vm190_vm1, %v311_v21, 0 }
  0x8e   : > { %v431_v25 = vpop.permute.xlu1 %430 }
  0x8f   : > { %v436_v28 = vsel %vm190_vm1, %v431_v25, 0 }
  0x92   : > { %v429_v27 = vpop.permute.xlu1 %428 }
  0x96   : > { %v551_v29 = vpop.permute.xlu1 %550 }
  0x97   : > { %v556_v30 = vsel %vm190_vm1, %v551_v29, 0 }
  0x9a   : > { %v549_v31 = vpop.permute.xlu1 %548 }
  0xed   : > { %v231_v4 = vpop.f32.mrb[0].mxu0 }
  0xee   : > { %v237_v5 = vmul.f32 0.35355338, %v231_v4  ;;  %v800_v6 = vpop.f32.mrb[1].mxu0 }
  0xef   : > { %v234_v7 = vpop.f32.mrb[2].mxu0 }
  0xf0   : > { %v801_v8 = vpop.f32.mrb[3].mxu0  ;;  %v238_v9 = vsel %vm190_vm1, %v237_v5, -inf }
  0xf1   : > { %239 = vmax.xlane.f32.xlu0 %v238_v9 }
 0x17e   : > { %v240_v12 = vpop.xlane.xlu0 %239 }
 0x17f   : > { %v241_v13 = vsub.f32 %v237_v5, %v240_v12 }
 0x181   : > { %v242_v14 = vmul.f32 1.442695, %v241_v13 }
 0x183   : > { %882 = vpow2.f32 %v242_v14 }
 0x18d   : > { %v883_v15 = vpop.eup %882 }
 0x18e   : > { %v244_v16 = vsel %vm190_vm1, %v883_v15, 0.0 }
 0x18f   : > { %245 = vadd.xlane.f32.xlu0 %v244_v16 }
 0x1a5   : > { %308 = vrot.lane.b32.xlu0 %v765_v11, %s925_s21 }
 0x21c   : > { %v246_v19 = vpop.xlane.xlu0 %245 }
 0x21d   : > { %884 = vrcp.f32 %v246_v19 }
 0x220   : > { %v309_v26 = vpop.permute.xlu0 %308 }
 0x227   : > { %v885_v20 = vpop.eup %884 }
 0x228   : > { %v248_v22 = vmul.f32 %v885_v20, %v883_v15 }
 0x22a   : > { %v249_v24 = vpack.c.bf16 %v248_v22, %v248_v22 }
 0x22c   : > { %805 = vmatmul.mubr.msk.bf16.vlgmr.msra.gmra.mrb[0].mxu1 %vm190_vm1, %v249_v24 }
 0x22d   : > { %809 = vmatpush3.bf16.xpose.msra.mxu1 %v316_v23  ;;  %810 = vmatprep.mubr.msk.bf16.mxu1 %vm923_vm0, %v922_v0 }
 0x22e   : > { %820 = vmatprep.subr.bf16.mxu1 %v922_v0 }
 0x234   : > { %811 = vmatmul.mubr.msk.bf16.vlgmr.msra.gmra.mrb[4].mxu1 %vm190_vm1, %v309_v26 }
 0x235   : > { %821 = vmatpush3.bf16.xpose.msra.mxu1 %v436_v28  ;;  %822 = vmatprep.mubr.msk.bf16.mxu1 %vm923_vm0, %v922_v0 }
 0x236   : > { %832 = vmatprep.subr.bf16.mxu1 %v922_v0 }
 0x23c   : > { %823 = vmatmul.mubr.msk.bf16.vlgmr.msra.gmra.mrb[8].mxu1 %vm190_vm1, %v429_v27 }
 0x23d   : > { %833 = vmatpush3.bf16.xpose.msra.mxu1 %v556_v30  ;;  %834 = vmatprep.mubr.msk.bf16.mxu1 %vm923_vm0, %v922_v0 }
 0x244   : > { %835 = vmatmul.mubr.msk.bf16.vlgmr.msra.gmra.mrb[12].mxu1 %vm190_vm1, %v549_v31 }
 0x2ff   : > { %v296_v32 = vpop.f32.mrb[0].mxu1 }
 0x300   : > { %v302_v33 = vpack.c.bf16 %v296_v32, %v296_v32  ;;  %v806_v34 = vpop.f32.mrb[1].mxu1 }
 0x301   : > { %v299_v35 = vpop.f32.mrb[2].mxu1 }
 0x302   : > { %304 = vst.msk [vmem:[%s1017_s26] sm:$0xf] %vm303_vm3, %v302_v33  ;;  %v807_v36 = vpop.f32.mrb[3].mxu1 }
 0x307   : > { %v352_v37 = vpop.f32.mrb[4].mxu1 }
 0x308   : > { %v358_v38 = vmul.f32 0.35355338, %v352_v37  ;;  %v812_v39 = vpop.f32.mrb[5].mxu1 }
 0x309   : > { %v355_v40 = vpop.f32.mrb[6].mxu1 }
 0x30a   : > { %v813_v41 = vpop.f32.mrb[7].mxu1  ;;  %v359_v42 = vsel %vm190_vm1, %v358_v38, -inf }
 0x30b   : > { %360 = vmax.xlane.f32.xlu1 %v359_v42 }
 0x30f   : > { %v472_v43 = vpop.f32.mrb[8].mxu1 }
 0x310   : > { %v478_v44 = vmul.f32 0.35355338, %v472_v43  ;;  %v824_v45 = vpop.f32.mrb[9].mxu1 }
 0x311   : > { %v475_v46 = vpop.f32.mrb[10].mxu1 }
 0x312   : > { %v825_v47 = vpop.f32.mrb[11].mxu1  ;;  %v479_v48 = vsel %vm190_vm1, %v478_v44, -inf }
 0x313   : > { %480 = vmax.xlane.f32.xlu0 %v479_v48 }
 0x317   : > { %v592_v49 = vpop.f32.mrb[12].mxu1 }
 0x318   : > { %v598_v50 = vmul.f32 0.35355338, %v592_v49  ;;  %v836_v51 = vpop.f32.mrb[13].mxu1 }
 0x319   : > { %v595_v52 = vpop.f32.mrb[14].mxu1 }
 0x31a   : > { %v837_v53 = vpop.f32.mrb[15].mxu1  ;;  %v599_v54 = vsel %vm190_vm1, %v598_v50, -inf }
 0x31b   : > { %600 = vmax.xlane.f32.xlu1 %v599_v54 }
 0x32c   : > { %371 = vrot.lane.b32.xlu1 %v989_v10, %s928_s27 }
 0x398   : > { %v361_v55 = vpop.xlane.xlu1 %360 }
 0x399   : > { %v362_v56 = vsub.f32 %v358_v38, %v361_v55 }
 0x39b   : > { %v363_v57 = vmul.f32 1.442695, %v362_v56 }
 0x39d   : > { %886 = vpow2.f32 %v363_v57 }
 0x3a0   : > { %v481_v58 = vpop.xlane.xlu0 %480 }
 0x3a1   : > { %v482_v59 = vsub.f32 %v478_v44, %v481_v58 }
 0x3a3   : > { %v483_v60 = vmul.f32 1.442695, %v482_v59 }
 0x3a5   : > { %888 = vpow2.f32 %v483_v60 }
 0x3a7   : > { %v887_v61 = vpop.eup %886 }
 0x3a8   : > { %v601_v62 = vpop.xlane.xlu1 %600  ;;  %v365_v63 = vsel %vm190_vm1, %v887_v61, 0.0 }
 0x3a9   : > { %v602_v1 = vsub.f32 %v598_v50, %v601_v62  ;;  %366 = vadd.xlane.f32.xlu0 %v365_v63 }
 0x3ab   : > { %v603_v2 = vmul.f32 1.442695, %v602_v1 }
 0x3ac   : > { %v372_v3 = vpop.permute.xlu1 %371 }
 0x3ad   : > { %890 = vpow2.f32 %v603_v2  ;;  %v377_v4 = vsel %vm258_vm2, %v372_v3, 0 }
 0x3ae   : > { %815 = vmatpush3.bf16.msra.mxu0 %v377_v4 }
 0x3af   : > { %v889_v5 = vpop.eup %888  ;;  %826 = vmatprep.subr.bf16.mxu0 %v922_v0 }
 0x3b0   : > { %v485_v6 = vsel %vm190_vm1, %v889_v5, 0.0 }
 0x3b1   : > { %486 = vadd.xlane.f32.xlu1 %v485_v6 }
 0x3b7   : > { %v891_v7 = vpop.eup %890 }
 0x3b8   : > { %v605_v8 = vsel %vm190_vm1, %v891_v7, 0.0 }
 0x3b9   : > { %606 = vadd.xlane.f32.xlu0 %v605_v8 }
 0x3c2   : > { %611 = vrot.lane.b32.xlu1 %v989_v10, %s929_s28 }
 0x3cf   : > { %491 = vrot.lane.b32.xlu0 %v989_v10, %s930_s29 }
 0x436   : > { %v367_v9 = vpop.xlane.xlu0 %366 }
 0x437   : > { %892 = vrcp.f32 %v367_v9 }
 0x43e   : > { %v487_v11 = vpop.xlane.xlu1 %486 }
 0x43f   : > { %894 = vrcp.f32 %v487_v11 }
 0x441   : > { %v893_v12 = vpop.eup %892 }
 0x442   : > { %v369_v13 = vmul.f32 %v893_v12, %v887_v61  ;;  %v612_v19 = vpop.permute.xlu1 %611 }
 0x443   : > { %v617_v21 = vsel %vm258_vm2, %v612_v19, 0 }
 0x444   : > { %v370_v14 = vpack.c.bf16 %v369_v13, %v369_v13 }
 0x446   : > { %v607_v15 = vpop.xlane.xlu0 %606  ;;  %817 = vmatmul.mubr.msk.bf16.vlgmr.msra.gmra.mrb[4].mxu0 %vm190_vm1, %v370_v14 }
 0x447   : > { %896 = vrcp.f32 %v607_v15  ;;  %828 = vmatprep.mubr.msk.bf16.mxu0 %vm923_vm0, %v922_v0 }
 0x449   : > { %v895_v16 = vpop.eup %894 }
 0x44a   : > { %v489_v17 = vmul.f32 %v895_v16, %v889_v5  ;;  %v492_v18 = vpop.permute.xlu0 %491 }
 0x44b   : > { %v497_v10 = vsel %vm258_vm2, %v492_v18, 0 }
 0x44c   : > { %827 = vmatpush3.bf16.msra.mxu0 %v497_v10  ;;  %v490_v20 = vpack.c.bf16 %v489_v17, %v489_v17 }
 0x44d   : > { %838 = vmatprep.subr.bf16.mxu0 %v922_v0 }
 0x44f   : > { %829 = vmatmul.mubr.msk.bf16.vlgmr.msra.gmra.mrb[8].mxu0 %vm190_vm1, %v490_v20 }
 0x450   : > { %839 = vmatpush3.bf16.msra.mxu0 %v617_v21  ;;  %840 = vmatprep.mubr.msk.bf16.mxu0 %vm923_vm0, %v922_v0 }
 0x451   : > { %v897_v22 = vpop.eup %896 }
 0x452   : > { %v609_v23 = vmul.f32 %v897_v22, %v891_v7 }
 0x454   : > { %v610_v24 = vpack.c.bf16 %v609_v23, %v609_v23 }
 0x457   : > { %841 = vmatmul.mubr.msk.bf16.vlgmr.msra.gmra.mrb[12].mxu0 %vm190_vm1, %v610_v24 }
 0x519   : > { %v413_v25 = vpop.f32.mrb[4].mxu0 }
 0x51a   : > { %v777_v26 = vpack.c.bf16 %v413_v25, %v413_v25  ;;  %v818_v27 = vpop.f32.mrb[5].mxu0 }
 0x51b   : > { %v416_v28 = vpop.f32.mrb[6].mxu0 }
 0x51c   : > { %423 = vrot.lane.b32.xlu1 %v777_v26, %s931_s30  ;;  %v819_v29 = vpop.f32.mrb[7].mxu0 }
 0x522   : > { %v533_v30 = vpop.f32.mrb[8].mxu0 }
 0x523   : > { %v778_v31 = vpack.c.bf16 %v533_v30, %v533_v30  ;;  %v830_v32 = vpop.f32.mrb[9].mxu0 }
 0x524   : > { %v536_v33 = vpop.f32.mrb[10].mxu0 }
 0x525   : > { %543 = vrot.lane.b32.xlu0 %v778_v31, %s932_s3  ;;  %v831_v0 = vpop.f32.mrb[11].mxu0 }
 0x52a   : > { %v653_v34 = vpop.f32.mrb[12].mxu0 }
 0x52b   : > { %v779_v35 = vpack.c.bf16 %v653_v34, %v653_v34  ;;  %v842_v36 = vpop.f32.mrb[13].mxu0 }
 0x52c   : > { %v656_v37 = vpop.f32.mrb[14].mxu0 }
 0x52d   : > { %663 = vrot.lane.b32.xlu1 %v779_v35, %s933_s4  ;;  %v843_v38 = vpop.f32.mrb[15].mxu0 }
 0x58e   : > { %v424_v39 = vpop.permute.xlu1 %423 }
 0x58f   : > { %427 = vst.msk [vmem:[%s1017_s26] sm:$0xf] %vm426_vm4, %v424_v39 }
 0x597   : > { %v544_v40 = vpop.permute.xlu0 %543 }
 0x598   : > { %547 = vst.msk [vmem:[%s1017_s26] sm:$0xf] %vm546_vm5, %v544_v40 }
 0x59f   : > { %v664_v41 = vpop.permute.xlu1 %663 }
 0x5a0   : > { %667 = vst.msk [vmem:[%s1017_s26] sm:$0xf] %vm666_vm6, %v664_v41 }
 0x5a1 PF: > { %s12_s11 = sadd.s32 1, %s920_s11   ;;  %s1056_s9 = smov %s916_s10 }
 0x5a2   : > { %p9_p5 = scmp.ge.s32.totalorder %s12_s11, 4   ;;  %s1057_s10 = smov %s1059_s12 }
 0x5a4   :  { %11 = sbr.rel (!%p9_p5) target bundleno = 2 (0x2), region = 61 }

// kernel: seq2seq_forward.39
= control target key start
LH: loop header
LB: loop body
LE: loop exit
PB: predicated region body
PF: predicated region fallthrough
CT: control target
= control target key end

     0   :  { %vm59_vm0 = vcmask 261120   ;;  %vm19_vm1 = vcmask 523264   ;;  %v185_v0 = vmov 0.0   ;;  %vm186_vm2 = vmmov 0   ;;  %s240_s1 = inlined_call_operand.vmem [shape: bf16[64,32], index: 1, kind: input, shape index: {}]   ;;  %s241_s0 = inlined_call_operand.vmem [shape: bf16[16,32], index: 0, kind: input, shape index: {}]   ;;  %s242_s2 = inlined_call_operand.vmem [shape: f32[1,64], index: 2, kind: input, shape index: {}]   ;;  %s243_s3 = inlined_call_operand.vmem [shape: bf16[16,64], index: 3, kind: output, shape index: {}]  }
   0x1   :  { %166 = vmatprep.subr.bf16.mxu0 %v185_v0  ;;  %v180_v1 = vld [vmem:[%s240_s1] sm:$0xff]   ;;  %174 = vmatprep.mubr.msk.bf16.mxu0 %vm186_vm2, %v185_v0  ;;  %20 = vst.msk [vmem:[#allocation2] sm:$0xff] %vm19_vm1, %v185_v0  ;;  %21 = vst.msk [vmem:[#allocation2 + $0x8] sm:$0xff] %vm19_vm1, %v185_v0  ;;  %v181_v3 = vld [vmem:[%s240_s1 + $0x8] sm:$0xff]   ;;  %vm143_vm3 = vcmask 519168  }
   0x2   :  { %v64_v2 = vsel %vm59_vm0, %v180_v1, 0  ;;  %v67_v4 = vsel %vm59_vm0, %v181_v3, 0  ;;  %v182_v5 = vld [vmem:[%s240_s1 + $0x10] sm:$0xff]   ;;  %v183_v7 = vld [vmem:[%s240_s1 + $0x18] sm:$0xff]   ;;  %v184_v9 = vld [vmem:[%s241_s0] sm:$0xff]  }
   0x3   :  { %167 = vmatpush3.bf16.xpose.msra.mxu0 %v64_v2  ;;  %v70_v6 = vsel %vm59_vm0, %v182_v5, 0  ;;  %v73_v8 = vsel %vm59_vm0, %v183_v7, 0  ;;  %v156_v18 = vld [vmem:[%s242_s2] ss:$0 sm:$0xff] }
   0x4   :  { %168 = vmatprep.subr.bf16.mxu0 %v185_v0 }
   0x8   :  { %v22_v10 = vld [vmem:[#allocation2] sm:$0xff]  ;;  %v23_v12 = vld [vmem:[#allocation2 + $0x8] sm:$0xff] }
   0xb   :  { %169 = vmatpush3.bf16.xpose.msra.mxu0 %v67_v4 }
   0xc   :  { %170 = vmatprep.subr.bf16.mxu0 %v185_v0 }
  0x13   :  { %171 = vmatpush3.bf16.xpose.msra.mxu0 %v70_v6 }
  0x14   :  { %172 = vmatprep.subr.bf16.mxu0 %v185_v0 }
  0x1b   :  { %173 = vmatpush3.bf16.xpose.msra.mxu0 %v73_v8 }
  0x22   :  { %175 = vmatmul.mubr.msk.bf16.vlgmr.msra.gmra.mrb[0].mxu0 %vm59_vm0, %v184_v9 }
  0xf5   :  { %v109_v11 = vpop.f32.mrb[0].mxu0 }
  0xf6   :  { %v116_v13 = vadd.f32 %v109_v11, %v22_v10  ;;  %v176_v14 = vpop.f32.mrb[1].mxu0 }
  0xf7   :  { %v112_v15 = vpop.f32.mrb[2].mxu0 }
  0xf8   :  { %119 = vst.msk [vmem:[#allocation2] sm:$0xff] %vm19_vm1, %v116_v13  ;;  %v117_v16 = vadd.f32 %v112_v15, %v23_v12  ;;  %v177_v17 = vpop.f32.mrb[3].mxu0 }
  0xfa   :  { %120 = vst.msk [vmem:[#allocation2 + $0x8] sm:$0xff] %vm19_vm1, %v117_v16 }
  0xff   :  { %v124_v19 = vld [vmem:[#allocation2] sm:$0xff] }
 0x100   :  { %v133_v20 = vadd.f32 %v156_v18, %v124_v19 }
 0x101   :  { %v125_v21 = vld [vmem:[#allocation2 + $0x8] sm:$0xff] }
 0x102   :  { %v159_v22 = vpack.c.bf16 %v133_v20, %v133_v20  ;;  %v134_v23 = vadd.f32 %v156_v18, %v125_v21 }
 0x104   :  { %144 = vst.msk [vmem:[%s243_s3] sm:$0xf] %vm143_vm3, %v159_v22  ;;  %v160_v24 = vpack.c.bf16 %v134_v23, %v134_v23 }
 0x106   :  { %145 = vst.msk [vmem:[%s243_s3 + $0x4] sm:$0xf] %vm143_vm3, %v160_v24 }

// kernel: seq2seq_forward.30
= control target key start
LH: loop header
LB: loop body
LE: loop exit
PB: predicated region body
PF: predicated region fallthrough
CT: control target
= control target key end

     0   :  { %vm31_vm0 = vcmask 261120   ;;  %v364_v0 = vmov 0.0   ;;  %vm365_vm1 = vmmov 0   ;;  %vm168_vm2 = vcmask 523264   ;;  %s461_s1 = inlined_call_operand.vmem [shape: bf16[64,32], index: 1, kind: input, shape index: {}]   ;;  %s462_s0 = inlined_call_operand.vmem [shape: bf16[16,32], index: 0, kind: input, shape index: {}]   ;;  %s463_s3 = inlined_call_operand.vmem [shape: bf16[32,64], index: 3, kind: input, shape index: {}]   ;;  %s464_s2 = inlined_call_operand.vmem [shape: f32[1,64], index: 2, kind: input, shape index: {}]   ;;  %s465_s4 = inlined_call_operand.vmem [shape: f32[1,32], index: 4, kind: input, shape index: {}]   ;;  %s466_s5 = inlined_call_operand.vmem [shape: f32[1,32], index: 5, kind: input, shape index: {}]   ;;  %s467_s6 = inlined_call_operand.vmem [shape: f32[1,32], index: 6, kind: input, shape index: {}]   ;;  %s468_s7 = inlined_call_operand.vmem [shape: bf16[16,32], index: 7, kind: output, shape index: {}]  }
   0x1   :  { %326 = vmatprep.subr.bf16.mxu0 %v364_v0  ;;  %v348_v1 = vld [vmem:[%s461_s1] sm:$0xff]   ;;  %32 = vst.msk [vmem:[#allocation2] sm:$0xff] %vm31_vm0, %v364_v0  ;;  %33 = vst.msk [vmem:[#allocation2 + $0x8] sm:$0xff] %vm31_vm0, %v364_v0  ;;  %334 = vmatprep.mubr.msk.bf16.mxu0 %vm365_vm1, %v364_v0  ;;  %v349_v3 = vld [vmem:[%s461_s1 + $0x8] sm:$0xff]   ;;  %vm294_vm3 = vcmask 257024  }
   0x2   :  { %338 = vmatprep.subr.bf16.mxu1 %v364_v0  ;;  %342 = vmatprep.mubr.msk.bf16.mxu1 %vm365_vm1, %v364_v0  ;;  %v81_v2 = vsel %vm31_vm0, %v348_v1, 0  ;;  %v84_v4 = vsel %vm31_vm0, %v349_v3, 0  ;;  %v350_v5 = vld [vmem:[%s461_s1 + $0x10] sm:$0xff]   ;;  %v351_v7 = vld [vmem:[%s461_s1 + $0x18] sm:$0xff]   ;;  %v34_v9 = vld [vmem:[%s462_s0] sm:$0xff]  }
   0x3   :  { %327 = vmatpush3.bf16.xpose.msra.mxu0 %v81_v2  ;;  %v87_v6 = vsel %vm31_vm0, %v350_v5, 0  ;;  %v90_v8 = vsel %vm31_vm0, %v351_v7, 0  ;;  %v353_v10 = vld [vmem:[%s463_s3] sm:$0xff]   ;;  %v354_v12 = vld [vmem:[%s463_s3 + $0x8] sm:$0xff]   ;;  %v226_v48 = vunpack.c.l.bf16 %v34_v9  ;;  %v227_v49 = vunpack.c.h.bf16 %v34_v9 }
   0x4   :  { %328 = vmatprep.subr.bf16.mxu0 %v364_v0  ;;  %v173_v11 = vsel %vm168_vm2, %v353_v10, 0  ;;  %v176_v13 = vsel %vm168_vm2, %v354_v12, 0  ;;  %v301_v14 = vld [vmem:[%s464_s2] ss:$0 sm:$0xff] }
   0x5   :  { %339 = vmatpush3.bf16.xpose.msra.mxu1 %v173_v11  ;;  %v311_v51 = vld [vmem:[%s465_s4] ss:$0 sm:$0xff] }
   0x6   :  { %340 = vmatprep.subr.bf16.mxu1 %v364_v0  ;;  %v312_v12 = vld [vmem:[%s466_s5] ss:$0 sm:$0xff] }
   0x8   :  { %v151_v40 = vld [vmem:[#allocation2] sm:$0xff]  ;;  %v152_v42 = vld [vmem:[#allocation2 + $0x8] sm:$0xff] }
   0xb   :  { %329 = vmatpush3.bf16.xpose.msra.mxu0 %v84_v4 }
   0xc   :  { %330 = vmatprep.subr.bf16.mxu0 %v364_v0 }
   0xd   :  { %341 = vmatpush3.bf16.xpose.msra.mxu1 %v176_v13 }
  0x13   :  { %331 = vmatpush3.bf16.xpose.msra.mxu0 %v87_v6 }
  0x14   :  { %332 = vmatprep.subr.bf16.mxu0 %v364_v0 }
  0x1b   :  { %333 = vmatpush3.bf16.xpose.msra.mxu0 %v90_v8 }
  0x22   :  { %335 = vmatmul.mubr.msk.bf16.vlgmr.msra.gmra.mrb[0].mxu0 %vm31_vm0, %v34_v9 }
  0xf5   :  { %v126_v15 = vpop.f32.mrb[0].mxu0 }
  0xf6   :  { %v127_v16 = vadd.f32 %v301_v14, %v126_v15  ;;  %v336_v17 = vpop.f32.mrb[1].mxu0 }
  0xf7   :  { %v129_v18 = vpop.f32.mrb[2].mxu0 }
  0xf8   :  { %v133_v19 = vmul.f32 %v127_v16, %v127_v16  ;;  %v130_v20 = vadd.f32 %v301_v14, %v129_v18  ;;  %v337_v21 = vpop.f32.mrb[3].mxu0  ;;  %v313_v14 = vld [vmem:[%s467_s6] ss:$0 sm:$0xff] }
  0xfa   :  { %v135_v22 = vmul.f32 %v133_v19, %v127_v16  ;;  %v134_v23 = vmul.f32 %v130_v20, %v130_v20 }
  0xfc   :  { %v137_v24 = vmul.f32 0.044715, %v135_v22  ;;  %v136_v25 = vmul.f32 %v134_v23, %v130_v20 }
  0xfe   :  { %v139_v26 = vadd.f32 %v137_v24, %v127_v16  ;;  %v138_v27 = vmul.f32 0.044715, %v136_v25 }
 0x100   :  { %v141_v28 = vmul.f32 0.7978846, %v139_v26  ;;  %v140_v29 = vadd.f32 %v138_v27, %v130_v20 }
 0x102   :  { %356 = vtanh.f32 %v141_v28  ;;  %v142_v30 = vmul.f32 0.7978846, %v140_v29 }
 0x104   :  { %358 = vtanh.f32 %v142_v30 }
 0x10c   :  { %v357_v31 = vpop.eup %356 }
 0x10d   :  { %v145_v32 = vadd.f32 1.0, %v357_v31 }
 0x10e   :  { %v359_v33 = vpop.eup %358 }
 0x10f   :  { %v147_v34 = vmul.f32 0.5, %v145_v32  ;;  %v146_v35 = vadd.f32 1.0, %v359_v33 }
 0x111   :  { %v148_v36 = vmul.f32 0.5, %v146_v35  ;;  %v149_v37 = vmul.f32 %v147_v34, %v127_v16 }
 0x113   :  { %v150_v38 = vmul.f32 %v148_v36, %v130_v20 }
 0x115   :  { %v157_v39 = vpack.c.bf16 %v150_v38, %v149_v37 }
 0x117   :  { %343 = vmatmul.mubr.msk.bf16.vlgmr.msra.gmra.mrb[0].mxu1 %vm168_vm2, %v157_v39 }
 0x1ea   :  { %v212_v41 = vpop.f32.mrb[0].mxu1 }
 0x1eb   :  { %v219_v43 = vadd.f32 %v212_v41, %v151_v40  ;;  %v344_v44 = vpop.f32.mrb[1].mxu1 }
 0x1ec   :  { %v215_v45 = vpop.f32.mrb[2].mxu1 }
 0x1ed   :  { %221 = vst.msk [vmem:[#allocation2] sm:$0xff] %vm31_vm0, %v219_v43  ;;  %v220_v46 = vadd.f32 %v215_v45, %v152_v42  ;;  %v345_v47 = vpop.f32.mrb[3].mxu1 }
 0x1ef   :  { %222 = vst.msk [vmem:[#allocation2 + $0x8] sm:$0xff] %vm31_vm0, %v220_v46 }
 0x1f4   :  { %v228_v50 = vld [vmem:[#allocation2] sm:$0xff] }
 0x1f5   :  { %v230_v52 = vadd.f32 %v228_v50, %v226_v48 }
 0x1f6   :  { %v229_v53 = vld [vmem:[#allocation2 + $0x8] sm:$0xff] }
 0x1f7   :  { %v239_v54 = vadd.f32 %v311_v51, %v230_v52  ;;  %v231_v55 = vadd.f32 %v229_v53, %v227_v49 }
 0x1f9   :  { %v243_v56 = vsel %vm31_vm0, %v239_v54, 0.0  ;;  %v240_v57 = vadd.f32 %v311_v51, %v231_v55 }
 0x1fa   :  { %244 = vadd.xlane.f32.xlu0 %v243_v56 }
 0x1fb   :  { %v246_v58 = vsel %vm31_vm0, %v240_v57, 0.0 }
 0x1fe   :  { %247 = vadd.xlane.f32.xlu0 %v246_v58 }
 0x287   :  { %v245_v59 = vpop.xlane.xlu0 %244 }
 0x288   :  { %v250_v60 = vmul.f32 0.03125, %v245_v59 }
 0x28a   :  { %v252_v61 = vsub.f32 %v239_v54, %v250_v60 }
 0x28b   :  { %v248_v62 = vpop.xlane.xlu0 %247 }
 0x28c   :  { %v251_v63 = vmul.f32 0.03125, %v248_v62  ;;  %v254_v0 = vmul.f32 %v252_v61, %v252_v61 }
 0x28e   :  { %v253_v1 = vsub.f32 %v240_v57, %v251_v63  ;;  %v256_v2 = vsel %vm31_vm0, %v254_v0, 0.0 }
 0x28f   :  { %257 = vadd.xlane.f32.xlu1 %v256_v2 }
 0x290   :  { %v255_v3 = vmul.f32 %v253_v1, %v253_v1 }
 0x292   :  { %v259_v4 = vsel %vm31_vm0, %v255_v3, 0.0 }
 0x293   :  { %260 = vadd.xlane.f32.xlu1 %v259_v4 }
 0x31c   :  { %v258_v5 = vpop.xlane.xlu1 %257 }
 0x31d   :  { %v262_v6 = vmul.f32 0.03125, %v258_v5 }
 0x31f   :  { %v264_v7 = vadd.f32 1e-12, %v262_v6 }
 0x320   :  { %v261_v8 = vpop.xlane.xlu1 %260 }
 0x321   :  { %360 = vrsqrt.f32 %v264_v7  ;;  %v263_v9 = vmul.f32 0.03125, %v261_v8 }
 0x323   :  { %v265_v10 = vadd.f32 1e-12, %v263_v9 }
 0x325   :  { %362 = vrsqrt.f32 %v265_v10 }
 0x32b   :  { %v361_v11 = vpop.eup %360 }
 0x32c   :  { %v268_v13 = vmul.f32 %v361_v11, %v252_v61 }
 0x32e   :  { %v276_v15 = vmul.f32 %v312_v12, %v268_v13 }
 0x32f   :  { %v363_v16 = vpop.eup %362 }
 0x330   :  { %v284_v17 = vadd.f32 %v313_v14, %v276_v15  ;;  %v269_v18 = vmul.f32 %v363_v16, %v253_v1 }
 0x332   :  { %v316_v19 = vpack.c.bf16 %v284_v17, %v284_v17  ;;  %v277_v20 = vmul.f32 %v312_v12, %v269_v18 }
 0x334   :  { %295 = vst.msk [vmem:[%s468_s7] sm:$0xf] %vm294_vm3, %v316_v19  ;;  %v285_v21 = vadd.f32 %v313_v14, %v277_v20 }
 0x336   :  { %v317_v22 = vpack.c.bf16 %v285_v21, %v285_v21 }
 0x338   :  { %296 = vst.msk [vmem:[%s468_s7 + $0x4] sm:$0xf] %vm294_vm3, %v317_v22 }

// kernel: seq2seq_forward.36
= control target key start
LH: loop header
LB: loop body
LE: loop exit
PB: predicated region body
PF: predicated region fallthrough
CT: control target
= control target key end

     0   :  { %s962_s9 = smov 0   ;;  %s964_s10 = smov 0   ;;  %s1073_s0 = inlined_call_operand.vmem [shape: bf16[2,8,32], index: 0, kind: input, shape index: {}]   ;;  %s1074_s1 = inlined_call_operand.vmem [shape: bf16[2,8,64], index: 1, kind: input, shape index: {}]   ;;  %s1075_s2 = inlined_call_operand.vmem [shape: bf16[2,8,32], index: 2, kind: output, shape index: {}]  }
   0x1   :  { %s966_s11 = smov 0  }
   0x2 LB: > { %s24_s12 = sadd.s32 1, %s929_s10  ;;  %p771_p0 = scmp.ge.s32.totalorder %s933_s11, 1  ;;  %s933_s11 = sphi %s966_s11, %s12_s11   ;;  %s929_s10 = sphi %s964_s10, %s1077_s10   ;;  %s925_s9 = sphi %s962_s9, %s1076_s9  }
   0x3   : > { %p26_p1 = scmp.ge.s32.totalorder %s24_s12, 2  ;;  %p139_p2 = scmp.lt.s32.totalorder %s933_s11, 3 }
   0x5   : > { %s1079_s12 = smov (%p26_p1, %s24_s12), 0  ;;  %p140_p3 = pnand %p771_p0, %p139_p2 }
   0x6   : > { %p169_p4 = scmp.lt.s32.totalorder (!%p140_p3), %s925_s9, 1  ;;  %v935_v0 = vmov (!%p140_p3), 0.0   ;;  %vm936_vm0 = vmmov (!%p140_p3), 0   ;;  %vm199_vm1 = vcmask (!%p140_p3), 64512   ;;  %v191_v4 = vlaneseq (!%p140_p3)  ;;  %s937_s20 = smov (!%p140_p3), 96  }
   0x7   : > { %143 = sbr.rel (%p140_p3) target bundleno = 1445 (0x5a5), region = 28  ;;  %809 = vmatprep.subr.bf16.mxu0 (!%p140_p3), %v935_v0  ;;  %811 = vmatprep.mubr.msk.bf16.mxu0 (!%p140_p3), %vm936_vm0, %v935_v0  ;;  %s938_s21 = smov (!%p140_p3), 120   ;;  %vm268_vm3 = vcmask (!%p140_p3), 1043456   ;;  %vm313_vm4 = vcmask (!%p140_p3), 60416   ;;  %vm437_vm5 = vcmask (!%p140_p3), 126016   ;;  %vm558_vm6 = vcmask (!%p140_p3), 191616  }
   0x8   : > { %815 = vmatprep.subr.bf16.mxu1 (!%p140_p3), %v935_v0  ;;  %817 = vmatprep.mubr.msk.bf16.mxu1 (!%p140_p3), %vm936_vm0, %v935_v0  ;;  %v192_v5 = vshrl.u32 (!%p140_p3), %v191_v4, 7  ;;  %v196_v6 = vand.u32 (!%p140_p3), 127, %v191_v4  ;;  %s939_s22 = smov (!%p140_p3), 112   ;;  %s940_s23 = smov (!%p140_p3), 104   ;;  %vm679_vm7 = vcmask (!%p140_p3), 257216  }
   0x9   : > { %s941_s27 = smov (!%p140_p3), 88   ;;  %s942_s28 = smov (!%p140_p3), 72  }
   0xa   : > { %vm197_vm2 = vcmp.gt.s32.totalorder (!%p140_p3), %v196_v6, %v192_v5  ;;  %s943_s29 = smov (!%p140_p3), 80   ;;  %s944_s30 = smov (!%p140_p3), 8  }
   0xb   : > { %v1002_v8 = vsel (!%p140_p3), %vm197_vm2, -1e+09, %v935_v0  ;;  %s945_s3 = smov (!%p140_p3), 16   ;;  %s946_s4 = smov (!%p140_p3), 24  }
   0xe   : > { %s1081_s9 = smov (!%p169_p4, %s925_s9), 1 }
   0xf   : > { %s986_s13 = sshll.u32 %s1081_s9, 2 }
  0x10   : > { %s179_s16 = scalar_lea.vmem %s1074_s1, %s986_s13  ;;  %s175_s19 = scalar_lea.vmem %s1073_s0, %s986_s13 }
  0x11   : > { %v189_v1 = vld [vmem:[%s179_s16] sm:$0xf]  ;;  %s1034_s26 = scalar_lea.vmem %s1075_s2, %s986_s13 }
  0x12   : > { %v204_v2 = vsel %vm199_vm1, %v189_v1, 0  ;;  %v188_v3 = vld [vmem:[%s175_s19] sm:$0xf]  ;;  %v1006_v15 = vcombine.low %v189_v1, %v189_v1 }
  0x13   : > { %810 = vmatpush3.bf16.xpose.msra.mxu0 %v204_v2  ;;  %v778_v16 = vcombine.low %v188_v3, %v188_v3 }
  0x14   : > { %827 = vmatprep.subr.bf16.mxu0 %v935_v0  ;;  %263 = vrot.lane.b32.xlu1 %v1006_v15, %s937_s20 }
  0x18   : > { %320 = vrot.lane.b32.xlu1 %v1006_v15, %s938_s21 }
  0x1a   : > { %812 = vmatmul.mubr.msk.bf16.vlgmr.msra.gmra.mrb[0].mxu0 %vm199_vm1, %v188_v3 }
  0x1b   : > { %829 = vmatprep.mubr.msk.bf16.mxu0 %vm936_vm0, %v935_v0 }
  0x1c   : > { %441 = vrot.lane.b32.xlu1 %v1006_v15, %s939_s22 }
  0x20   : > { %439 = vrot.lane.b32.xlu1 %v778_v16, %s939_s22 }
  0x24   : > { %562 = vrot.lane.b32.xlu1 %v1006_v15, %s940_s23 }
  0x28   : > { %560 = vrot.lane.b32.xlu1 %v778_v16, %s940_s23 }
  0x86   : > { %v264_v22 = vpop.permute.xlu1 %263 }
  0x87   : > { %v270_v23 = vsel %vm268_vm3, %v264_v22, 0 }
  0x88   : > { %816 = vmatpush3.bf16.msra.mxu1 %v270_v23 }
  0x89   : > { %821 = vmatprep.subr.bf16.mxu1 %v935_v0 }
  0x8a   : > { %v321_v26 = vpop.permute.xlu1 %320 }
  0x8b   : > { %v326_v28 = vsel %vm199_vm1, %v321_v26, 0 }
  0x8e   : > { %v442_v30 = vpop.permute.xlu1 %441 }
  0x8f   : > { %v447_v33 = vsel %vm199_vm1, %v442_v30, 0 }
  0x92   : > { %v440_v32 = vpop.permute.xlu1 %439 }
  0x96   : > { %v563_v34 = vpop.permute.xlu1 %562 }
  0x97   : > { %v568_v35 = vsel %vm199_vm1, %v563_v34, 0 }
  0x9a   : > { %v561_v36 = vpop.permute.xlu1 %560 }
  0xed   : > { %v240_v7 = vpop.f32.mrb[0].mxu0 }
  0xee   : > { %v246_v9 = vmul.f32 0.35355338, %v240_v7  ;;  %v813_v10 = vpop.f32.mrb[1].mxu0 }
  0xef   : > { %v243_v11 = vpop.f32.mrb[2].mxu0 }
  0xf0   : > { %v814_v12 = vpop.f32.mrb[3].mxu0  ;;  %v247_v13 = vadd.f32 %v246_v9, %v1002_v8 }
  0xf2   : > { %v248_v14 = vsel %vm199_vm1, %v247_v13, -inf }
  0xf3   : > { %249 = vmax.xlane.f32.xlu0 %v248_v14 }
 0x180   : > { %v250_v17 = vpop.xlane.xlu0 %249 }
 0x181   : > { %v251_v18 = vsub.f32 %v247_v13, %v250_v17 }
 0x183   : > { %v252_v19 = vmul.f32 1.442695, %v251_v18 }
 0x185   : > { %895 = vpow2.f32 %v252_v19 }
 0x18f   : > { %v896_v20 = vpop.eup %895 }
 0x190   : > { %v254_v21 = vsel %vm199_vm1, %v896_v20, 0.0 }
 0x191   : > { %255 = vadd.xlane.f32.xlu0 %v254_v21 }
 0x1a7   : > { %318 = vrot.lane.b32.xlu0 %v778_v16, %s938_s21 }
 0x21e   : > { %v256_v24 = vpop.xlane.xlu0 %255 }
 0x21f   : > { %897 = vrcp.f32 %v256_v24 }
 0x222   : > { %v319_v31 = vpop.permute.xlu0 %318 }
 0x229   : > { %v898_v25 = vpop.eup %897 }
 0x22a   : > { %v258_v27 = vmul.f32 %v898_v25, %v896_v20 }
 0x22c   : > { %v259_v29 = vpack.c.bf16 %v258_v27, %v258_v27 }
 0x22e   : > { %818 = vmatmul.mubr.msk.bf16.vlgmr.msra.gmra.mrb[0].mxu1 %vm199_vm1, %v259_v29 }
 0x22f   : > { %822 = vmatpush3.bf16.xpose.msra.mxu1 %v326_v28  ;;  %823 = vmatprep.mubr.msk.bf16.mxu1 %vm936_vm0, %v935_v0 }
 0x230   : > { %833 = vmatprep.subr.bf16.mxu1 %v935_v0 }
 0x236   : > { %824 = vmatmul.mubr.msk.bf16.vlgmr.msra.gmra.mrb[4].mxu1 %vm199_vm1, %v319_v31 }
 0x237   : > { %834 = vmatpush3.bf16.xpose.msra.mxu1 %v447_v33  ;;  %835 = vmatprep.mubr.msk.bf16.mxu1 %vm936_vm0, %v935_v0 }
 0x238   : > { %845 = vmatprep.subr.bf16.mxu1 %v935_v0 }
 0x23e   : > { %836 = vmatmul.mubr.msk.bf16.vlgmr.msra.gmra.mrb[8].mxu1 %vm199_vm1, %v440_v32 }
 0x23f   : > { %846 = vmatpush3.bf16.xpose.msra.mxu1 %v568_v35  ;;  %847 = vmatprep.mubr.msk.bf16.mxu1 %vm936_vm0, %v935_v0 }
 0x246   : > { %848 = vmatmul.mubr.msk.bf16.vlgmr.msra.gmra.mrb[12].mxu1 %vm199_vm1, %v561_v36 }
 0x301   : > { %v306_v37 = vpop.f32.mrb[0].mxu1 }
 0x302   : > { %v312_v38 = vpack.c.bf16 %v306_v37, %v306_v37  ;;  %v819_v39 = vpop.f32.mrb[1].mxu1 }
 0x303   : > { %v309_v40 = vpop.f32.mrb[2].mxu1 }
 0x304   : > { %314 = vst.msk [vmem:[%s1034_s26] sm:$0xf] %vm313_vm4, %v312_v38  ;;  %v820_v41 = vpop.f32.mrb[3].mxu1 }
 0x309   : > { %v362_v42 = vpop.f32.mrb[4].mxu1 }
 0x30a   : > { %v368_v43 = vmul.f32 0.35355338, %v362_v42  ;;  %v825_v44 = vpop.f32.mrb[5].mxu1 }
 0x30b   : > { %v365_v45 = vpop.f32.mrb[6].mxu1 }
 0x30c   : > { %v826_v46 = vpop.f32.mrb[7].mxu1  ;;  %v369_v47 = vadd.f32 %v368_v43, %v1002_v8 }
 0x30e   : > { %v370_v48 = vsel %vm199_vm1, %v369_v47, -inf }
 0x30f   : > { %371 = vmax.xlane.f32.xlu1 %v370_v48 }
 0x311   : > { %v483_v49 = vpop.f32.mrb[8].mxu1 }
 0x312   : > { %v489_v50 = vmul.f32 0.35355338, %v483_v49  ;;  %v837_v51 = vpop.f32.mrb[9].mxu1 }
 0x313   : > { %v486_v52 = vpop.f32.mrb[10].mxu1 }
 0x314   : > { %v838_v53 = vpop.f32.mrb[11].mxu1  ;;  %v490_v54 = vadd.f32 %v489_v50, %v1002_v8 }
 0x316   : > { %v491_v55 = vsel %vm199_vm1, %v490_v54, -inf }
 0x317   : > { %492 = vmax.xlane.f32.xlu0 %v491_v55 }
 0x319   : > { %v604_v56 = vpop.f32.mrb[12].mxu1 }
 0x31a   : > { %v610_v57 = vmul.f32 0.35355338, %v604_v56  ;;  %v849_v58 = vpop.f32.mrb[13].mxu1 }
 0x31b   : > { %v607_v59 = vpop.f32.mrb[14].mxu1 }
 0x31c   : > { %v850_v60 = vpop.f32.mrb[15].mxu1  ;;  %v611_v61 = vadd.f32 %v610_v57, %v1002_v8 }
 0x31e   : > { %v612_v62 = vsel %vm199_vm1, %v611_v61, -inf }
 0x31f   : > { %613 = vmax.xlane.f32.xlu1 %v612_v62 }
 0x330   : > { %382 = vrot.lane.b32.xlu1 %v1006_v15, %s941_s27 }
 0x39c   : > { %v372_v63 = vpop.xlane.xlu1 %371 }
 0x39d   : > { %v373_v1 = vsub.f32 %v369_v47, %v372_v63 }
 0x39f   : > { %v374_v2 = vmul.f32 1.442695, %v373_v1 }
 0x3a1   : > { %899 = vpow2.f32 %v374_v2 }
 0x3a4   : > { %v493_v3 = vpop.xlane.xlu0 %492 }
 0x3a5   : > { %v494_v4 = vsub.f32 %v490_v54, %v493_v3 }
 0x3a7   : > { %v495_v5 = vmul.f32 1.442695, %v494_v4 }
 0x3a9   : > { %901 = vpow2.f32 %v495_v5 }
 0x3ab   : > { %v900_v6 = vpop.eup %899 }
 0x3ac   : > { %v614_v7 = vpop.xlane.xlu1 %613  ;;  %v376_v9 = vsel %vm199_vm1, %v900_v6, 0.0 }
 0x3ad   : > { %v615_v10 = vsub.f32 %v611_v61, %v614_v7  ;;  %377 = vadd.xlane.f32.xlu0 %v376_v9 }
 0x3af   : > { %v616_v8 = vmul.f32 1.442695, %v615_v10 }
 0x3b0   : > { %v383_v11 = vpop.permute.xlu1 %382 }
 0x3b1   : > { %903 = vpow2.f32 %v616_v8  ;;  %v388_v12 = vsel %vm268_vm3, %v383_v11, 0 }
 0x3b2   : > { %828 = vmatpush3.bf16.msra.mxu0 %v388_v12 }
 0x3b3   : > { %v902_v13 = vpop.eup %901  ;;  %839 = vmatprep.subr.bf16.mxu0 %v935_v0 }
 0x3b4   : > { %v497_v14 = vsel %vm199_vm1, %v902_v13, 0.0 }
 0x3b5   : > { %498 = vadd.xlane.f32.xlu1 %v497_v14 }
 0x3bb   : > { %v904_v16 = vpop.eup %903 }
 0x3bc   : > { %v618_v17 = vsel %vm199_vm1, %v904_v16, 0.0 }
 0x3bd   : > { %619 = vadd.xlane.f32.xlu0 %v618_v17 }
 0x3c6   : > { %624 = vrot.lane.b32.xlu1 %v1006_v15, %s942_s28 }
 0x3d3   : > { %503 = vrot.lane.b32.xlu0 %v1006_v15, %s943_s29 }
 0x43a   : > { %v378_v18 = vpop.xlane.xlu0 %377 }
 0x43b   : > { %905 = vrcp.f32 %v378_v18 }
 0x442   : > { %v499_v19 = vpop.xlane.xlu1 %498 }
 0x443   : > { %907 = vrcp.f32 %v499_v19 }
 0x445   : > { %v906_v20 = vpop.eup %905 }
 0x446   : > { %v380_v21 = vmul.f32 %v906_v20, %v900_v6  ;;  %v625_v27 = vpop.permute.xlu1 %624 }
 0x447   : > { %v630_v29 = vsel %vm268_vm3, %v625_v27, 0 }
 0x448   : > { %v381_v22 = vpack.c.bf16 %v380_v21, %v380_v21 }
 0x44a   : > { %v620_v23 = vpop.xlane.xlu0 %619  ;;  %830 = vmatmul.mubr.msk.bf16.vlgmr.msra.gmra.mrb[4].mxu0 %vm199_vm1, %v381_v22 }
 0x44b   : > { %909 = vrcp.f32 %v620_v23  ;;  %841 = vmatprep.mubr.msk.bf16.mxu0 %vm936_vm0, %v935_v0 }
 0x44d   : > { %v908_v24 = vpop.eup %907 }
 0x44e   : > { %v501_v25 = vmul.f32 %v908_v24, %v902_v13  ;;  %v504_v26 = vpop.permute.xlu0 %503 }
 0x44f   : > { %v509_v15 = vsel %vm268_vm3, %v504_v26, 0 }
 0x450   : > { %840 = vmatpush3.bf16.msra.mxu0 %v509_v15  ;;  %v502_v28 = vpack.c.bf16 %v501_v25, %v501_v25 }
 0x451   : > { %851 = vmatprep.subr.bf16.mxu0 %v935_v0 }
 0x453   : > { %842 = vmatmul.mubr.msk.bf16.vlgmr.msra.gmra.mrb[8].mxu0 %vm199_vm1, %v502_v28 }
 0x454   : > { %852 = vmatpush3.bf16.msra.mxu0 %v630_v29  ;;  %853 = vmatprep.mubr.msk.bf16.mxu0 %vm936_vm0, %v935_v0 }
 0x455   : > { %v910_v30 = vpop.eup %909 }
 0x456   : > { %v622_v31 = vmul.f32 %v910_v30, %v904_v16 }
 0x458   : > { %v623_v32 = vpack.c.bf16 %v622_v31, %v622_v31 }
 0x45b   : > { %854 = vmatmul.mubr.msk.bf16.vlgmr.msra.gmra.mrb[12].mxu0 %vm199_vm1, %v623_v32 }
 0x51d   : > { %v424_v33 = vpop.f32.mrb[4].mxu0 }
 0x51e   : > { %v790_v34 = vpack.c.bf16 %v424_v33, %v424_v33  ;;  %v831_v35 = vpop.f32.mrb[5].mxu0 }
 0x51f   : > { %v427_v36 = vpop.f32.mrb[6].mxu0 }
 0x520   : > { %434 = vrot.lane.b32.xlu1 %v790_v34, %s944_s30  ;;  %v832_v37 = vpop.f32.mrb[7].mxu0 }
 0x526   : > { %v545_v38 = vpop.f32.mrb[8].mxu0 }
 0x527   : > { %v791_v39 = vpack.c.bf16 %v545_v38, %v545_v38  ;;  %v843_v40 = vpop.f32.mrb[9].mxu0 }
 0x528   : > { %v548_v41 = vpop.f32.mrb[10].mxu0 }
 0x529   : > { %555 = vrot.lane.b32.xlu0 %v791_v39, %s945_s3  ;;  %v844_v0 = vpop.f32.mrb[11].mxu0 }
 0x52e   : > { %v666_v42 = vpop.f32.mrb[12].mxu0 }
 0x52f   : > { %v792_v43 = vpack.c.bf16 %v666_v42, %v666_v42  ;;  %v855_v44 = vpop.f32.mrb[13].mxu0 }
 0x530   : > { %v669_v45 = vpop.f32.mrb[14].mxu0 }
 0x531   : > { %676 = vrot.lane.b32.xlu1 %v792_v43, %s946_s4  ;;  %v856_v46 = vpop.f32.mrb[15].mxu0 }
 0x592   : > { %v435_v47 = vpop.permute.xlu1 %434 }
 0x593   : > { %438 = vst.msk [vmem:[%s1034_s26] sm:$0xf] %vm437_vm5, %v435_v47 }
 0x59b   : > { %v556_v48 = vpop.permute.xlu0 %555 }
 0x59c   : > { %559 = vst.msk [vmem:[%s1034_s26] sm:$0xf] %vm558_vm6, %v556_v48 }
 0x5a3   : > { %v677_v49 = vpop.permute.xlu1 %676 }
 0x5a4   : > { %680 = vst.msk [vmem:[%s1034_s26] sm:$0xf] %vm679_vm7, %v677_v49 }
 0x5a5 PF: > { %s12_s11 = sadd.s32 1, %s933_s11   ;;  %s1076_s9 = smov %s929_s10 }
 0x5a6   : > { %p9_p5 = scmp.ge.s32.totalorder %s12_s11, 4   ;;  %s1077_s10 = smov %s1079_s12 }
 0x5a8   :  { %11 = sbr.rel (!%p9_p5) target bundleno = 2 (0x2), region = 61 }

// kernel: seq2seq_forward.37
= control target key start
LH: loop header
LB: loop body
LE: loop exit
PB: predicated region body
PF: predicated region fallthrough
CT: control target
= control target key end

     0   :  { %vm52_vm0 = vcmask 261120   ;;  %v204_v0 = vmov 0.0   ;;  %vm205_vm1 = vmmov 0   ;;  %vm162_vm2 = vcmask 257024   ;;  %s275_s1 = inlined_call_operand.vmem [shape: bf16[32,32], index: 1, kind: input, shape index: {}]   ;;  %s276_s0 = inlined_call_operand.vmem [shape: bf16[16,32], index: 0, kind: input, shape index: {}]   ;;  %s277_s3 = inlined_call_operand.vmem [shape: bf16[16,32], index: 3, kind: input, shape index: {}]   ;;  %s278_s2 = inlined_call_operand.vmem [shape: f32[1,32], index: 2, kind: input, shape index: {}]   ;;  %s279_s4 = inlined_call_operand.vmem [shape: f32[1,32], index: 4, kind: input, shape index: {}]   ;;  %s280_s5 = inlined_call_operand.vmem [shape: f32[1,32], index: 5, kind: input, shape index: {}]   ;;  %s281_s6 = inlined_call_operand.vmem [shape: bf16[16,32], index: 6, kind: output, shape index: {}]  }
   0x1   :  { %187 = vmatprep.subr.bf16.mxu0 %v204_v0  ;;  %v197_v1 = vld [vmem:[%s275_s1] sm:$0xff]   ;;  %191 = vmatprep.mubr.msk.bf16.mxu0 %vm205_vm1, %v204_v0  ;;  %v198_v3 = vld [vmem:[%s275_s1 + $0x8] sm:$0xff]  }
   0x2   :  { %v57_v2 = vsel %vm52_vm0, %v197_v1, 0  ;;  %v60_v4 = vsel %vm52_vm0, %v198_v3, 0  ;;  %v199_v5 = vld [vmem:[%s276_s0] sm:$0xff]  }
   0x3   :  { %188 = vmatpush3.bf16.xpose.msra.mxu0 %v57_v2  ;;  %v181_v6 = vld [vmem:[%s277_s3] sm:$0xff]  }
   0x4   :  { %189 = vmatprep.subr.bf16.mxu0 %v204_v0  ;;  %v169_v7 = vld [vmem:[%s278_s2] ss:$0 sm:$0xff]  ;;  %v182_v8 = vunpack.c.l.bf16 %v181_v6  ;;  %v183_v12 = vunpack.c.h.bf16 %v181_v6 }
   0x5   :  { %v174_v37 = vld [vmem:[%s279_s4] ss:$0 sm:$0xff] }
   0x6   :  { %v175_v39 = vld [vmem:[%s280_s5] ss:$0 sm:$0xff] }
   0xb   :  { %190 = vmatpush3.bf16.xpose.msra.mxu0 %v60_v4 }
  0x12   :  { %192 = vmatmul.mubr.msk.bf16.vlgmr.msra.gmra.mrb[0].mxu0 %vm52_vm0, %v199_v5 }
  0xe5   :  { %v96_v9 = vpop.f32.mrb[0].mxu0 }
  0xe6   :  { %v97_v10 = vadd.f32 %v169_v7, %v96_v9  ;;  %v193_v11 = vpop.f32.mrb[1].mxu0 }
  0xe7   :  { %v99_v13 = vpop.f32.mrb[2].mxu0 }
  0xe8   :  { %v100_v14 = vadd.f32 %v169_v7, %v99_v13  ;;  %v194_v15 = vpop.f32.mrb[3].mxu0  ;;  %v107_v16 = vadd.f32 %v182_v8, %v97_v10 }
  0xea   :  { %v111_v17 = vsel %vm52_vm0, %v107_v16, 0.0  ;;  %v108_v18 = vadd.f32 %v183_v12, %v100_v14 }
  0xeb   :  { %112 = vadd.xlane.f32.xlu0 %v111_v17 }
  0xec   :  { %v114_v19 = vsel %vm52_vm0, %v108_v18, 0.0 }
  0xef   :  { %115 = vadd.xlane.f32.xlu0 %v114_v19 }
 0x178   :  { %v113_v20 = vpop.xlane.xlu0 %112 }
 0x179   :  { %v118_v21 = vmul.f32 0.03125, %v113_v20 }
 0x17b   :  { %v120_v22 = vsub.f32 %v107_v16, %v118_v21 }
 0x17c   :  { %v116_v23 = vpop.xlane.xlu0 %115 }
 0x17d   :  { %v119_v24 = vmul.f32 0.03125, %v116_v23  ;;  %v122_v25 = vmul.f32 %v120_v22, %v120_v22 }
 0x17f   :  { %v121_v26 = vsub.f32 %v108_v18, %v119_v24  ;;  %v124_v27 = vsel %vm52_vm0, %v122_v25, 0.0 }
 0x180   :  { %125 = vadd.xlane.f32.xlu1 %v124_v27 }
 0x181   :  { %v123_v28 = vmul.f32 %v121_v26, %v121_v26 }
 0x183   :  { %v127_v29 = vsel %vm52_vm0, %v123_v28, 0.0 }
 0x184   :  { %128 = vadd.xlane.f32.xlu1 %v127_v29 }
 0x20d   :  { %v126_v30 = vpop.xlane.xlu1 %125 }
 0x20e   :  { %v130_v31 = vmul.f32 0.03125, %v126_v30 }
 0x210   :  { %v132_v32 = vadd.f32 1e-05, %v130_v31 }
 0x211   :  { %v129_v33 = vpop.xlane.xlu1 %128 }
 0x212   :  { %200 = vrsqrt.f32 %v132_v32  ;;  %v131_v34 = vmul.f32 0.03125, %v129_v33 }
 0x214   :  { %v133_v35 = vadd.f32 1e-05, %v131_v34 }
 0x216   :  { %202 = vrsqrt.f32 %v133_v35 }
 0x21c   :  { %v201_v36 = vpop.eup %200 }
 0x21d   :  { %v136_v38 = vmul.f32 %v201_v36, %v120_v22 }
 0x21f   :  { %v144_v40 = vmul.f32 %v174_v37, %v136_v38 }
 0x220   :  { %v203_v41 = vpop.eup %202 }
 0x221   :  { %v152_v42 = vadd.f32 %v175_v39, %v144_v40  ;;  %v137_v43 = vmul.f32 %v203_v41, %v121_v26 }
 0x223   :  { %v178_v44 = vpack.c.bf16 %v152_v42, %v152_v42  ;;  %v145_v45 = vmul.f32 %v174_v37, %v137_v43 }
 0x225   :  { %163 = vst.msk [vmem:[%s281_s6] sm:$0xf] %vm162_vm2, %v178_v44  ;;  %v153_v46 = vadd.f32 %v175_v39, %v145_v45 }
 0x227   :  { %v179_v47 = vpack.c.bf16 %v153_v46, %v153_v46 }
 0x229   :  { %164 = vst.msk [vmem:[%s281_s6 + $0x4] sm:$0xf] %vm162_vm2, %v179_v47 }

// kernel: seq2seq_forward.38
= control target key start
LH: loop header
LB: loop body
LE: loop exit
PB: predicated region body
PF: predicated region fallthrough
CT: control target
= control target key end

     0   :  { %vm19_vm0 = vcmask 261120   ;;  %v154_v0 = vmov 0.0   ;;  %vm155_vm1 = vmmov 0   ;;  %vm122_vm2 = vcmask 257024   ;;  %s201_s1 = inlined_call_operand.vmem [shape: bf16[32,32], index: 1, kind: input, shape index: {}]   ;;  %s202_s0 = inlined_call_operand.vmem [shape: bf16[16,32], index: 0, kind: input, shape index: {}]   ;;  %s203_s2 = inlined_call_operand.vmem [shape: f32[1,32], index: 2, kind: input, shape index: {}]   ;;  %s204_s3 = inlined_call_operand.vmem [shape: bf16[16,32], index: 3, kind: output, shape index: {}]  }
   0x1   :  { %141 = vmatprep.subr.bf16.mxu0 %v154_v0  ;;  %v151_v1 = vld [vmem:[%s201_s1] sm:$0xff]   ;;  %20 = vst.msk [vmem:[#allocation2] sm:$0xff] %vm19_vm0, %v154_v0  ;;  %21 = vst.msk [vmem:[#allocation2 + $0x8] sm:$0xff] %vm19_vm0, %v154_v0  ;;  %145 = vmatprep.mubr.msk.bf16.mxu0 %vm155_vm1, %v154_v0  ;;  %v152_v3 = vld [vmem:[%s201_s1 + $0x8] sm:$0xff]  }
   0x2   :  { %v50_v2 = vsel %vm19_vm0, %v151_v1, 0  ;;  %v53_v4 = vsel %vm19_vm0, %v152_v3, 0  ;;  %v153_v5 = vld [vmem:[%s202_s0] sm:$0xff]  }
   0x3   :  { %142 = vmatpush3.bf16.xpose.msra.mxu0 %v50_v2  ;;  %v133_v14 = vld [vmem:[%s203_s2] ss:$0 sm:$0xff] }
   0x4   :  { %143 = vmatprep.subr.bf16.mxu0 %v154_v0 }
   0x8   :  { %v22_v6 = vld [vmem:[#allocation2] sm:$0xff]  ;;  %v23_v8 = vld [vmem:[#allocation2 + $0x8] sm:$0xff] }
   0xb   :  { %144 = vmatpush3.bf16.xpose.msra.mxu0 %v53_v4 }
  0x12   :  { %146 = vmatmul.mubr.msk.bf16.vlgmr.msra.gmra.mrb[0].mxu0 %vm19_vm0, %v153_v5 }
  0xe5   :  { %v89_v7 = vpop.f32.mrb[0].mxu0 }
  0xe6   :  { %v96_v9 = vadd.f32 %v89_v7, %v22_v6  ;;  %v147_v10 = vpop.f32.mrb[1].mxu0 }
  0xe7   :  { %v92_v11 = vpop.f32.mrb[2].mxu0 }
  0xe8   :  { %98 = vst.msk [vmem:[#allocation2] sm:$0xff] %vm19_vm0, %v96_v9  ;;  %v97_v12 = vadd.f32 %v92_v11, %v23_v8  ;;  %v148_v13 = vpop.f32.mrb[3].mxu0 }
  0xea   :  { %99 = vst.msk [vmem:[#allocation2 + $0x8] sm:$0xff] %vm19_vm0, %v97_v12 }
  0xef   :  { %v103_v15 = vld [vmem:[#allocation2] sm:$0xff] }
  0xf0   :  { %v112_v16 = vadd.f32 %v133_v14, %v103_v15 }
  0xf1   :  { %v104_v17 = vld [vmem:[#allocation2 + $0x8] sm:$0xff] }
  0xf2   :  { %v136_v18 = vpack.c.bf16 %v112_v16, %v112_v16  ;;  %v113_v19 = vadd.f32 %v133_v14, %v104_v17 }
  0xf4   :  { %123 = vst.msk [vmem:[%s204_s3] sm:$0xf] %vm122_vm2, %v136_v18  ;;  %v137_v20 = vpack.c.bf16 %v113_v19, %v113_v19 }
  0xf6   :  { %124 = vst.msk [vmem:[%s204_s3 + $0x4] sm:$0xf] %vm122_vm2, %v137_v20 }

// kernel: seq2seq_forward.40
= control target key start
LH: loop header
LB: loop body
LE: loop exit
PB: predicated region body
PF: predicated region fallthrough
CT: control target
= control target key end

     0   :  { %s1016_s12 = smov 0   ;;  %s1018_s13 = smov 0   ;;  %s1129_s0 = inlined_call_operand.vmem [shape: bf16[2,8,32], index: 0, kind: input, shape index: {}]   ;;  %s1130_s1 = inlined_call_operand.vmem [shape: bf16[2,8,64], index: 1, kind: input, shape index: {}]   ;;  %s1131_s2 = inlined_call_operand.vmem [shape: f32[2,1,8], index: 2, kind: input, shape index: {}]   ;;  %s1132_s3 = inlined_call_operand.vmem [shape: bf16[2,8,32], index: 3, kind: output, shape index: {}]  }
   0x1   :  { %s1020_s14 = smov 0  }
   0x2 LB: > { %s25_s15 = sadd.s32 1, %s978_s13  ;;  %p819_p0 = scmp.ge.s32.totalorder %s982_s14, 1  ;;  %s982_s14 = sphi %s1020_s14, %s13_s14   ;;  %s978_s13 = sphi %s1018_s13, %s1134_s13   ;;  %s974_s12 = sphi %s1016_s12, %s1133_s12  }
   0x3   : > { %p27_p1 = scmp.ge.s32.totalorder %s25_s15, 2  ;;  %p172_p2 = scmp.lt.s32.totalorder %s982_s14, 3 }
   0x5   : > { %s1136_s15 = smov (%p27_p1, %s25_s15), 0  ;;  %p173_p3 = pnand %p819_p0, %p172_p2 }
   0x6   : > { %p207_p4 = scmp.lt.s32.totalorder (!%p173_p3), %s974_s12, 1  ;;  %v984_v0 = vmov (!%p173_p3), 0.0   ;;  %vm985_vm0 = vmmov (!%p173_p3), 0   ;;  %vm232_vm1 = vcmask (!%p173_p3), 64512   ;;  %s986_s26 = smov (!%p173_p3), 96   ;;  %vm307_vm2 = vcmask (!%p173_p3), 1043456  }
   0x7   : > { %176 = sbr.rel (%p173_p3) target bundleno = 1445 (0x5a5), region = 32  ;;  %858 = vmatprep.subr.bf16.mxu0 (!%p173_p3), %v984_v0  ;;  %860 = vmatprep.mubr.msk.bf16.mxu0 (!%p173_p3), %vm985_vm0, %v984_v0  ;;  %s987_s27 = smov (!%p173_p3), 120   ;;  %vm352_vm3 = vcmask (!%p173_p3), 60416   ;;  %vm476_vm4 = vcmask (!%p173_p3), 126016   ;;  %vm597_vm5 = vcmask (!%p173_p3), 191616   ;;  %vm718_vm6 = vcmask (!%p173_p3), 257216  }
   0x8   : > { %864 = vmatprep.subr.bf16.mxu1 (!%p173_p3), %v984_v0  ;;  %866 = vmatprep.mubr.msk.bf16.mxu1 (!%p173_p3), %vm985_vm0, %v984_v0  ;;  %s988_s28 = smov (!%p173_p3), 112   ;;  %s989_s29 = smov (!%p173_p3), 104  }
   0x9   : > { %s990_s6 = smov (!%p173_p3), 88   ;;  %s991_s7 = smov (!%p173_p3), 72  }
   0xa   : > { %s992_s8 = smov (!%p173_p3), 80   ;;  %s993_s9 = smov (!%p173_p3), 8  }
   0xb   : > { %s994_s10 = smov (!%p173_p3), 16   ;;  %s995_s11 = smov (!%p173_p3), 24  }
   0xe   : > { %s1138_s12 = smov (!%p207_p4, %s974_s12), 1 }
   0xf   : > { %s1040_s16 = sshll.u32 %s1138_s12, 2  ;;  %s220_s25 = scalar_lea.vmem %s1131_s2, %s1138_s12 }
  0x10   : > { %s217_s19 = scalar_lea.vmem %s1130_s1, %s1040_s16  ;;  %s213_s22 = scalar_lea.vmem %s1129_s0, %s1040_s16  ;;  %v1058_v5 = vld [vmem:[%s220_s25] ss:$0 sm:$0xff] }
  0x11   : > { %v230_v1 = vld [vmem:[%s217_s19] sm:$0xf]  ;;  %s1090_s5 = scalar_lea.vmem %s1132_s3, %s1040_s16 }
  0x12   : > { %v237_v2 = vsel %vm232_vm1, %v230_v1, 0  ;;  %v229_v3 = vld [vmem:[%s213_s22] sm:$0xf]  ;;  %v1062_v12 = vcombine.low %v230_v1, %v230_v1 }
  0x13   : > { %859 = vmatpush3.bf16.xpose.msra.mxu0 %v237_v2  ;;  %v827_v13 = vcombine.low %v229_v3, %v229_v3 }
  0x14   : > { %876 = vmatprep.subr.bf16.mxu0 %v984_v0  ;;  %302 = vrot.lane.b32.xlu1 %v1062_v12, %s986_s26 }
  0x18   : > { %359 = vrot.lane.b32.xlu1 %v1062_v12, %s987_s27 }
  0x1a   : > { %861 = vmatmul.mubr.msk.bf16.vlgmr.msra.gmra.mrb[0].mxu0 %vm232_vm1, %v229_v3 }
  0x1b   : > { %878 = vmatprep.mubr.msk.bf16.mxu0 %vm985_vm0, %v984_v0 }
  0x1c   : > { %480 = vrot.lane.b32.xlu1 %v1062_v12, %s988_s28 }
  0x20   : > { %478 = vrot.lane.b32.xlu1 %v827_v13, %s988_s28 }
  0x24   : > { %601 = vrot.lane.b32.xlu1 %v1062_v12, %s989_s29 }
  0x28   : > { %599 = vrot.lane.b32.xlu1 %v827_v13, %s989_s29 }
  0x86   : > { %v303_v19 = vpop.permute.xlu1 %302 }
  0x87   : > { %v309_v20 = vsel %vm307_vm2, %v303_v19, 0 }
  0x88   : > { %865 = vmatpush3.bf16.msra.mxu1 %v309_v20 }
  0x89   : > { %870 = vmatprep.subr.bf16.mxu1 %v984_v0 }
  0x8a   : > { %v360_v23 = vpop.permute.xlu1 %359 }
  0x8b   : > { %v365_v25 = vsel %vm232_vm1, %v360_v23, 0 }
  0x8e   : > { %v481_v27 = vpop.permute.xlu1 %480 }
  0x8f   : > { %v486_v30 = vsel %vm232_vm1, %v481_v27, 0 }
  0x92   : > { %v479_v29 = vpop.permute.xlu1 %478 }
  0x96   : > { %v602_v31 = vpop.permute.xlu1 %601 }
  0x97   : > { %v607_v32 = vsel %vm232_vm1, %v602_v31, 0 }
  0x9a   : > { %v600_v33 = vpop.permute.xlu1 %599 }
  0xed   : > { %v273_v4 = vpop.f32.mrb[0].mxu0 }
  0xee   : > { %v279_v6 = vmul.f32 0.35355338, %v273_v4  ;;  %v862_v7 = vpop.f32.mrb[1].mxu0 }
  0xef   : > { %v276_v8 = vpop.f32.mrb[2].mxu0 }
  0xf0   : > { %v863_v9 = vpop.f32.mrb[3].mxu0  ;;  %v286_v10 = vadd.f32 %v1058_v5, %v279_v6 }
  0xf2   : > { %v287_v11 = vsel %vm232_vm1, %v286_v10, -inf }
  0xf3   : > { %288 = vmax.xlane.f32.xlu0 %v287_v11 }
 0x180   : > { %v289_v14 = vpop.xlane.xlu0 %288 }
 0x181   : > { %v290_v15 = vsub.f32 %v286_v10, %v289_v14 }
 0x183   : > { %v291_v16 = vmul.f32 1.442695, %v290_v15 }
 0x185   : > { %944 = vpow2.f32 %v291_v16 }
 0x18f   : > { %v945_v17 = vpop.eup %944 }
 0x190   : > { %v293_v18 = vsel %vm232_vm1, %v945_v17, 0.0 }
 0x191   : > { %294 = vadd.xlane.f32.xlu0 %v293_v18 }
 0x1a7   : > { %357 = vrot.lane.b32.xlu0 %v827_v13, %s987_s27 }
 0x21e   : > { %v295_v21 = vpop.xlane.xlu0 %294 }
 0x21f   : > { %946 = vrcp.f32 %v295_v21 }
 0x222   : > { %v358_v28 = vpop.permute.xlu0 %357 }
 0x229   : > { %v947_v22 = vpop.eup %946 }
 0x22a   : > { %v297_v24 = vmul.f32 %v947_v22, %v945_v17 }
 0x22c   : > { %v298_v26 = vpack.c.bf16 %v297_v24, %v297_v24 }
 0x22e   : > { %867 = vmatmul.mubr.msk.bf16.vlgmr.msra.gmra.mrb[0].mxu1 %vm232_vm1, %v298_v26 }
 0x22f   : > { %871 = vmatpush3.bf16.xpose.msra.mxu1 %v365_v25  ;;  %872 = vmatprep.mubr.msk.bf16.mxu1 %vm985_vm0, %v984_v0 }
 0x230   : > { %882 = vmatprep.subr.bf16.mxu1 %v984_v0 }
 0x236   : > { %873 = vmatmul.mubr.msk.bf16.vlgmr.msra.gmra.mrb[4].mxu1 %vm232_vm1, %v358_v28 }
 0x237   : > { %883 = vmatpush3.bf16.xpose.msra.mxu1 %v486_v30  ;;  %884 = vmatprep.mubr.msk.bf16.mxu1 %vm985_vm0, %v984_v0 }
 0x238   : > { %894 = vmatprep.subr.bf16.mxu1 %v984_v0 }
 0x23e   : > { %885 = vmatmul.mubr.msk.bf16.vlgmr.msra.gmra.mrb[8].mxu1 %vm232_vm1, %v479_v29 }
 0x23f   : > { %895 = vmatpush3.bf16.xpose.msra.mxu1 %v607_v32  ;;  %896 = vmatprep.mubr.msk.bf16.mxu1 %vm985_vm0, %v984_v0 }
 0x246   : > { %897 = vmatmul.mubr.msk.bf16.vlgmr.msra.gmra.mrb[12].mxu1 %vm232_vm1, %v600_v33 }
 0x301   : > { %v345_v34 = vpop.f32.mrb[0].mxu1 }
 0x302   : > { %v351_v35 = vpack.c.bf16 %v345_v34, %v345_v34  ;;  %v868_v36 = vpop.f32.mrb[1].mxu1 }
 0x303   : > { %v348_v37 = vpop.f32.mrb[2].mxu1 }
 0x304   : > { %353 = vst.msk [vmem:[%s1090_s5] sm:$0xf] %vm352_vm3, %v351_v35  ;;  %v869_v38 = vpop.f32.mrb[3].mxu1 }
 0x309   : > { %v401_v39 = vpop.f32.mrb[4].mxu1 }
 0x30a   : > { %v407_v40 = vmul.f32 0.35355338, %v401_v39  ;;  %v874_v41 = vpop.f32.mrb[5].mxu1 }
 0x30b   : > { %v404_v42 = vpop.f32.mrb[6].mxu1 }
 0x30c   : > { %v875_v43 = vpop.f32.mrb[7].mxu1  ;;  %v408_v44 = vadd.f32 %v1058_v5, %v407_v40 }
 0x30e   : > { %v409_v45 = vsel %vm232_vm1, %v408_v44, -inf }
 0x30f   : > { %410 = vmax.xlane.f32.xlu1 %v409_v45 }
 0x311   : > { %v522_v46 = vpop.f32.mrb[8].mxu1 }
 0x312   : > { %v528_v47 = vmul.f32 0.35355338, %v522_v46  ;;  %v886_v48 = vpop.f32.mrb[9].mxu1 }
 0x313   : > { %v525_v49 = vpop.f32.mrb[10].mxu1 }
 0x314   : > { %v887_v50 = vpop.f32.mrb[11].mxu1  ;;  %v529_v51 = vadd.f32 %v1058_v5, %v528_v47 }
 0x316   : > { %v530_v52 = vsel %vm232_vm1, %v529_v51, -inf }
 0x317   : > { %531 = vmax.xlane.f32.xlu0 %v530_v52 }
 0x319   : > { %v643_v53 = vpop.f32.mrb[12].mxu1 }
 0x31a   : > { %v649_v54 = vmul.f32 0.35355338, %v643_v53  ;;  %v898_v55 = vpop.f32.mrb[13].mxu1 }
 0x31b   : > { %v646_v56 = vpop.f32.mrb[14].mxu1 }
 0x31c   : > { %v899_v57 = vpop.f32.mrb[15].mxu1  ;;  %v650_v58 = vadd.f32 %v1058_v5, %v649_v54 }
 0x31e   : > { %v651_v59 = vsel %vm232_vm1, %v650_v58, -inf }
 0x31f   : > { %652 = vmax.xlane.f32.xlu1 %v651_v59 }
 0x330   : > { %421 = vrot.lane.b32.xlu1 %v1062_v12, %s990_s6 }
 0x39c   : > { %v411_v60 = vpop.xlane.xlu1 %410 }
 0x39d   : > { %v412_v61 = vsub.f32 %v408_v44, %v411_v60 }
 0x39f   : > { %v413_v62 = vmul.f32 1.442695, %v412_v61 }
 0x3a1   : > { %948 = vpow2.f32 %v413_v62 }
 0x3a4   : > { %v532_v63 = vpop.xlane.xlu0 %531 }
 0x3a5   : > { %v533_v1 = vsub.f32 %v529_v51, %v532_v63 }
 0x3a7   : > { %v534_v2 = vmul.f32 1.442695, %v533_v1 }
 0x3a9   : > { %950 = vpow2.f32 %v534_v2 }
 0x3ab   : > { %v949_v3 = vpop.eup %948 }
 0x3ac   : > { %v653_v4 = vpop.xlane.xlu1 %652  ;;  %v415_v6 = vsel %vm232_vm1, %v949_v3, 0.0 }
 0x3ad   : > { %v654_v7 = vsub.f32 %v650_v58, %v653_v4  ;;  %416 = vadd.xlane.f32.xlu0 %v415_v6 }
 0x3af   : > { %v655_v5 = vmul.f32 1.442695, %v654_v7 }
 0x3b0   : > { %v422_v8 = vpop.permute.xlu1 %421 }
 0x3b1   : > { %952 = vpow2.f32 %v655_v5  ;;  %v427_v9 = vsel %vm307_vm2, %v422_v8, 0 }
 0x3b2   : > { %877 = vmatpush3.bf16.msra.mxu0 %v427_v9 }
 0x3b3   : > { %v951_v10 = vpop.eup %950  ;;  %888 = vmatprep.subr.bf16.mxu0 %v984_v0 }
 0x3b4   : > { %v536_v11 = vsel %vm232_vm1, %v951_v10, 0.0 }
 0x3b5   : > { %537 = vadd.xlane.f32.xlu1 %v536_v11 }
 0x3bb   : > { %v953_v13 = vpop.eup %952 }
 0x3bc   : > { %v657_v14 = vsel %vm232_vm1, %v953_v13, 0.0 }
 0x3bd   : > { %658 = vadd.xlane.f32.xlu0 %v657_v14 }
 0x3c6   : > { %663 = vrot.lane.b32.xlu1 %v1062_v12, %s991_s7 }
 0x3d3   : > { %542 = vrot.lane.b32.xlu0 %v1062_v12, %s992_s8 }
 0x43a   : > { %v417_v15 = vpop.xlane.xlu0 %416 }
 0x43b   : > { %954 = vrcp.f32 %v417_v15 }
 0x442   : > { %v538_v16 = vpop.xlane.xlu1 %537 }
 0x443   : > { %956 = vrcp.f32 %v538_v16 }
 0x445   : > { %v955_v17 = vpop.eup %954 }
 0x446   : > { %v419_v18 = vmul.f32 %v955_v17, %v949_v3  ;;  %v664_v24 = vpop.permute.xlu1 %663 }
 0x447   : > { %v669_v26 = vsel %vm307_vm2, %v664_v24, 0 }
 0x448   : > { %v420_v19 = vpack.c.bf16 %v419_v18, %v419_v18 }
 0x44a   : > { %v659_v20 = vpop.xlane.xlu0 %658  ;;  %879 = vmatmul.mubr.msk.bf16.vlgmr.msra.gmra.mrb[4].mxu0 %vm232_vm1, %v420_v19 }
 0x44b   : > { %958 = vrcp.f32 %v659_v20  ;;  %890 = vmatprep.mubr.msk.bf16.mxu0 %vm985_vm0, %v984_v0 }
 0x44d   : > { %v957_v21 = vpop.eup %956 }
 0x44e   : > { %v540_v22 = vmul.f32 %v957_v21, %v951_v10  ;;  %v543_v23 = vpop.permute.xlu0 %542 }
 0x44f   : > { %v548_v12 = vsel %vm307_vm2, %v543_v23, 0 }
 0x450   : > { %889 = vmatpush3.bf16.msra.mxu0 %v548_v12  ;;  %v541_v25 = vpack.c.bf16 %v540_v22, %v540_v22 }
 0x451   : > { %900 = vmatprep.subr.bf16.mxu0 %v984_v0 }
 0x453   : > { %891 = vmatmul.mubr.msk.bf16.vlgmr.msra.gmra.mrb[8].mxu0 %vm232_vm1, %v541_v25 }
 0x454   : > { %901 = vmatpush3.bf16.msra.mxu0 %v669_v26  ;;  %902 = vmatprep.mubr.msk.bf16.mxu0 %vm985_vm0, %v984_v0 }
 0x455   : > { %v959_v27 = vpop.eup %958 }
 0x456   : > { %v661_v28 = vmul.f32 %v959_v27, %v953_v13 }
 0x458   : > { %v662_v29 = vpack.c.bf16 %v661_v28, %v661_v28 }
 0x45b   : > { %903 = vmatmul.mubr.msk.bf16.vlgmr.msra.gmra.mrb[12].mxu0 %vm232_vm1, %v662_v29 }
 0x51d   : > { %v463_v30 = vpop.f32.mrb[4].mxu0 }
 0x51e   : > { %v839_v31 = vpack.c.bf16 %v463_v30, %v463_v30  ;;  %v880_v32 = vpop.f32.mrb[5].mxu0 }
 0x51f   : > { %v466_v33 = vpop.f32.mrb[6].mxu0 }
 0x520   : > { %473 = vrot.lane.b32.xlu1 %v839_v31, %s993_s9  ;;  %v881_v34 = vpop.f32.mrb[7].mxu0 }
 0x526   : > { %v584_v35 = vpop.f32.mrb[8].mxu0 }
 0x527   : > { %v840_v36 = vpack.c.bf16 %v584_v35, %v584_v35  ;;  %v892_v37 = vpop.f32.mrb[9].mxu0 }
 0x528   : > { %v587_v38 = vpop.f32.mrb[10].mxu0 }
 0x529   : > { %594 = vrot.lane.b32.xlu0 %v840_v36, %s994_s10  ;;  %v893_v0 = vpop.f32.mrb[11].mxu0 }
 0x52e   : > { %v705_v39 = vpop.f32.mrb[12].mxu0 }
 0x52f   : > { %v841_v40 = vpack.c.bf16 %v705_v39, %v705_v39  ;;  %v904_v41 = vpop.f32.mrb[13].mxu0 }
 0x530   : > { %v708_v42 = vpop.f32.mrb[14].mxu0 }
 0x531   : > { %715 = vrot.lane.b32.xlu1 %v841_v40, %s995_s11  ;;  %v905_v43 = vpop.f32.mrb[15].mxu0 }
 0x592   : > { %v474_v44 = vpop.permute.xlu1 %473 }
 0x593   : > { %477 = vst.msk [vmem:[%s1090_s5] sm:$0xf] %vm476_vm4, %v474_v44 }
 0x59b   : > { %v595_v45 = vpop.permute.xlu0 %594 }
 0x59c   : > { %598 = vst.msk [vmem:[%s1090_s5] sm:$0xf] %vm597_vm5, %v595_v45 }
 0x5a3   : > { %v716_v46 = vpop.permute.xlu1 %715 }
 0x5a4   : > { %719 = vst.msk [vmem:[%s1090_s5] sm:$0xf] %vm718_vm6, %v716_v46 }
 0x5a5 PF: > { %s13_s14 = sadd.s32 1, %s982_s14   ;;  %s1133_s12 = smov %s978_s13 }
 0x5a6   : > { %p10_p5 = scmp.ge.s32.totalorder %s13_s14, 4   ;;  %s1134_s13 = smov %s1136_s15 }
 0x5a8   :  { %12 = sbr.rel (!%p10_p5) target bundleno = 2 (0x2), region = 68 }

// kernel: seq2seq_forward.51
= control target key start
LH: loop header
LB: loop body
LE: loop exit
PB: predicated region body
PF: predicated region fallthrough
CT: control target
= control target key end

     0   :  { %v194_v1 = vmov 0.0   ;;  %vm50_vm0 = vcmask 261120   ;;  %vm195_vm1 = vmmov 0   ;;  %vm20_vm2 = vcmask 326656   ;;  %s256_s0 = inlined_call_operand.vmem [shape: bf16[16,32], index: 0, kind: input, shape index: {}]   ;;  %s257_s1 = inlined_call_operand.vmem [shape: bf16[40,32], index: 1, kind: input, shape index: {}]   ;;  %s258_s2 = inlined_call_operand.vmem [shape: f32[1,40], index: 2, kind: input, shape index: {}]   ;;  %s259_s3 = inlined_call_operand.hbm [shape: f32[16,40], index: 3, kind: output, shape index: {}]  }
   0x1   :  { %v166_v0 = vld [vmem:[%s257_s1] sm:$0xff]   ;;  %151 = vmatprep.subr.bf16.mxu0 %v194_v1  ;;  %157 = vmatprep.mubr.msk.bf16.mxu0 %vm195_vm1, %v194_v1  ;;  %v167_v3 = vld [vmem:[%s257_s1 + $0x8] sm:$0xff]  }
   0x2   :  { %v55_v2 = vsel %vm50_vm0, %v166_v0, 0 }
   0x3   :  { %152 = vmatpush3.bf16.xpose.msra.mxu0 %v55_v2 }
   0x4   :  { %153 = vmatprep.subr.bf16.mxu0 %v194_v1 }
   0x5   :  { %8 = vsyncpa [#allocation4], 0  ;;  %21 = vst.msk [vmem:[#allocation2] sm:$0xff] %vm20_vm2, %v194_v1  ;;  %v58_v4 = vsel %vm50_vm0, %v167_v3, 0  ;;  %v168_v5 = vld [vmem:[%s257_s1 + $0x10] ss:$0 sps:$4 sm:$0xff]  }
   0x6   :  { %22 = vst.msk [vmem:[#allocation2 + $0x8] sm:$0xff] %vm20_vm2, %v194_v1  ;;  %v61_v6 = vsel %vm50_vm0, %v168_v5, 0  ;;  %v169_v7 = vld [vmem:[%s256_s0] sm:$0xff]   ;;  %s196_s21 = smov [#allocation3]  }
   0x7   :  { %v146_v16 = vld [vmem:[%s258_s2] ss:$0 sm:$0xff]  ;;  %s130_s0 = sshll.u32 %s196_s21, 4  ;;  %s131_s0 = int_to_ptr.vmem [resolvable:$true] %s130_s0 }
   0x8   :  { %s170_s22 = scalar_lea.vmem %s131_s0, 256  ;;  %p175_p1 = scmp.lt.s32.totalorder %s131_s0, %s131_s0 }
   0x9   :  { %p171_p0 = scmp.ne.s32.totalorder %s131_s0, %s170_s22  ;;  %p176_p2 = scmp.lt.s32.totalorder %s170_s22, %s170_s22 }
   0xb   :  { %154 = vmatpush3.bf16.xpose.msra.mxu0 %v58_v4  ;;  %p177_p3 = por %p176_p2, %p175_p1 }
   0xc   :  { %155 = vmatprep.subr.bf16.mxu0 %v194_v1  ;;  %v23_v8 = vld [vmem:[#allocation2] sm:$0xff] }
   0xd   :  { %v24_v10 = vld [vmem:[#allocation2 + $0x8] sm:$0xff]  ;;  %p178_p4 = pnand %p177_p3, %p171_p0 }
  0x13   :  { %156 = vmatpush3.bf16.xpose.msra.mxu0 %v61_v6 }
  0x1a   :  { %158 = vmatmul.mubr.msk.bf16.vlgmr.msra.gmra.mrb[0].mxu0 %vm50_vm0, %v169_v7 }
  0xed   :  { %v97_v9 = vpop.f32.mrb[0].mxu0 }
  0xee   :  { %v104_v11 = vadd.f32 %v97_v9, %v23_v8  ;;  %v159_v12 = vpop.f32.mrb[1].mxu0 }
  0xef   :  { %v100_v13 = vpop.f32.mrb[2].mxu0 }
  0xf0   :  { %107 = vst.msk [vmem:[#allocation2] sm:$0xff] %vm20_vm2, %v104_v11  ;;  %v105_v14 = vadd.f32 %v100_v13, %v24_v10  ;;  %v160_v15 = vpop.f32.mrb[3].mxu0 }
  0xf2   :  { %108 = vst.msk [vmem:[#allocation2 + $0x8] sm:$0xff] %vm20_vm2, %v105_v14 }
  0xf7   :  { %v112_v17 = vld [vmem:[#allocation2] sm:$0xff] }
  0xf8   :  { %v121_v18 = vadd.f32 %v146_v16, %v112_v17 }
  0xf9   :  { %v113_v19 = vld [vmem:[#allocation2 + $0x8] sm:$0xff] }
  0xfa   :  { %v122_v20 = vadd.f32 %v146_v16, %v113_v19  ;;  %123 = vst.msk [vmem:[#allocation3] sm:$0xff] %vm20_vm2, %v121_v18 }
  0xfc   :  { %124 = vst.msk [vmem:[#allocation3 + $0x8] sm:$0xff] %vm20_vm2, %v122_v20 }
  0xfd   :  { %181 = shalt.err (!%p178_p4)
}
  0xfe   :  { %s182_s24 = scalar_lea.hbm %s259_s3, 256 }
  0xff   :  { %p183_p5 = scmp.ne.s32.totalorder %s259_s3, %s182_s24  ;;  %p186_p6 = scmp.lt.u32.totalorder %s182_s24, %s259_s3 }
 0x101   :  { %p188_p7 = pnand %p186_p6, %p183_p5 }
 0x103   :  { %191 = shalt.err (!%p188_p7)
}
 0x104   :  { %s197_s29 = smov 128   ;;  %s198_s30 = smov 8  }
 0x105   :  { %136 = dma.vmem_to_hbm [thread:$0]  %s131_s0, 256, %s259_s3, [#allocation4], %s197_s29, %s197_s29, %s198_s30  }
 0x106   :  { %192 = dma.done.wait [#allocation4], 256  }
 0x107   :  { %193 = vsyncadd [#allocation4], 4294967040 }
 0x108   :  { %140 = vsyncpa [#allocation4], 1 }

// kernel: seq2seq_forward.42
= control target key start
LH: loop header
LB: loop body
LE: loop exit
PB: predicated region body
PF: predicated region fallthrough
CT: control target
= control target key end

     0   :  { %vm31_vm0 = vcmask 261120   ;;  %v344_v0 = vmov 0.0   ;;  %vm345_vm1 = vmmov 0   ;;  %vm152_vm2 = vcmask 523264   ;;  %s441_s1 = inlined_call_operand.vmem [shape: bf16[64,32], index: 1, kind: input, shape index: {}]   ;;  %s442_s3 = inlined_call_operand.vmem [shape: bf16[32,64], index: 3, kind: input, shape index: {}]   ;;  %s443_s0 = inlined_call_operand.vmem [shape: bf16[16,32], index: 0, kind: input, shape index: {}]   ;;  %s444_s2 = inlined_call_operand.vmem [shape: f32[1,64], index: 2, kind: input, shape index: {}]   ;;  %s445_s4 = inlined_call_operand.vmem [shape: f32[1,32], index: 4, kind: input, shape index: {}]   ;;  %s446_s5 = inlined_call_operand.vmem [shape: f32[1,32], index: 5, kind: input, shape index: {}]   ;;  %s447_s6 = inlined_call_operand.vmem [shape: f32[1,32], index: 6, kind: input, shape index: {}]   ;;  %s448_s7 = inlined_call_operand.vmem [shape: bf16[16,32], index: 7, kind: output, shape index: {}]  }
   0x1   :  { %310 = vmatprep.subr.bf16.mxu0 %v344_v0  ;;  %v332_v1 = vld [vmem:[%s441_s1] sm:$0xff]   ;;  %32 = vst.msk [vmem:[#allocation2] sm:$0xff] %vm31_vm0, %v344_v0  ;;  %33 = vst.msk [vmem:[#allocation2 + $0x8] sm:$0xff] %vm31_vm0, %v344_v0  ;;  %318 = vmatprep.mubr.msk.bf16.mxu0 %vm345_vm1, %v344_v0  ;;  %v333_v3 = vld [vmem:[%s441_s1 + $0x8] sm:$0xff]   ;;  %vm278_vm3 = vcmask 257024  }
   0x2   :  { %322 = vmatprep.subr.bf16.mxu1 %v344_v0  ;;  %326 = vmatprep.mubr.msk.bf16.mxu1 %vm345_vm1, %v344_v0  ;;  %v81_v2 = vsel %vm31_vm0, %v332_v1, 0  ;;  %v337_v4 = vld [vmem:[%s442_s3] sm:$0xff]   ;;  %v84_v6 = vsel %vm31_vm0, %v333_v3, 0  ;;  %v334_v7 = vld [vmem:[%s441_s1 + $0x10] sm:$0xff]   ;;  %v335_v9 = vld [vmem:[%s441_s1 + $0x18] sm:$0xff]  }
   0x3   :  { %311 = vmatpush3.bf16.xpose.msra.mxu0 %v81_v2  ;;  %v157_v5 = vsel %vm152_vm2, %v337_v4, 0  ;;  %v87_v8 = vsel %vm31_vm0, %v334_v7, 0  ;;  %v90_v10 = vsel %vm31_vm0, %v335_v9, 0  ;;  %v34_v11 = vld [vmem:[%s443_s0] sm:$0xff]   ;;  %v338_v12 = vld [vmem:[%s442_s3 + $0x8] sm:$0xff]  }
   0x4   :  { %312 = vmatprep.subr.bf16.mxu0 %v344_v0  ;;  %323 = vmatpush3.bf16.xpose.msra.mxu1 %v157_v5  ;;  %v160_v13 = vsel %vm152_vm2, %v338_v12, 0  ;;  %v285_v14 = vld [vmem:[%s444_s2] ss:$0 sm:$0xff]  ;;  %v210_v32 = vunpack.c.l.bf16 %v34_v11  ;;  %v211_v33 = vunpack.c.h.bf16 %v34_v11 }
   0x5   :  { %324 = vmatprep.subr.bf16.mxu1 %v344_v0  ;;  %v295_v35 = vld [vmem:[%s445_s4] ss:$0 sm:$0xff] }
   0x6   :  { %v296_v60 = vld [vmem:[%s446_s5] ss:$0 sm:$0xff] }
   0x7   :  { %v297_v62 = vld [vmem:[%s447_s6] ss:$0 sm:$0xff] }
   0x8   :  { %v135_v24 = vld [vmem:[#allocation2] sm:$0xff]  ;;  %v136_v26 = vld [vmem:[#allocation2 + $0x8] sm:$0xff] }
   0xb   :  { %313 = vmatpush3.bf16.xpose.msra.mxu0 %v84_v6 }
   0xc   :  { %314 = vmatprep.subr.bf16.mxu0 %v344_v0  ;;  %325 = vmatpush3.bf16.xpose.msra.mxu1 %v160_v13 }
  0x13   :  { %315 = vmatpush3.bf16.xpose.msra.mxu0 %v87_v8 }
  0x14   :  { %316 = vmatprep.subr.bf16.mxu0 %v344_v0 }
  0x1b   :  { %317 = vmatpush3.bf16.xpose.msra.mxu0 %v90_v10 }
  0x22   :  { %319 = vmatmul.mubr.msk.bf16.vlgmr.msra.gmra.mrb[0].mxu0 %vm31_vm0, %v34_v11 }
  0xf5   :  { %v126_v15 = vpop.f32.mrb[0].mxu0 }
  0xf6   :  { %v127_v16 = vadd.f32 %v285_v14, %v126_v15  ;;  %v320_v17 = vpop.f32.mrb[1].mxu0 }
  0xf7   :  { %v129_v18 = vpop.f32.mrb[2].mxu0 }
  0xf8   :  { %v130_v19 = vadd.f32 %v285_v14, %v129_v18  ;;  %v321_v20 = vpop.f32.mrb[3].mxu0  ;;  %v133_v21 = vmax.f32 %v127_v16, 0.0 }
  0xfa   :  { %v134_v22 = vmax.f32 %v130_v19, 0.0 }
  0xfc   :  { %v141_v23 = vpack.c.bf16 %v134_v22, %v133_v21 }
  0xfe   :  { %327 = vmatmul.mubr.msk.bf16.vlgmr.msra.gmra.mrb[0].mxu1 %vm152_vm2, %v141_v23 }
 0x1d1   :  { %v196_v25 = vpop.f32.mrb[0].mxu1 }
 0x1d2   :  { %v203_v27 = vadd.f32 %v196_v25, %v135_v24  ;;  %v328_v28 = vpop.f32.mrb[1].mxu1 }
 0x1d3   :  { %v199_v29 = vpop.f32.mrb[2].mxu1 }
 0x1d4   :  { %205 = vst.msk [vmem:[#allocation2] sm:$0xff] %vm31_vm0, %v203_v27  ;;  %v204_v30 = vadd.f32 %v199_v29, %v136_v26  ;;  %v329_v31 = vpop.f32.mrb[3].mxu1 }
 0x1d6   :  { %206 = vst.msk [vmem:[#allocation2 + $0x8] sm:$0xff] %vm31_vm0, %v204_v30 }
 0x1db   :  { %v212_v34 = vld [vmem:[#allocation2] sm:$0xff] }
 0x1dc   :  { %v214_v36 = vadd.f32 %v212_v34, %v210_v32 }
 0x1dd   :  { %v213_v37 = vld [vmem:[#allocation2 + $0x8] sm:$0xff] }
 0x1de   :  { %v223_v38 = vadd.f32 %v295_v35, %v214_v36  ;;  %v215_v39 = vadd.f32 %v213_v37, %v211_v33 }
 0x1e0   :  { %v227_v40 = vsel %vm31_vm0, %v223_v38, 0.0  ;;  %v224_v41 = vadd.f32 %v295_v35, %v215_v39 }
 0x1e1   :  { %228 = vadd.xlane.f32.xlu0 %v227_v40 }
 0x1e2   :  { %v230_v42 = vsel %vm31_vm0, %v224_v41, 0.0 }
 0x1e5   :  { %231 = vadd.xlane.f32.xlu0 %v230_v42 }
 0x26e   :  { %v229_v43 = vpop.xlane.xlu0 %228 }
 0x26f   :  { %v234_v44 = vmul.f32 0.03125, %v229_v43 }
 0x271   :  { %v236_v45 = vsub.f32 %v223_v38, %v234_v44 }
 0x272   :  { %v232_v46 = vpop.xlane.xlu0 %231 }
 0x273   :  { %v235_v47 = vmul.f32 0.03125, %v232_v46  ;;  %v238_v48 = vmul.f32 %v236_v45, %v236_v45 }
 0x275   :  { %v237_v49 = vsub.f32 %v224_v41, %v235_v47  ;;  %v240_v50 = vsel %vm31_vm0, %v238_v48, 0.0 }
 0x276   :  { %241 = vadd.xlane.f32.xlu1 %v240_v50 }
 0x277   :  { %v239_v51 = vmul.f32 %v237_v49, %v237_v49 }
 0x279   :  { %v243_v52 = vsel %vm31_vm0, %v239_v51, 0.0 }
 0x27a   :  { %244 = vadd.xlane.f32.xlu1 %v243_v52 }
 0x303   :  { %v242_v53 = vpop.xlane.xlu1 %241 }
 0x304   :  { %v246_v54 = vmul.f32 0.03125, %v242_v53 }
 0x306   :  { %v248_v55 = vadd.f32 1e-05, %v246_v54 }
 0x307   :  { %v245_v56 = vpop.xlane.xlu1 %244 }
 0x308   :  { %340 = vrsqrt.f32 %v248_v55  ;;  %v247_v57 = vmul.f32 0.03125, %v245_v56 }
 0x30a   :  { %v249_v58 = vadd.f32 1e-05, %v247_v57 }
 0x30c   :  { %342 = vrsqrt.f32 %v249_v58 }
 0x312   :  { %v341_v59 = vpop.eup %340 }
 0x313   :  { %v252_v61 = vmul.f32 %v341_v59, %v236_v45 }
 0x315   :  { %v260_v63 = vmul.f32 %v296_v60, %v252_v61 }
 0x316   :  { %v343_v0 = vpop.eup %342 }
 0x317   :  { %v268_v1 = vadd.f32 %v297_v62, %v260_v63  ;;  %v253_v2 = vmul.f32 %v343_v0, %v237_v49 }
 0x319   :  { %v300_v3 = vpack.c.bf16 %v268_v1, %v268_v1  ;;  %v261_v4 = vmul.f32 %v296_v60, %v253_v2 }
 0x31b   :  { %279 = vst.msk [vmem:[%s448_s7] sm:$0xf] %vm278_vm3, %v300_v3  ;;  %v269_v5 = vadd.f32 %v297_v62, %v261_v4 }
 0x31d   :  { %v301_v6 = vpack.c.bf16 %v269_v5, %v269_v5 }
 0x31f   :  { %280 = vst.msk [vmem:[%s448_s7 + $0x4] sm:$0xf] %vm278_vm3, %v301_v6 }

</bundles_post_ra>
